<compile_context>
chip_gen: v7x
topology: tpu7x:2x2x1
jax: 0.10.0
libtpu: 0.0.40
codegen_flags: <defaults>
</compile_context>

<pallas_src>
import functools
import math

import numpy as np
import jax
import jax.numpy as jnp
from jax.experimental import pallas as pl
from jax.experimental.pallas import tpu as pltpu

# --------------------------------------------------------------------------
# Model config (small synthetic SAM-like components)
# --------------------------------------------------------------------------
D = 32                  # embedding / transformer dim
PATCH = 8               # patch size of the ViT image encoder
IMG = 32                # input image resolution
GRID = IMG // PATCH     # 4x4 image-embedding grid
HEADS = 2
N_MASK_TOKENS = 4       # SAM: num_multimask_outputs(3) + 1


# --------------------------------------------------------------------------
# In-kernel helpers (traced inside the Pallas kernel)
# --------------------------------------------------------------------------
def _ln(x, g, b, eps):
    mu = jnp.mean(x, axis=-1, keepdims=True)
    var = jnp.mean(jnp.square(x - mu), axis=-1, keepdims=True)
    return (x - mu) * jax.lax.rsqrt(var + eps) * g + b


def _gelu(x):
    # TODO(synk): PyTorch nn.GELU is erf-based; tanh approximation kept (EUP-friendly).
    return jax.nn.gelu(x, approximate=True)


def _mm(x, w):
    return jnp.dot(x, w, preferred_element_type=jnp.float32)


def _qkt(q, k):
    # q @ k.T without materializing a transpose.
    return jax.lax.dot_general(q, k, (((1,), (1,)), ((), ())),
                               preferred_element_type=jnp.float32)


# Weight / constant inputs of the fused kernel, in call order.
_W_NAMES = (
    # image encoder
    "pos_embed", "patch_w", "patch_b", "enc_g1", "enc_b1", "enc_wqkv", "enc_bqkv",
    "enc_wo", "enc_bo", "enc_g2", "enc_b2", "enc_m1w", "enc_m1b", "enc_m2w", "enc_m2b",
    "neck_w", "neck_b", "neck_g", "neck_beta", "no_mask", "dense_pe",
    # mask decoder
    "dec_W", "dec_B", "dec_G", "dec_Bn",
    "dec_m1w", "dec_m1b", "dec_m2w", "dec_m2b",
    "up1_w", "up1_b", "gavg", "upln_g", "upln_b", "up2_w", "up2_b",
    "hyp_w1", "hyp_b1", "hyp_w2", "hyp_b2", "hyp_w3t", "hyp_b3t",
    # constant matmuls: channel pooling + blocked->flat permutation + bilinear resize
    "pq", "rsel", "ones_row", "kmat",
)


# --------------------------------------------------------------------------
# The single fused kernel: one grid step per batch element
# --------------------------------------------------------------------------
def _medsam_kernel(patches_ref, tokens_ref, *refs, heads):
    w = dict(zip(_W_NAMES, refs))
    out_ref = refs[len(_W_NAMES)]

    d = D
    dh = d // heads
    scale = 1.0 / math.sqrt(dh)

    # ---------------- image encoder: patch embed -> ViT block -> neck ----------------
    x = _mm(patches_ref[0], w["patch_w"][...]) + w["patch_b"][...]       # [16, D]
    x = x + w["pos_embed"][...]

    h = _ln(x, w["enc_g1"][...], w["enc_b1"][...], 1e-5)
    qkv = _mm(h, w["enc_wqkv"][...]) + w["enc_bqkv"][...]                # [16, 3D]
    attn_out = None
    for hh in range(heads):
        c0 = hh * dh
        q = qkv[:, c0:c0 + dh]
        k = qkv[:, d + c0:d + c0 + dh]
        v = qkv[:, 2 * d + c0:2 * d + c0 + dh]
        p = jax.nn.softmax(_qkt(q, k) * scale, axis=-1)
        # concat(heads) @ Wo  ==  sum_h head_h @ Wo[h*dh:(h+1)*dh, :]
        contrib = _mm(_mm(p, v), w["enc_wo"][c0:c0 + dh, :])
        attn_out = contrib if attn_out is None else attn_out + contrib
    x = x + attn_out + w["enc_bo"][...]

    h = _ln(x, w["enc_g2"][...], w["enc_b2"][...], 1e-5)
    h = _gelu(_mm(h, w["enc_m1w"][...]) + w["enc_m1b"][...])
    x = x + _mm(h, w["enc_m2w"][...]) + w["enc_m2b"][...]

    x = _mm(x, w["neck_w"][...]) + w["neck_b"][...]
    emb = _ln(x, w["neck_g"][...], w["neck_beta"][...], 1e-6)           # [16, D]

    # ---------------- mask decoder: TwoWay block + final token->image attn -----------
    keys = emb + w["no_mask"][...]          # dense prompt embedding (masks=None)
    pos = w["dense_pe"][...]                # [16, D] frozen Fourier dense PE
    tokens = tokens_ref[0]                  # [n_tok, D]
    point_pe = tokens

    dW, dB = w["dec_W"], w["dec_B"]         # refs [16,D,D]/[16,D]: static per-use slices
    dG, dBn = w["dec_G"], w["dec_Bn"]       # refs [5,D]

    def attn(blk, qx, kx, vx):
        q = _mm(qx, dW[blk * 4 + 0]) + dB[blk * 4 + 0:blk * 4 + 1, :]
        k = _mm(kx, dW[blk * 4 + 1]) + dB[blk * 4 + 1:blk * 4 + 2, :]
        v = _mm(vx, dW[blk * 4 + 2]) + dB[blk * 4 + 2:blk * 4 + 3, :]
        wo = dW[blk * 4 + 3]
        o = None
        for hh in range(heads):
            c0 = hh * dh
            p = jax.nn.softmax(_qkt(q[:, c0:c0 + dh], k[:, c0:c0 + dh]) * scale, axis=-1)
            contrib = _mm(_mm(p, v[:, c0:c0 + dh]), wo[c0:c0 + dh, :])
            o = contrib if o is None else o + contrib
        return o + dB[blk * 4 + 3:blk * 4 + 4, :]

    def norm(xx, i):
        return _ln(xx, dG[i:i + 1, :], dBn[i:i + 1, :], 1e-5)

    queries = attn(0, tokens, tokens, tokens)          # self attn (skip_first_layer_pe)
    queries = norm(queries, 0)
    q = queries + point_pe
    k = keys + pos
    queries = queries + attn(1, q, k, keys)            # token -> image
    queries = norm(queries, 1)
    h = jnp.maximum(_mm(queries, w["dec_m1w"][...]) + w["dec_m1b"][...], 0.0)
    h = _mm(h, w["dec_m2w"][...]) + w["dec_m2b"][...]
    queries = norm(queries + h, 2)
    q = queries + point_pe
    k = keys + pos
    keys = keys + attn(2, k, q, queries)               # image -> token
    keys = norm(keys, 3)
    q = queries + point_pe
    k = keys + pos
    queries = queries + attn(3, q, k, keys)            # final token -> image
    queries = norm(queries, 4)

    # ------- output upscaling: 2x ConvTranspose2d(k=2,s=2) in a sub-pixel blocked
    #         layout (row = coarse cell, cols = (sub-pixel, channel)).  The per-
    #         sub-pixel LayerNorm2d uses a block-diagonal group-average matmul
    #         (no lane slicing / concatenation). -------
    u1 = _mm(keys, w["up1_w"][...]) + w["up1_b"][...]             # [16, 4*c1]
    gavg = w["gavg"][...]
    mu = _mm(u1, gavg)
    cen = u1 - mu
    var = _mm(cen * cen, gavg)
    u1 = _gelu(cen * jax.lax.rsqrt(var + 1e-6) * w["upln_g"][...] + w["upln_b"][...])
    u2 = _gelu(_mm(u1, w["up2_w"][...]) + w["up2_b"][...])        # [16, 16*c2]

    # ------- hypernetwork MLP for mask token 0 (multimask_output=False) -------
    t0 = queries[1:2, :]                                          # static slice, [1, D]
    t0 = jnp.maximum(_mm(t0, w["hyp_w1"][...]) + w["hyp_b1"][...], 0.0)
    t0 = jnp.maximum(_mm(t0, w["hyp_w2"][...]) + w["hyp_b2"][...], 0.0)
    hyp = _mm(t0, w["hyp_w3t"][...]) + w["hyp_b3t"][...]          # [1, 16*c2] pre-tiled

    # ------- low-res mask: channel pooling + blocked->row-major flatten, both as
    #         constant matmuls (no in-kernel reshape / relayout), then bilinear resize
    #         as one [1,256]@[256,1024] matmul -> lane-dense store. -------
    prod = u2 * hyp                                               # [16, 16*c2]
    flat = _mm(w["ones_row"][...],
               _mm(prod, w["pq"][...]) * w["rsel"][...])          # [1, 256]
    out_ref[0] = _mm(flat, w["kmat"][...])                        # [1, IMG*IMG]


def _medsam_call(packed, patches, tokens, batch):
    seq = GRID * GRID
    n_tok = tokens.shape[1]
    weight_args = tuple(packed[n] for n in _W_NAMES)
    in_specs = [
        pl.BlockSpec((1, seq, 3 * PATCH * PATCH), lambda b: (b, 0, 0)),
        pl.BlockSpec((1, n_tok, D), lambda b: (b, 0, 0)),
    ] + [pl.BlockSpec(a.shape, lambda b, _nd=a.ndim: (0,) * _nd) for a in weight_args]
    return pl.pallas_call(
        functools.partial(_medsam_kernel, heads=HEADS),
        grid=(batch,),
        in_specs=in_specs,
        out_specs=pl.BlockSpec((1, 1, IMG * IMG), lambda b: (b, 0, 0)),
        out_shape=jax.ShapeDtypeStruct((batch, 1, IMG * IMG), jnp.float32),
        compiler_params=pltpu.CompilerParams(dimension_semantics=("parallel",)),
    )(patches, tokens, *weight_args)


# --------------------------------------------------------------------------
# Precomputed bilinear-resize matrix (consumes the blocked low-res mask layout)
# --------------------------------------------------------------------------
def _interp_matrix_np(in_size, out_size):
    # PyTorch F.interpolate(mode="bilinear", align_corners=False) row weights.
    w = np.zeros((out_size, in_size), dtype=np.float32)
    scale = in_size / out_size
    for i in range(out_size):
        src = max((i + 0.5) * scale - 0.5, 0.0)
        i0 = int(np.floor(src))
        i0 = min(i0, in_size - 1)
        i1 = min(i0 + 1, in_size - 1)
        frac = src - i0
        w[i, i0] += 1.0 - frac
        w[i, i1] += frac
    return w


@functools.lru_cache(maxsize=None)
def _resize_matrix(grid, out_h, out_w):
    # Maps the decoder's flattened low-res mask (index = r*16 + q, with r = gy*grid+gx
    # the coarse cell and q = (dy1*2+dx1)*4 + (dy2*2+dx2) the sub-pixel) directly to the
    # bilinear-resized full-resolution output, de-blocking permutation baked in.
    low = 4 * grid
    wh = _interp_matrix_np(low, out_h)
    ww = _interp_matrix_np(low, out_w)
    k = np.zeros((grid * grid * 16, out_h * out_w), dtype=np.float32)
    for gy in range(grid):
        for gx in range(grid):
            r = gy * grid + gx
            for dy1 in range(2):
                for dx1 in range(2):
                    for dy2 in range(2):
                        for dx2 in range(2):
                            q = (dy1 * 2 + dx1) * 4 + (dy2 * 2 + dx2)
                            y = 4 * gy + 2 * dy1 + dy2
                            x = 4 * gx + 2 * dx1 + dx2
                            k[r * 16 + q, :] = np.outer(wh[:, y], ww[:, x]).reshape(-1)
    return jnp.asarray(k)


# --------------------------------------------------------------------------
# Parameters
# --------------------------------------------------------------------------
def init_params(key):
    keys = iter(jax.random.split(key, 96))

    def nrm(shape, std=0.02):
        return jax.random.normal(next(keys), shape, jnp.float32) * std

    p = {}
    # ---- image encoder (1-block ViT) ----
    p["patch_w"] = nrm((3 * PATCH * PATCH, D)); p["patch_b"] = jnp.zeros((D,))
    p["pos_embed"] = nrm((GRID * GRID, D))
    p["enc_ln1_g"] = jnp.ones((D,)); p["enc_ln1_b"] = jnp.zeros((D,))
    for n in ("q", "k", "v", "o"):
        p[f"enc_attn_{n}_w"] = nrm((D, D)); p[f"enc_attn_{n}_b"] = jnp.zeros((D,))
    p["enc_ln2_g"] = jnp.ones((D,)); p["enc_ln2_b"] = jnp.zeros((D,))
    p["enc_mlp1_w"] = nrm((D, 2 * D)); p["enc_mlp1_b"] = jnp.zeros((2 * D,))
    p["enc_mlp2_w"] = nrm((2 * D, D)); p["enc_mlp2_b"] = jnp.zeros((D,))
    p["neck_w"] = nrm((D, D)); p["neck_b"] = jnp.zeros((D,))
    p["neck_ln_g"] = jnp.ones((D,)); p["neck_ln_b"] = jnp.zeros((D,))
    # ---- prompt encoder (frozen) ----
    p["pe_gaussian"] = jax.random.normal(next(keys), (2, D // 2), jnp.float32)
    p["pt_emb_corner0"] = nrm((D,)); p["pt_emb_corner1"] = nrm((D,))
    p["no_mask_embed"] = nrm((D,))
    # ---- mask decoder ----
    p["iou_token"] = nrm((1, D)); p["mask_tokens"] = nrm((N_MASK_TOKENS, D))
    for blk in ("dec_self", "dec_t2i", "dec_i2t", "dec_final"):
        for n in ("q", "k", "v", "o"):
            p[f"{blk}_{n}_w"] = nrm((D, D)); p[f"{blk}_{n}_b"] = jnp.zeros((D,))
    for ln in ("dec_norm1", "dec_norm2", "dec_norm3", "dec_norm4", "dec_normf"):
        p[f"{ln}_g"] = jnp.ones((D,)); p[f"{ln}_b"] = jnp.zeros((D,))
    p["dec_mlp1_w"] = nrm((D, 2 * D)); p["dec_mlp1_b"] = jnp.zeros((2 * D,))
    p["dec_mlp2_w"] = nrm((2 * D, D)); p["dec_mlp2_b"] = jnp.zeros((D,))
    # output upscaling (ConvTranspose2d(k=2,s=2) expressed as matmuls)
    p["up1_w"] = nrm((D, (D // 4) * 4)); p["up1_b"] = jnp.zeros(((D // 4) * 4,))
    p["up_ln_g"] = jnp.ones((D // 4,)); p["up_ln_b"] = jnp.zeros((D // 4,))
    p["up2_w"] = nrm((D // 4, (D // 8) * 4)); p["up2_b"] = jnp.zeros(((D // 8) * 4,))
    # hypernetwork MLPs (one per mask token)
    for i in range(N_MASK_TOKENS):
        p[f"hyp{i}_w1"] = nrm((D, D)); p[f"hyp{i}_b1"] = jnp.zeros((D,))
        p[f"hyp{i}_w2"] = nrm((D, D)); p[f"hyp{i}_b2"] = jnp.zeros((D,))
        p[f"hyp{i}_w3"] = nrm((D, D // 8)); p[f"hyp{i}_b3"] = jnp.zeros((D // 8,))
    return p


def _pe_encode(gaussian, coords01):
    # Frozen random-Fourier positional encoding.
    c = 2.0 * coords01 - 1.0
    c = (2.0 * jnp.pi) * (c @ gaussian)
    return jnp.concatenate([jnp.sin(c), jnp.cos(c)], axis=-1)


def prepare_params(p):
    """One-time repack of parameters + precomputed constants for the fused kernel.

    Hoisted out of the jitted forward path (perf feedback): runs once at setup.
    """
    c1, c2 = D // 4, D // 8
    f = {}
    # ---- image encoder ----
    f["patch_w"] = p["patch_w"]
    f["patch_b"] = p["patch_b"].reshape(1, D)
    f["pos_embed"] = p["pos_embed"]
    f["enc_g1"] = p["enc_ln1_g"].reshape(1, D)
    f["enc_b1"] = p["enc_ln1_b"].reshape(1, D)
    f["enc_wqkv"] = jnp.concatenate(
        [p["enc_attn_q_w"], p["enc_attn_k_w"], p["enc_attn_v_w"]], axis=1)
    f["enc_bqkv"] = jnp.concatenate(
        [p["enc_attn_q_b"], p["enc_attn_k_b"], p["enc_attn_v_b"]], axis=0).reshape(1, 3 * D)
    f["enc_wo"] = p["enc_attn_o_w"]
    f["enc_bo"] = p["enc_attn_o_b"].reshape(1, D)
    f["enc_g2"] = p["enc_ln2_g"].reshape(1, D)
    f["enc_b2"] = p["enc_ln2_b"].reshape(1, D)
    f["enc_m1w"] = p["enc_mlp1_w"]; f["enc_m1b"] = p["enc_mlp1_b"].reshape(1, 2 * D)
    f["enc_m2w"] = p["enc_mlp2_w"]; f["enc_m2b"] = p["enc_mlp2_b"].reshape(1, D)
    f["neck_w"] = p["neck_w"]; f["neck_b"] = p["neck_b"].reshape(1, D)
    f["neck_g"] = p["neck_ln_g"].reshape(1, D); f["neck_beta"] = p["neck_ln_b"].reshape(1, D)
    f["no_mask"] = p["no_mask_embed"].reshape(1, D)

    # ---- frozen dense positional encoding over the image-embedding grid ----
    g = (jnp.arange(GRID, dtype=jnp.float32) + 0.5) / GRID
    gy, gx = jnp.meshgrid(g, g, indexing="ij")
    gridc = jnp.stack([gx, gy], axis=-1)                           # (x, y) order
    f["dense_pe"] = _pe_encode(p["pe_gaussian"], gridc).reshape(GRID * GRID, D)

    # ---- decoder attention / norm stacks (read via static ref slices in-kernel) ----
    ws, bs = [], []
    for blk in ("dec_self", "dec_t2i", "dec_i2t", "dec_final"):
        for n in ("q", "k", "v", "o"):
            ws.append(p[f"{blk}_{n}_w"]); bs.append(p[f"{blk}_{n}_b"])
    f["dec_W"] = jnp.stack(ws, axis=0)                             # [16, D, D]
    f["dec_B"] = jnp.stack(bs, axis=0)                             # [16, D]
    gs, bns = [], []
    for ln in ("dec_norm1", "dec_norm2", "dec_norm3", "dec_norm4", "dec_normf"):
        gs.append(p[f"{ln}_g"]); bns.append(p[f"{ln}_b"])
    f["dec_G"] = jnp.stack(gs, axis=0)                             # [5, D]
    f["dec_Bn"] = jnp.stack(bns, axis=0)
    f["dec_m1w"] = p["dec_mlp1_w"]; f["dec_m1b"] = p["dec_mlp1_b"].reshape(1, 2 * D)
    f["dec_m2w"] = p["dec_mlp2_w"]; f["dec_m2b"] = p["dec_mlp2_b"].reshape(1, D)

    # ---- output upscaling weights, sub-pixel-major blocked layout ----
    f["up1_w"] = p["up1_w"].reshape(D, c1, 4).transpose(0, 2, 1).reshape(D, 4 * c1)
    f["up1_b"] = p["up1_b"].reshape(c1, 4).transpose(1, 0).reshape(1, 4 * c1)
    f["upln_g"] = jnp.tile(p["up_ln_g"].reshape(1, c1), (1, 4))    # [1, 4*c1]
    f["upln_b"] = jnp.tile(p["up_ln_b"].reshape(1, c1), (1, 4))
    # block-diagonal group-average matrix for the per-sub-pixel LayerNorm2d
    f["gavg"] = jnp.asarray(np.kron(np.eye(4), np.ones((c1, c1)) / c1), jnp.float32)
    w2r = p["up2_w"].reshape(c1, c2, 4).transpose(0, 2, 1).reshape(c1, 4 * c2)
    f["up2_w"] = jnp.kron(jnp.eye(4, dtype=w2r.dtype), w2r)        # [4*c1, 16*c2]
    b2r = p["up2_b"].reshape(c2, 4).transpose(1, 0).reshape(4 * c2)
    f["up2_b"] = jnp.tile(b2r, 4).reshape(1, 16 * c2)

    # ---- hypernetwork for mask token 0 only ----
    # TODO(synk): hypernet heads 1-3 and the IoU head are skipped -- their outputs are
    # discarded under multimask_output=False in MedSAM.forward (output is identical).
    f["hyp_w1"] = p["hyp0_w1"]; f["hyp_b1"] = p["hyp0_b1"].reshape(1, D)
    f["hyp_w2"] = p["hyp0_w2"]; f["hyp_b2"] = p["hyp0_b2"].reshape(1, D)
    f["hyp_w3t"] = jnp.tile(p["hyp0_w3"], (1, 16))                 # [D, 16*c2] pre-tiled
    f["hyp_b3t"] = jnp.tile(p["hyp0_b3"].reshape(1, c2), (1, 16))

    # ---- constant matmuls: channel pooling + blocked->flat permutation + resize ----
    n_sub = 16                                                     # sub-pixels per cell
    n_cell = GRID * GRID
    ii = np.arange(n_sub * c2)[:, None] // c2
    jj = np.arange(n_cell * n_sub)[None, :] % n_sub
    f["pq"] = jnp.asarray((ii == jj).astype(np.float32))           # [n_sub*c2, 256]
    rr = np.arange(n_cell)[:, None]
    jc = np.arange(n_cell * n_sub)[None, :] // n_sub
    f["rsel"] = jnp.asarray((rr == jc).astype(np.float32))         # [n_cell, 256]
    f["ones_row"] = jnp.ones((1, n_cell), jnp.float32)
    f["kmat"] = _resize_matrix(GRID, IMG, IMG)                     # [256, IMG*IMG]

    # ---- prompt-encoder pieces used by the (tiny) JAX glue in the wrapper ----
    f["pe_gaussian"] = p["pe_gaussian"]
    f["corner_emb"] = jnp.stack([p["pt_emb_corner0"], p["pt_emb_corner1"]], axis=0)
    f["out_tokens"] = jnp.concatenate([p["iou_token"], p["mask_tokens"]], axis=0)
    return f


# --------------------------------------------------------------------------
# Forward pass
# --------------------------------------------------------------------------
def medsam_forward(packed, image, box):
    """image: [B, 3, IMG, IMG] float32 (NCHW), box: [B, 4] xyxy pixel coords."""
    B = image.shape[0]

    # ---- patchify (single XLA transpose; the only pre-kernel tensor glue) ----
    patches = (image.reshape(B, 3, GRID, PATCH, GRID, PATCH)
                    .transpose(0, 2, 4, 1, 3, 5)
                    .reshape(B, GRID * GRID, 3 * PATCH * PATCH))

    # ---- prompt encoder (frozen): box corner tokens, a handful of tiny ops ----
    box = jnp.asarray(box, jnp.float32)
    if box.ndim == 2:
        box = box[:, None, :]
    coords = box.reshape(B, 2, 2) + 0.5
    coords = coords / jnp.asarray([IMG, IMG], jnp.float32)
    corner = _pe_encode(packed["pe_gaussian"], coords) + packed["corner_emb"][None]
    tokens = jnp.concatenate(
        [jnp.broadcast_to(packed["out_tokens"][None], (B, 1 + N_MASK_TOKENS, D)), corner],
        axis=1)                                                    # [B, n_tok, D]

    # ---- one fused kernel: encoder + decoder + upscale + hypernet + resize ----
    out = _medsam_call(packed, patches, tokens, B)                 # [B, 1, IMG*IMG]
    return out.reshape(B, 1, IMG, IMG)


# --------------------------------------------------------------------------
if __name__ == "__main__":
    key = jax.random.PRNGKey(0)
    pkey, ikey, bkey = jax.random.split(key, 3)
    params = init_params(pkey)
    packed = prepare_params(params)        # hoisted: runs once, outside the jitted path

    image = jax.random.normal(ikey, (2, 3, IMG, IMG), jnp.float32)
    xy0 = jax.random.uniform(bkey, (2, 2), minval=0.0, maxval=12.0)
    box = jnp.concatenate([xy0, xy0 + 16.0], axis=-1)              # [B, 4] xyxy

    fwd = jax.jit(medsam_forward)
    out = fwd(packed, image, box)
    jax.block_until_ready(out)
    assert out.shape == (2, 1, IMG, IMG) and out.dtype == jnp.float32
    assert bool(jnp.isfinite(out).all())
    print("KERNEL_OK")
</pallas_src>

<mosaic_0001>
module attributes {stable_mosaic.version = 11 : i64} {
  func.func @_medsam_kernel(%arg0: i32, %arg1: memref<1x16x192xf32, #tpu.memory_space<vmem>>, %arg2: memref<1x7x32xf32, #tpu.memory_space<vmem>>, %arg3: memref<16x32xf32, #tpu.memory_space<vmem>>, %arg4: memref<192x32xf32, #tpu.memory_space<vmem>>, %arg5: memref<1x32xf32, #tpu.memory_space<vmem>>, %arg6: memref<1x32xf32, #tpu.memory_space<vmem>>, %arg7: memref<1x32xf32, #tpu.memory_space<vmem>>, %arg8: memref<32x96xf32, #tpu.memory_space<vmem>>, %arg9: memref<1x96xf32, #tpu.memory_space<vmem>>, %arg10: memref<32x32xf32, #tpu.memory_space<vmem>>, %arg11: memref<1x32xf32, #tpu.memory_space<vmem>>, %arg12: memref<1x32xf32, #tpu.memory_space<vmem>>, %arg13: memref<1x32xf32, #tpu.memory_space<vmem>>, %arg14: memref<32x64xf32, #tpu.memory_space<vmem>>, %arg15: memref<1x64xf32, #tpu.memory_space<vmem>>, %arg16: memref<64x32xf32, #tpu.memory_space<vmem>>, %arg17: memref<1x32xf32, #tpu.memory_space<vmem>>, %arg18: memref<32x32xf32, #tpu.memory_space<vmem>>, %arg19: memref<1x32xf32, #tpu.memory_space<vmem>>, %arg20: memref<1x32xf32, #tpu.memory_space<vmem>>, %arg21: memref<1x32xf32, #tpu.memory_space<vmem>>, %arg22: memref<1x32xf32, #tpu.memory_space<vmem>>, %arg23: memref<16x32xf32, #tpu.memory_space<vmem>>, %arg24: memref<16x32x32xf32, #tpu.memory_space<vmem>>, %arg25: memref<16x32xf32, #tpu.memory_space<vmem>>, %arg26: memref<5x32xf32, #tpu.memory_space<vmem>>, %arg27: memref<5x32xf32, #tpu.memory_space<vmem>>, %arg28: memref<32x64xf32, #tpu.memory_space<vmem>>, %arg29: memref<1x64xf32, #tpu.memory_space<vmem>>, %arg30: memref<64x32xf32, #tpu.memory_space<vmem>>, %arg31: memref<1x32xf32, #tpu.memory_space<vmem>>, %arg32: memref<32x32xf32, #tpu.memory_space<vmem>>, %arg33: memref<1x32xf32, #tpu.memory_space<vmem>>, %arg34: memref<32x32xf32, #tpu.memory_space<vmem>>, %arg35: memref<1x32xf32, #tpu.memory_space<vmem>>, %arg36: memref<1x32xf32, #tpu.memory_space<vmem>>, %arg37: memref<32x64xf32, #tpu.memory_space<vmem>>, %arg38: memref<1x64xf32, #tpu.memory_space<vmem>>, %arg39: memref<32x32xf32, #tpu.memory_space<vmem>>, %arg40: memref<1x32xf32, #tpu.memory_space<vmem>>, %arg41: memref<32x32xf32, #tpu.memory_space<vmem>>, %arg42: memref<1x32xf32, #tpu.memory_space<vmem>>, %arg43: memref<32x64xf32, #tpu.memory_space<vmem>>, %arg44: memref<1x64xf32, #tpu.memory_space<vmem>>, %arg45: memref<64x256xf32, #tpu.memory_space<vmem>>, %arg46: memref<16x256xf32, #tpu.memory_space<vmem>>, %arg47: memref<1x16xf32, #tpu.memory_space<vmem>>, %arg48: memref<256x1024xf32, #tpu.memory_space<vmem>>, %arg49: memref<1x1x1024xf32, #tpu.memory_space<vmem>>) attributes {dimension_semantics = [#tpu.dimension_semantics<parallel>], iteration_bounds = array<i64: 2>, scalar_prefetch = 0 : i64, scratch_operands = 0 : i64, tpu.core_type = #tpu.core_type<tc>, window_params = [{transform_indices = @transform_0, window_bounds = array<i64: 1, 16, 192>}, {transform_indices = @transform_1, window_bounds = array<i64: 1, 7, 32>}, {pipeline_mode = #tpu.pipeline_mode<synchronous>, transform_indices = @transform_2, window_bounds = array<i64: 16, 32>}, {pipeline_mode = #tpu.pipeline_mode<synchronous>, transform_indices = @transform_3, window_bounds = array<i64: 192, 32>}, {pipeline_mode = #tpu.pipeline_mode<synchronous>, transform_indices = @transform_4, window_bounds = array<i64: 1, 32>}, {pipeline_mode = #tpu.pipeline_mode<synchronous>, transform_indices = @transform_5, window_bounds = array<i64: 1, 32>}, {pipeline_mode = #tpu.pipeline_mode<synchronous>, transform_indices = @transform_6, window_bounds = array<i64: 1, 32>}, {pipeline_mode = #tpu.pipeline_mode<synchronous>, transform_indices = @transform_7, window_bounds = array<i64: 32, 96>}, {pipeline_mode = #tpu.pipeline_mode<synchronous>, transform_indices = @transform_8, window_bounds = array<i64: 1, 96>}, {pipeline_mode = #tpu.pipeline_mode<synchronous>, transform_indices = @transform_9, window_bounds = array<i64: 32, 32>}, {pipeline_mode = #tpu.pipeline_mode<synchronous>, transform_indices = @transform_10, window_bounds = array<i64: 1, 32>}, {pipeline_mode = #tpu.pipeline_mode<synchronous>, transform_indices = @transform_11, window_bounds = array<i64: 1, 32>}, {pipeline_mode = #tpu.pipeline_mode<synchronous>, transform_indices = @transform_12, window_bounds = array<i64: 1, 32>}, {pipeline_mode = #tpu.pipeline_mode<synchronous>, transform_indices = @transform_13, window_bounds = array<i64: 32, 64>}, {pipeline_mode = #tpu.pipeline_mode<synchronous>, transform_indices = @transform_14, window_bounds = array<i64: 1, 64>}, {pipeline_mode = #tpu.pipeline_mode<synchronous>, transform_indices = @transform_15, window_bounds = array<i64: 64, 32>}, {pipeline_mode = #tpu.pipeline_mode<synchronous>, transform_indices = @transform_16, window_bounds = array<i64: 1, 32>}, {pipeline_mode = #tpu.pipeline_mode<synchronous>, transform_indices = @transform_17, window_bounds = array<i64: 32, 32>}, {pipeline_mode = #tpu.pipeline_mode<synchronous>, transform_indices = @transform_18, window_bounds = array<i64: 1, 32>}, {pipeline_mode = #tpu.pipeline_mode<synchronous>, transform_indices = @transform_19, window_bounds = array<i64: 1, 32>}, {pipeline_mode = #tpu.pipeline_mode<synchronous>, transform_indices = @transform_20, window_bounds = array<i64: 1, 32>}, {pipeline_mode = #tpu.pipeline_mode<synchronous>, transform_indices = @transform_21, window_bounds = array<i64: 1, 32>}, {pipeline_mode = #tpu.pipeline_mode<synchronous>, transform_indices = @transform_22, window_bounds = array<i64: 16, 32>}, {pipeline_mode = #tpu.pipeline_mode<synchronous>, transform_indices = @transform_23, window_bounds = array<i64: 16, 32, 32>}, {pipeline_mode = #tpu.pipeline_mode<synchronous>, transform_indices = @transform_24, window_bounds = array<i64: 16, 32>}, {pipeline_mode = #tpu.pipeline_mode<synchronous>, transform_indices = @transform_25, window_bounds = array<i64: 5, 32>}, {pipeline_mode = #tpu.pipeline_mode<synchronous>, transform_indices = @transform_26, window_bounds = array<i64: 5, 32>}, {pipeline_mode = #tpu.pipeline_mode<synchronous>, transform_indices = @transform_27, window_bounds = array<i64: 32, 64>}, {pipeline_mode = #tpu.pipeline_mode<synchronous>, transform_indices = @transform_28, window_bounds = array<i64: 1, 64>}, {pipeline_mode = #tpu.pipeline_mode<synchronous>, transform_indices = @transform_29, window_bounds = array<i64: 64, 32>}, {pipeline_mode = #tpu.pipeline_mode<synchronous>, transform_indices = @transform_30, window_bounds = array<i64: 1, 32>}, {pipeline_mode = #tpu.pipeline_mode<synchronous>, transform_indices = @transform_31, window_bounds = array<i64: 32, 32>}, {pipeline_mode = #tpu.pipeline_mode<synchronous>, transform_indices = @transform_32, window_bounds = array<i64: 1, 32>}, {pipeline_mode = #tpu.pipeline_mode<synchronous>, transform_indices = @transform_33, window_bounds = array<i64: 32, 32>}, {pipeline_mode = #tpu.pipeline_mode<synchronous>, transform_indices = @transform_34, window_bounds = array<i64: 1, 32>}, {pipeline_mode = #tpu.pipeline_mode<synchronous>, transform_indices = @transform_35, window_bounds = array<i64: 1, 32>}, {pipeline_mode = #tpu.pipeline_mode<synchronous>, transform_indices = @transform_36, window_bounds = array<i64: 32, 64>}, {pipeline_mode = #tpu.pipeline_mode<synchronous>, transform_indices = @transform_37, window_bounds = array<i64: 1, 64>}, {pipeline_mode = #tpu.pipeline_mode<synchronous>, transform_indices = @transform_38, window_bounds = array<i64: 32, 32>}, {pipeline_mode = #tpu.pipeline_mode<synchronous>, transform_indices = @transform_39, window_bounds = array<i64: 1, 32>}, {pipeline_mode = #tpu.pipeline_mode<synchronous>, transform_indices = @transform_40, window_bounds = array<i64: 32, 32>}, {pipeline_mode = #tpu.pipeline_mode<synchronous>, transform_indices = @transform_41, window_bounds = array<i64: 1, 32>}, {pipeline_mode = #tpu.pipeline_mode<synchronous>, transform_indices = @transform_42, window_bounds = array<i64: 32, 64>}, {pipeline_mode = #tpu.pipeline_mode<synchronous>, transform_indices = @transform_43, window_bounds = array<i64: 1, 64>}, {pipeline_mode = #tpu.pipeline_mode<synchronous>, transform_indices = @transform_44, window_bounds = array<i64: 64, 256>}, {pipeline_mode = #tpu.pipeline_mode<synchronous>, transform_indices = @transform_45, window_bounds = array<i64: 16, 256>}, {pipeline_mode = #tpu.pipeline_mode<synchronous>, transform_indices = @transform_46, window_bounds = array<i64: 1, 16>}, {pipeline_mode = #tpu.pipeline_mode<synchronous>, transform_indices = @transform_47, window_bounds = array<i64: 256, 1024>}, {transform_indices = @transform_48, window_bounds = array<i64: 1, 1, 1024>}]} {
    %c0 = arith.constant 0 : index
    %c0_0 = arith.constant 0 : index
    %c0_1 = arith.constant 0 : index
    %0 = vector.load %arg1[%c0, %c0_0, %c0_1] : memref<1x16x192xf32, #tpu.memory_space<vmem>>, vector<1x16x192xf32>
    %1 = vector.shape_cast %0 : vector<1x16x192xf32> to vector<16x192xf32>
    %c0_2 = arith.constant 0 : index
    %c0_3 = arith.constant 0 : index
    %2 = vector.load %arg4[%c0_2, %c0_3] : memref<192x32xf32, #tpu.memory_space<vmem>>, vector<192x32xf32>
    %cst = arith.constant dense<0.000000e+00> : vector<16x32xf32>
    %3 = tpu.matmul %1, %2, %cst {dimension_numbers = #tpu.dot_dimension_numbers<[1], [0], [0], [1], [0, 0, 1, 1], [], []>} : vector<16x192xf32>, vector<192x32xf32>, vector<16x32xf32> -> vector<16x32xf32>
    %c0_4 = arith.constant 0 : index
    %c0_5 = arith.constant 0 : index
    %4 = vector.load %arg5[%c0_4, %c0_5] : memref<1x32xf32, #tpu.memory_space<vmem>>, vector<1x32xf32>
    %5 = vector.broadcast %4 : vector<1x32xf32> to vector<16x32xf32>
    %6 = arith.addf %3, %5 : vector<16x32xf32>
    %c0_6 = arith.constant 0 : index
    %c0_7 = arith.constant 0 : index
    %7 = vector.load %arg3[%c0_6, %c0_7] : memref<16x32xf32, #tpu.memory_space<vmem>>, vector<16x32xf32>
    %8 = arith.addf %6, %7 : vector<16x32xf32>
    %c0_8 = arith.constant 0 : index
    %c0_9 = arith.constant 0 : index
    %9 = vector.load %arg6[%c0_8, %c0_9] : memref<1x32xf32, #tpu.memory_space<vmem>>, vector<1x32xf32>
    %c0_10 = arith.constant 0 : index
    %c0_11 = arith.constant 0 : index
    %10 = vector.load %arg7[%c0_10, %c0_11] : memref<1x32xf32, #tpu.memory_space<vmem>>, vector<1x32xf32>
    %cst_12 = arith.constant dense<0.000000e+00> : vector<16xf32>
    %11 = vector.multi_reduction <add>, %8, %cst_12 [1] : vector<16x32xf32> to vector<16xf32>
    %12 = vector.shape_cast %11 : vector<16xf32> to vector<16x1xf32>
    %cst_13 = arith.constant 3.200000e+01 : f32
    %13 = vector.broadcast %cst_13 : f32 to vector<16x1xf32>
    %14 = arith.divf %12, %13 : vector<16x1xf32>
    %15 = vector.broadcast %14 : vector<16x1xf32> to vector<16x32xf32>
    %16 = arith.subf %8, %15 : vector<16x32xf32>
    %17 = arith.mulf %16, %16 : vector<16x32xf32>
    %cst_14 = arith.constant dense<0.000000e+00> : vector<16xf32>
    %18 = vector.multi_reduction <add>, %17, %cst_14 [1] : vector<16x32xf32> to vector<16xf32>
    %19 = vector.shape_cast %18 : vector<16xf32> to vector<16x1xf32>
    %cst_15 = arith.constant 3.200000e+01 : f32
    %20 = vector.broadcast %cst_15 : f32 to vector<16x1xf32>
    %21 = arith.divf %19, %20 : vector<16x1xf32>
    %22 = vector.broadcast %14 : vector<16x1xf32> to vector<16x32xf32>
    %23 = arith.subf %8, %22 : vector<16x32xf32>
    %cst_16 = arith.constant 9.99999974E-6 : f32
    %24 = vector.broadcast %cst_16 : f32 to vector<16x1xf32>
    %25 = arith.addf %21, %24 : vector<16x1xf32>
    %26 = math.rsqrt %25 : vector<16x1xf32>
    %27 = vector.broadcast %26 : vector<16x1xf32> to vector<16x32xf32>
    %28 = arith.mulf %23, %27 : vector<16x32xf32>
    %29 = vector.broadcast %9 : vector<1x32xf32> to vector<16x32xf32>
    %30 = arith.mulf %28, %29 : vector<16x32xf32>
    %31 = vector.broadcast %10 : vector<1x32xf32> to vector<16x32xf32>
    %32 = arith.addf %30, %31 : vector<16x32xf32>
    %c0_17 = arith.constant 0 : index
    %c0_18 = arith.constant 0 : index
    %33 = vector.load %arg8[%c0_17, %c0_18] : memref<32x96xf32, #tpu.memory_space<vmem>>, vector<32x96xf32>
    %cst_19 = arith.constant dense<0.000000e+00> : vector<16x96xf32>
    %34 = tpu.matmul %32, %33, %cst_19 {dimension_numbers = #tpu.dot_dimension_numbers<[1], [0], [0], [1], [0, 0, 1, 1], [], []>} : vector<16x32xf32>, vector<32x96xf32>, vector<16x96xf32> -> vector<16x96xf32>
    %c0_20 = arith.constant 0 : index
    %c0_21 = arith.constant 0 : index
    %35 = vector.load %arg9[%c0_20, %c0_21] : memref<1x96xf32, #tpu.memory_space<vmem>>, vector<1x96xf32>
    %36 = vector.broadcast %35 : vector<1x96xf32> to vector<16x96xf32>
    %37 = arith.addf %34, %36 : vector<16x96xf32>
    %38 = vector.extract_strided_slice %37 {offsets = [0, 0], sizes = [16, 16], strides = [1, 1]} : vector<16x96xf32> to vector<16x16xf32>
    %39 = vector.extract_strided_slice %37 {offsets = [0, 32], sizes = [16, 16], strides = [1, 1]} : vector<16x96xf32> to vector<16x16xf32>
    %40 = vector.extract_strided_slice %37 {offsets = [0, 64], sizes = [16, 16], strides = [1, 1]} : vector<16x96xf32> to vector<16x16xf32>
    %cst_22 = arith.constant dense<0.000000e+00> : vector<16x16xf32>
    %41 = tpu.matmul %38, %39, %cst_22 {dimension_numbers = #tpu.dot_dimension_numbers<[1], [1], [0], [0], [0, 0, 1, 0], [], []>} : vector<16x16xf32>, vector<16x16xf32>, vector<16x16xf32> -> vector<16x16xf32>
    %cst_23 = arith.constant 2.500000e-01 : f32
    %42 = vector.broadcast %cst_23 : f32 to vector<16x16xf32>
    %43 = arith.mulf %41, %42 : vector<16x16xf32>
    %cst_24 = arith.constant dense<0xFF800000> : vector<16xf32>
    %44 = vector.multi_reduction <maximumf>, %43, %cst_24 [1] : vector<16x16xf32> to vector<16xf32>
    %cst_25 = arith.constant 0xFF800000 : f32
    %45 = vector.broadcast %cst_25 : f32 to vector<16xf32>
    %46 = arith.maximumf %45, %44 : vector<16xf32>
    %47 = vector.shape_cast %46 : vector<16xf32> to vector<16x1xf32>
    %48 = vector.broadcast %47 : vector<16x1xf32> to vector<16x16xf32>
    %49 = arith.subf %43, %48 : vector<16x16xf32>
    %50 = math.exp %49 : vector<16x16xf32>
    %cst_26 = arith.constant dense<0.000000e+00> : vector<16xf32>
    %51 = vector.multi_reduction <add>, %50, %cst_26 [1] : vector<16x16xf32> to vector<16xf32>
    %52 = vector.shape_cast %51 : vector<16xf32> to vector<16x1xf32>
    %53 = vector.broadcast %52 : vector<16x1xf32> to vector<16x16xf32>
    %54 = arith.divf %50, %53 : vector<16x16xf32>
    %cst_27 = arith.constant dense<0.000000e+00> : vector<16x16xf32>
    %55 = tpu.matmul %54, %40, %cst_27 {dimension_numbers = #tpu.dot_dimension_numbers<[1], [0], [0], [1], [0, 0, 1, 1], [], []>} : vector<16x16xf32>, vector<16x16xf32>, vector<16x16xf32> -> vector<16x16xf32>
    %c0_28 = arith.constant 0 : index
    %c0_29 = arith.constant 0 : index
    %56 = vector.load %arg10[%c0_28, %c0_29] : memref<32x32xf32, #tpu.memory_space<vmem>>, vector<16x32xf32>
    %cst_30 = arith.constant dense<0.000000e+00> : vector<16x32xf32>
    %57 = tpu.matmul %55, %56, %cst_30 {dimension_numbers = #tpu.dot_dimension_numbers<[1], [0], [0], [1], [0, 0, 1, 1], [], []>} : vector<16x16xf32>, vector<16x32xf32>, vector<16x32xf32> -> vector<16x32xf32>
    %58 = vector.extract_strided_slice %37 {offsets = [0, 16], sizes = [16, 16], strides = [1, 1]} : vector<16x96xf32> to vector<16x16xf32>
    %59 = vector.extract_strided_slice %37 {offsets = [0, 48], sizes = [16, 16], strides = [1, 1]} : vector<16x96xf32> to vector<16x16xf32>
    %60 = vector.extract_strided_slice %37 {offsets = [0, 80], sizes = [16, 16], strides = [1, 1]} : vector<16x96xf32> to vector<16x16xf32>
    %cst_31 = arith.constant dense<0.000000e+00> : vector<16x16xf32>
    %61 = tpu.matmul %58, %59, %cst_31 {dimension_numbers = #tpu.dot_dimension_numbers<[1], [1], [0], [0], [0, 0, 1, 0], [], []>} : vector<16x16xf32>, vector<16x16xf32>, vector<16x16xf32> -> vector<16x16xf32>
    %cst_32 = arith.constant 2.500000e-01 : f32
    %62 = vector.broadcast %cst_32 : f32 to vector<16x16xf32>
    %63 = arith.mulf %61, %62 : vector<16x16xf32>
    %cst_33 = arith.constant dense<0xFF800000> : vector<16xf32>
    %64 = vector.multi_reduction <maximumf>, %63, %cst_33 [1] : vector<16x16xf32> to vector<16xf32>
    %cst_34 = arith.constant 0xFF800000 : f32
    %65 = vector.broadcast %cst_34 : f32 to vector<16xf32>
    %66 = arith.maximumf %65, %64 : vector<16xf32>
    %67 = vector.shape_cast %66 : vector<16xf32> to vector<16x1xf32>
    %68 = vector.broadcast %67 : vector<16x1xf32> to vector<16x16xf32>
    %69 = arith.subf %63, %68 : vector<16x16xf32>
    %70 = math.exp %69 : vector<16x16xf32>
    %cst_35 = arith.constant dense<0.000000e+00> : vector<16xf32>
    %71 = vector.multi_reduction <add>, %70, %cst_35 [1] : vector<16x16xf32> to vector<16xf32>
    %72 = vector.shape_cast %71 : vector<16xf32> to vector<16x1xf32>
    %73 = vector.broadcast %72 : vector<16x1xf32> to vector<16x16xf32>
    %74 = arith.divf %70, %73 : vector<16x16xf32>
    %cst_36 = arith.constant dense<0.000000e+00> : vector<16x16xf32>
    %75 = tpu.matmul %74, %60, %cst_36 {dimension_numbers = #tpu.dot_dimension_numbers<[1], [0], [0], [1], [0, 0, 1, 1], [], []>} : vector<16x16xf32>, vector<16x16xf32>, vector<16x16xf32> -> vector<16x16xf32>
    %c16 = arith.constant 16 : index
    %c0_37 = arith.constant 0 : index
    %76 = vector.load %arg10[%c16, %c0_37] : memref<32x32xf32, #tpu.memory_space<vmem>>, vector<16x32xf32>
    %cst_38 = arith.constant dense<0.000000e+00> : vector<16x32xf32>
    %77 = tpu.matmul %75, %76, %cst_38 {dimension_numbers = #tpu.dot_dimension_numbers<[1], [0], [0], [1], [0, 0, 1, 1], [], []>} : vector<16x16xf32>, vector<16x32xf32>, vector<16x32xf32> -> vector<16x32xf32>
    %78 = arith.addf %57, %77 : vector<16x32xf32>
    %79 = arith.addf %8, %78 : vector<16x32xf32>
    %c0_39 = arith.constant 0 : index
    %c0_40 = arith.constant 0 : index
    %80 = vector.load %arg11[%c0_39, %c0_40] : memref<1x32xf32, #tpu.memory_space<vmem>>, vector<1x32xf32>
    %81 = vector.broadcast %80 : vector<1x32xf32> to vector<16x32xf32>
    %82 = arith.addf %79, %81 : vector<16x32xf32>
    %c0_41 = arith.constant 0 : index
    %c0_42 = arith.constant 0 : index
    %83 = vector.load %arg12[%c0_41, %c0_42] : memref<1x32xf32, #tpu.memory_space<vmem>>, vector<1x32xf32>
    %c0_43 = arith.constant 0 : index
    %c0_44 = arith.constant 0 : index
    %84 = vector.load %arg13[%c0_43, %c0_44] : memref<1x32xf32, #tpu.memory_space<vmem>>, vector<1x32xf32>
    %cst_45 = arith.constant dense<0.000000e+00> : vector<16xf32>
    %85 = vector.multi_reduction <add>, %82, %cst_45 [1] : vector<16x32xf32> to vector<16xf32>
    %86 = vector.shape_cast %85 : vector<16xf32> to vector<16x1xf32>
    %cst_46 = arith.constant 3.200000e+01 : f32
    %87 = vector.broadcast %cst_46 : f32 to vector<16x1xf32>
    %88 = arith.divf %86, %87 : vector<16x1xf32>
    %89 = vector.broadcast %88 : vector<16x1xf32> to vector<16x32xf32>
    %90 = arith.subf %82, %89 : vector<16x32xf32>
    %91 = arith.mulf %90, %90 : vector<16x32xf32>
    %cst_47 = arith.constant dense<0.000000e+00> : vector<16xf32>
    %92 = vector.multi_reduction <add>, %91, %cst_47 [1] : vector<16x32xf32> to vector<16xf32>
    %93 = vector.shape_cast %92 : vector<16xf32> to vector<16x1xf32>
    %cst_48 = arith.constant 3.200000e+01 : f32
    %94 = vector.broadcast %cst_48 : f32 to vector<16x1xf32>
    %95 = arith.divf %93, %94 : vector<16x1xf32>
    %96 = vector.broadcast %88 : vector<16x1xf32> to vector<16x32xf32>
    %97 = arith.subf %82, %96 : vector<16x32xf32>
    %cst_49 = arith.constant 9.99999974E-6 : f32
    %98 = vector.broadcast %cst_49 : f32 to vector<16x1xf32>
    %99 = arith.addf %95, %98 : vector<16x1xf32>
    %100 = math.rsqrt %99 : vector<16x1xf32>
    %101 = vector.broadcast %100 : vector<16x1xf32> to vector<16x32xf32>
    %102 = arith.mulf %97, %101 : vector<16x32xf32>
    %103 = vector.broadcast %83 : vector<1x32xf32> to vector<16x32xf32>
    %104 = arith.mulf %102, %103 : vector<16x32xf32>
    %105 = vector.broadcast %84 : vector<1x32xf32> to vector<16x32xf32>
    %106 = arith.addf %104, %105 : vector<16x32xf32>
    %c0_50 = arith.constant 0 : index
    %c0_51 = arith.constant 0 : index
    %107 = vector.load %arg14[%c0_50, %c0_51] : memref<32x64xf32, #tpu.memory_space<vmem>>, vector<32x64xf32>
    %cst_52 = arith.constant dense<0.000000e+00> : vector<16x64xf32>
    %108 = tpu.matmul %106, %107, %cst_52 {dimension_numbers = #tpu.dot_dimension_numbers<[1], [0], [0], [1], [0, 0, 1, 1], [], []>} : vector<16x32xf32>, vector<32x64xf32>, vector<16x64xf32> -> vector<16x64xf32>
    %c0_53 = arith.constant 0 : index
    %c0_54 = arith.constant 0 : index
    %109 = vector.load %arg15[%c0_53, %c0_54] : memref<1x64xf32, #tpu.memory_space<vmem>>, vector<1x64xf32>
    %110 = vector.broadcast %109 : vector<1x64xf32> to vector<16x64xf32>
    %111 = arith.addf %108, %110 : vector<16x64xf32>
    %112 = arith.mulf %111, %111 : vector<16x64xf32>
    %113 = arith.mulf %111, %112 : vector<16x64xf32>
    %cst_55 = arith.constant 4.471500e-02 : f32
    %114 = vector.broadcast %cst_55 : f32 to vector<16x64xf32>
    %115 = arith.mulf %114, %113 : vector<16x64xf32>
    %116 = arith.addf %111, %115 : vector<16x64xf32>
    %cst_56 = arith.constant 0.797884583 : f32
    %117 = vector.broadcast %cst_56 : f32 to vector<16x64xf32>
    %118 = arith.mulf %117, %116 : vector<16x64xf32>
    %119 = math.tanh %118 : vector<16x64xf32>
    %cst_57 = arith.constant 1.000000e+00 : f32
    %120 = vector.broadcast %cst_57 : f32 to vector<16x64xf32>
    %121 = arith.addf %120, %119 : vector<16x64xf32>
    %cst_58 = arith.constant 5.000000e-01 : f32
    %122 = vector.broadcast %cst_58 : f32 to vector<16x64xf32>
    %123 = arith.mulf %122, %121 : vector<16x64xf32>
    %124 = arith.mulf %111, %123 : vector<16x64xf32>
    %c0_59 = arith.constant 0 : index
    %c0_60 = arith.constant 0 : index
    %125 = vector.load %arg16[%c0_59, %c0_60] : memref<64x32xf32, #tpu.memory_space<vmem>>, vector<64x32xf32>
    %cst_61 = arith.constant dense<0.000000e+00> : vector<16x32xf32>
    %126 = tpu.matmul %124, %125, %cst_61 {dimension_numbers = #tpu.dot_dimension_numbers<[1], [0], [0], [1], [0, 0, 1, 1], [], []>} : vector<16x64xf32>, vector<64x32xf32>, vector<16x32xf32> -> vector<16x32xf32>
    %127 = arith.addf %82, %126 : vector<16x32xf32>
    %c0_62 = arith.constant 0 : index
    %c0_63 = arith.constant 0 : index
    %128 = vector.load %arg17[%c0_62, %c0_63] : memref<1x32xf32, #tpu.memory_space<vmem>>, vector<1x32xf32>
    %129 = vector.broadcast %128 : vector<1x32xf32> to vector<16x32xf32>
    %130 = arith.addf %127, %129 : vector<16x32xf32>
    %c0_64 = arith.constant 0 : index
    %c0_65 = arith.constant 0 : index
    %131 = vector.load %arg18[%c0_64, %c0_65] : memref<32x32xf32, #tpu.memory_space<vmem>>, vector<32x32xf32>
    %cst_66 = arith.constant dense<0.000000e+00> : vector<16x32xf32>
    %132 = tpu.matmul %130, %131, %cst_66 {dimension_numbers = #tpu.dot_dimension_numbers<[1], [0], [0], [1], [0, 0, 1, 1], [], []>} : vector<16x32xf32>, vector<32x32xf32>, vector<16x32xf32> -> vector<16x32xf32>
    %c0_67 = arith.constant 0 : index
    %c0_68 = arith.constant 0 : index
    %133 = vector.load %arg19[%c0_67, %c0_68] : memref<1x32xf32, #tpu.memory_space<vmem>>, vector<1x32xf32>
    %134 = vector.broadcast %133 : vector<1x32xf32> to vector<16x32xf32>
    %135 = arith.addf %132, %134 : vector<16x32xf32>
    %c0_69 = arith.constant 0 : index
    %c0_70 = arith.constant 0 : index
    %136 = vector.load %arg20[%c0_69, %c0_70] : memref<1x32xf32, #tpu.memory_space<vmem>>, vector<1x32xf32>
    %c0_71 = arith.constant 0 : index
    %c0_72 = arith.constant 0 : index
    %137 = vector.load %arg21[%c0_71, %c0_72] : memref<1x32xf32, #tpu.memory_space<vmem>>, vector<1x32xf32>
    %cst_73 = arith.constant dense<0.000000e+00> : vector<16xf32>
    %138 = vector.multi_reduction <add>, %135, %cst_73 [1] : vector<16x32xf32> to vector<16xf32>
    %139 = vector.shape_cast %138 : vector<16xf32> to vector<16x1xf32>
    %cst_74 = arith.constant 3.200000e+01 : f32
    %140 = vector.broadcast %cst_74 : f32 to vector<16x1xf32>
    %141 = arith.divf %139, %140 : vector<16x1xf32>
    %142 = vector.broadcast %141 : vector<16x1xf32> to vector<16x32xf32>
    %143 = arith.subf %135, %142 : vector<16x32xf32>
    %144 = arith.mulf %143, %143 : vector<16x32xf32>
    %cst_75 = arith.constant dense<0.000000e+00> : vector<16xf32>
    %145 = vector.multi_reduction <add>, %144, %cst_75 [1] : vector<16x32xf32> to vector<16xf32>
    %146 = vector.shape_cast %145 : vector<16xf32> to vector<16x1xf32>
    %cst_76 = arith.constant 3.200000e+01 : f32
    %147 = vector.broadcast %cst_76 : f32 to vector<16x1xf32>
    %148 = arith.divf %146, %147 : vector<16x1xf32>
    %149 = vector.broadcast %141 : vector<16x1xf32> to vector<16x32xf32>
    %150 = arith.subf %135, %149 : vector<16x32xf32>
    %cst_77 = arith.constant 9.99999997E-7 : f32
    %151 = vector.broadcast %cst_77 : f32 to vector<16x1xf32>
    %152 = arith.addf %148, %151 : vector<16x1xf32>
    %153 = math.rsqrt %152 : vector<16x1xf32>
    %154 = vector.broadcast %153 : vector<16x1xf32> to vector<16x32xf32>
    %155 = arith.mulf %150, %154 : vector<16x32xf32>
    %156 = vector.broadcast %136 : vector<1x32xf32> to vector<16x32xf32>
    %157 = arith.mulf %155, %156 : vector<16x32xf32>
    %158 = vector.broadcast %137 : vector<1x32xf32> to vector<16x32xf32>
    %159 = arith.addf %157, %158 : vector<16x32xf32>
    %c0_78 = arith.constant 0 : index
    %c0_79 = arith.constant 0 : index
    %160 = vector.load %arg22[%c0_78, %c0_79] : memref<1x32xf32, #tpu.memory_space<vmem>>, vector<1x32xf32>
    %161 = vector.broadcast %160 : vector<1x32xf32> to vector<16x32xf32>
    %162 = arith.addf %159, %161 : vector<16x32xf32>
    %c0_80 = arith.constant 0 : index
    %c0_81 = arith.constant 0 : index
    %163 = vector.load %arg23[%c0_80, %c0_81] : memref<16x32xf32, #tpu.memory_space<vmem>>, vector<16x32xf32>
    %c0_82 = arith.constant 0 : index
    %c0_83 = arith.constant 0 : index
    %c0_84 = arith.constant 0 : index
    %164 = vector.load %arg2[%c0_82, %c0_83, %c0_84] : memref<1x7x32xf32, #tpu.memory_space<vmem>>, vector<1x7x32xf32>
    %165 = vector.shape_cast %164 : vector<1x7x32xf32> to vector<7x32xf32>
    %c0_85 = arith.constant 0 : index
    %c0_86 = arith.constant 0 : index
    %c0_87 = arith.constant 0 : index
    %166 = vector.load %arg24[%c0_85, %c0_86, %c0_87] : memref<16x32x32xf32, #tpu.memory_space<vmem>>, vector<1x32x32xf32>
    %167 = vector.shape_cast %166 : vector<1x32x32xf32> to vector<32x32xf32>
    %cst_88 = arith.constant dense<0.000000e+00> : vector<7x32xf32>
    %168 = tpu.matmul %165, %167, %cst_88 {dimension_numbers = #tpu.dot_dimension_numbers<[1], [0], [0], [1], [0, 0, 1, 1], [], []>} : vector<7x32xf32>, vector<32x32xf32>, vector<7x32xf32> -> vector<7x32xf32>
    %c0_89 = arith.constant 0 : index
    %c0_90 = arith.constant 0 : index
    %169 = vector.load %arg25[%c0_89, %c0_90] : memref<16x32xf32, #tpu.memory_space<vmem>>, vector<1x32xf32>
    %170 = vector.broadcast %169 : vector<1x32xf32> to vector<7x32xf32>
    %171 = arith.addf %168, %170 : vector<7x32xf32>
    %c1 = arith.constant 1 : index
    %c0_91 = arith.constant 0 : index
    %c0_92 = arith.constant 0 : index
    %172 = vector.load %arg24[%c1, %c0_91, %c0_92] : memref<16x32x32xf32, #tpu.memory_space<vmem>>, vector<1x32x32xf32>
    %173 = vector.shape_cast %172 : vector<1x32x32xf32> to vector<32x32xf32>
    %cst_93 = arith.constant dense<0.000000e+00> : vector<7x32xf32>
    %174 = tpu.matmul %165, %173, %cst_93 {dimension_numbers = #tpu.dot_dimension_numbers<[1], [0], [0], [1], [0, 0, 1, 1], [], []>} : vector<7x32xf32>, vector<32x32xf32>, vector<7x32xf32> -> vector<7x32xf32>
    %c1_94 = arith.constant 1 : index
    %c0_95 = arith.constant 0 : index
    %175 = vector.load %arg25[%c1_94, %c0_95] : memref<16x32xf32, #tpu.memory_space<vmem>>, vector<1x32xf32>
    %176 = vector.broadcast %175 : vector<1x32xf32> to vector<7x32xf32>
    %177 = arith.addf %174, %176 : vector<7x32xf32>
    %c2 = arith.constant 2 : index
    %c0_96 = arith.constant 0 : index
    %c0_97 = arith.constant 0 : index
    %178 = vector.load %arg24[%c2, %c0_96, %c0_97] : memref<16x32x32xf32, #tpu.memory_space<vmem>>, vector<1x32x32xf32>
    %179 = vector.shape_cast %178 : vector<1x32x32xf32> to vector<32x32xf32>
    %cst_98 = arith.constant dense<0.000000e+00> : vector<7x32xf32>
    %180 = tpu.matmul %165, %179, %cst_98 {dimension_numbers = #tpu.dot_dimension_numbers<[1], [0], [0], [1], [0, 0, 1, 1], [], []>} : vector<7x32xf32>, vector<32x32xf32>, vector<7x32xf32> -> vector<7x32xf32>
    %c2_99 = arith.constant 2 : index
    %c0_100 = arith.constant 0 : index
    %181 = vector.load %arg25[%c2_99, %c0_100] : memref<16x32xf32, #tpu.memory_space<vmem>>, vector<1x32xf32>
    %182 = vector.broadcast %181 : vector<1x32xf32> to vector<7x32xf32>
    %183 = arith.addf %180, %182 : vector<7x32xf32>
    %c3 = arith.constant 3 : index
    %c0_101 = arith.constant 0 : index
    %c0_102 = arith.constant 0 : index
    %184 = vector.load %arg24[%c3, %c0_101, %c0_102] : memref<16x32x32xf32, #tpu.memory_space<vmem>>, vector<1x32x32xf32>
    %185 = vector.shape_cast %184 : vector<1x32x32xf32> to vector<32x32xf32>
    %186 = vector.extract_strided_slice %171 {offsets = [0, 0], sizes = [7, 16], strides = [1, 1]} : vector<7x32xf32> to vector<7x16xf32>
    %187 = vector.extract_strided_slice %177 {offsets = [0, 0], sizes = [7, 16], strides = [1, 1]} : vector<7x32xf32> to vector<7x16xf32>
    %cst_103 = arith.constant dense<0.000000e+00> : vector<7x7xf32>
    %188 = tpu.matmul %186, %187, %cst_103 {dimension_numbers = #tpu.dot_dimension_numbers<[1], [1], [0], [0], [0, 0, 1, 0], [], []>} : vector<7x16xf32>, vector<7x16xf32>, vector<7x7xf32> -> vector<7x7xf32>
    %cst_104 = arith.constant 2.500000e-01 : f32
    %189 = vector.broadcast %cst_104 : f32 to vector<7x7xf32>
    %190 = arith.mulf %188, %189 : vector<7x7xf32>
    %cst_105 = arith.constant dense<0xFF800000> : vector<7xf32>
    %191 = vector.multi_reduction <maximumf>, %190, %cst_105 [1] : vector<7x7xf32> to vector<7xf32>
    %cst_106 = arith.constant 0xFF800000 : f32
    %192 = vector.broadcast %cst_106 : f32 to vector<7xf32>
    %193 = arith.maximumf %192, %191 : vector<7xf32>
    %194 = vector.shape_cast %193 : vector<7xf32> to vector<7x1xf32>
    %195 = vector.broadcast %194 : vector<7x1xf32> to vector<7x7xf32>
    %196 = arith.subf %190, %195 : vector<7x7xf32>
    %197 = math.exp %196 : vector<7x7xf32>
    %cst_107 = arith.constant dense<0.000000e+00> : vector<7xf32>
    %198 = vector.multi_reduction <add>, %197, %cst_107 [1] : vector<7x7xf32> to vector<7xf32>
    %199 = vector.shape_cast %198 : vector<7xf32> to vector<7x1xf32>
    %200 = vector.broadcast %199 : vector<7x1xf32> to vector<7x7xf32>
    %201 = arith.divf %197, %200 : vector<7x7xf32>
    %202 = vector.extract_strided_slice %183 {offsets = [0, 0], sizes = [7, 16], strides = [1, 1]} : vector<7x32xf32> to vector<7x16xf32>
    %cst_108 = arith.constant dense<0.000000e+00> : vector<7x16xf32>
    %203 = tpu.matmul %201, %202, %cst_108 {dimension_numbers = #tpu.dot_dimension_numbers<[1], [0], [0], [1], [0, 0, 1, 1], [], []>} : vector<7x7xf32>, vector<7x16xf32>, vector<7x16xf32> -> vector<7x16xf32>
    %204 = vector.extract_strided_slice %185 {offsets = [0, 0], sizes = [16, 32], strides = [1, 1]} : vector<32x32xf32> to vector<16x32xf32>
    %cst_109 = arith.constant dense<0.000000e+00> : vector<7x32xf32>
    %205 = tpu.matmul %203, %204, %cst_109 {dimension_numbers = #tpu.dot_dimension_numbers<[1], [0], [0], [1], [0, 0, 1, 1], [], []>} : vector<7x16xf32>, vector<16x32xf32>, vector<7x32xf32> -> vector<7x32xf32>
    %206 = vector.extract_strided_slice %171 {offsets = [0, 16], sizes = [7, 16], strides = [1, 1]} : vector<7x32xf32> to vector<7x16xf32>
    %207 = vector.extract_strided_slice %177 {offsets = [0, 16], sizes = [7, 16], strides = [1, 1]} : vector<7x32xf32> to vector<7x16xf32>
    %cst_110 = arith.constant dense<0.000000e+00> : vector<7x7xf32>
    %208 = tpu.matmul %206, %207, %cst_110 {dimension_numbers = #tpu.dot_dimension_numbers<[1], [1], [0], [0], [0, 0, 1, 0], [], []>} : vector<7x16xf32>, vector<7x16xf32>, vector<7x7xf32> -> vector<7x7xf32>
    %cst_111 = arith.constant 2.500000e-01 : f32
    %209 = vector.broadcast %cst_111 : f32 to vector<7x7xf32>
    %210 = arith.mulf %208, %209 : vector<7x7xf32>
    %cst_112 = arith.constant dense<0xFF800000> : vector<7xf32>
    %211 = vector.multi_reduction <maximumf>, %210, %cst_112 [1] : vector<7x7xf32> to vector<7xf32>
    %cst_113 = arith.constant 0xFF800000 : f32
    %212 = vector.broadcast %cst_113 : f32 to vector<7xf32>
    %213 = arith.maximumf %212, %211 : vector<7xf32>
    %214 = vector.shape_cast %213 : vector<7xf32> to vector<7x1xf32>
    %215 = vector.broadcast %214 : vector<7x1xf32> to vector<7x7xf32>
    %216 = arith.subf %210, %215 : vector<7x7xf32>
    %217 = math.exp %216 : vector<7x7xf32>
    %cst_114 = arith.constant dense<0.000000e+00> : vector<7xf32>
    %218 = vector.multi_reduction <add>, %217, %cst_114 [1] : vector<7x7xf32> to vector<7xf32>
    %219 = vector.shape_cast %218 : vector<7xf32> to vector<7x1xf32>
    %220 = vector.broadcast %219 : vector<7x1xf32> to vector<7x7xf32>
    %221 = arith.divf %217, %220 : vector<7x7xf32>
    %222 = vector.extract_strided_slice %183 {offsets = [0, 16], sizes = [7, 16], strides = [1, 1]} : vector<7x32xf32> to vector<7x16xf32>
    %cst_115 = arith.constant dense<0.000000e+00> : vector<7x16xf32>
    %223 = tpu.matmul %221, %222, %cst_115 {dimension_numbers = #tpu.dot_dimension_numbers<[1], [0], [0], [1], [0, 0, 1, 1], [], []>} : vector<7x7xf32>, vector<7x16xf32>, vector<7x16xf32> -> vector<7x16xf32>
    %224 = vector.extract_strided_slice %185 {offsets = [16, 0], sizes = [16, 32], strides = [1, 1]} : vector<32x32xf32> to vector<16x32xf32>
    %cst_116 = arith.constant dense<0.000000e+00> : vector<7x32xf32>
    %225 = tpu.matmul %223, %224, %cst_116 {dimension_numbers = #tpu.dot_dimension_numbers<[1], [0], [0], [1], [0, 0, 1, 1], [], []>} : vector<7x16xf32>, vector<16x32xf32>, vector<7x32xf32> -> vector<7x32xf32>
    %226 = arith.addf %205, %225 : vector<7x32xf32>
    %c3_117 = arith.constant 3 : index
    %c0_118 = arith.constant 0 : index
    %227 = vector.load %arg25[%c3_117, %c0_118] : memref<16x32xf32, #tpu.memory_space<vmem>>, vector<1x32xf32>
    %228 = vector.broadcast %227 : vector<1x32xf32> to vector<7x32xf32>
    %229 = arith.addf %226, %228 : vector<7x32xf32>
    %c0_119 = arith.constant 0 : index
    %c0_120 = arith.constant 0 : index
    %230 = vector.load %arg26[%c0_119, %c0_120] : memref<5x32xf32, #tpu.memory_space<vmem>>, vector<1x32xf32>
    %c0_121 = arith.constant 0 : index
    %c0_122 = arith.constant 0 : index
    %231 = vector.load %arg27[%c0_121, %c0_122] : memref<5x32xf32, #tpu.memory_space<vmem>>, vector<1x32xf32>
    %cst_123 = arith.constant dense<0.000000e+00> : vector<7xf32>
    %232 = vector.multi_reduction <add>, %229, %cst_123 [1] : vector<7x32xf32> to vector<7xf32>
    %233 = vector.shape_cast %232 : vector<7xf32> to vector<7x1xf32>
    %cst_124 = arith.constant 3.200000e+01 : f32
    %234 = vector.broadcast %cst_124 : f32 to vector<7x1xf32>
    %235 = arith.divf %233, %234 : vector<7x1xf32>
    %236 = vector.broadcast %235 : vector<7x1xf32> to vector<7x32xf32>
    %237 = arith.subf %229, %236 : vector<7x32xf32>
    %238 = arith.mulf %237, %237 : vector<7x32xf32>
    %cst_125 = arith.constant dense<0.000000e+00> : vector<7xf32>
    %239 = vector.multi_reduction <add>, %238, %cst_125 [1] : vector<7x32xf32> to vector<7xf32>
    %240 = vector.shape_cast %239 : vector<7xf32> to vector<7x1xf32>
    %cst_126 = arith.constant 3.200000e+01 : f32
    %241 = vector.broadcast %cst_126 : f32 to vector<7x1xf32>
    %242 = arith.divf %240, %241 : vector<7x1xf32>
    %243 = vector.broadcast %235 : vector<7x1xf32> to vector<7x32xf32>
    %244 = arith.subf %229, %243 : vector<7x32xf32>
    %cst_127 = arith.constant 9.99999974E-6 : f32
    %245 = vector.broadcast %cst_127 : f32 to vector<7x1xf32>
    %246 = arith.addf %242, %245 : vector<7x1xf32>
    %247 = math.rsqrt %246 : vector<7x1xf32>
    %248 = vector.broadcast %247 : vector<7x1xf32> to vector<7x32xf32>
    %249 = arith.mulf %244, %248 : vector<7x32xf32>
    %250 = vector.broadcast %230 : vector<1x32xf32> to vector<7x32xf32>
    %251 = arith.mulf %249, %250 : vector<7x32xf32>
    %252 = vector.broadcast %231 : vector<1x32xf32> to vector<7x32xf32>
    %253 = arith.addf %251, %252 : vector<7x32xf32>
    %254 = arith.addf %253, %165 : vector<7x32xf32>
    %255 = arith.addf %162, %163 : vector<16x32xf32>
    %c4 = arith.constant 4 : index
    %c0_128 = arith.constant 0 : index
    %c0_129 = arith.constant 0 : index
    %256 = vector.load %arg24[%c4, %c0_128, %c0_129] : memref<16x32x32xf32, #tpu.memory_space<vmem>>, vector<1x32x32xf32>
    %257 = vector.shape_cast %256 : vector<1x32x32xf32> to vector<32x32xf32>
    %cst_130 = arith.constant dense<0.000000e+00> : vector<7x32xf32>
    %258 = tpu.matmul %254, %257, %cst_130 {dimension_numbers = #tpu.dot_dimension_numbers<[1], [0], [0], [1], [0, 0, 1, 1], [], []>} : vector<7x32xf32>, vector<32x32xf32>, vector<7x32xf32> -> vector<7x32xf32>
    %c4_131 = arith.constant 4 : index
    %c0_132 = arith.constant 0 : index
    %259 = vector.load %arg25[%c4_131, %c0_132] : memref<16x32xf32, #tpu.memory_space<vmem>>, vector<1x32xf32>
    %260 = vector.broadcast %259 : vector<1x32xf32> to vector<7x32xf32>
    %261 = arith.addf %258, %260 : vector<7x32xf32>
    %c5 = arith.constant 5 : index
    %c0_133 = arith.constant 0 : index
    %c0_134 = arith.constant 0 : index
    %262 = vector.load %arg24[%c5, %c0_133, %c0_134] : memref<16x32x32xf32, #tpu.memory_space<vmem>>, vector<1x32x32xf32>
    %263 = vector.shape_cast %262 : vector<1x32x32xf32> to vector<32x32xf32>
    %cst_135 = arith.constant dense<0.000000e+00> : vector<16x32xf32>
    %264 = tpu.matmul %255, %263, %cst_135 {dimension_numbers = #tpu.dot_dimension_numbers<[1], [0], [0], [1], [0, 0, 1, 1], [], []>} : vector<16x32xf32>, vector<32x32xf32>, vector<16x32xf32> -> vector<16x32xf32>
    %c5_136 = arith.constant 5 : index
    %c0_137 = arith.constant 0 : index
    %265 = vector.load %arg25[%c5_136, %c0_137] : memref<16x32xf32, #tpu.memory_space<vmem>>, vector<1x32xf32>
    %266 = vector.broadcast %265 : vector<1x32xf32> to vector<16x32xf32>
    %267 = arith.addf %264, %266 : vector<16x32xf32>
    %c6 = arith.constant 6 : index
    %c0_138 = arith.constant 0 : index
    %c0_139 = arith.constant 0 : index
    %268 = vector.load %arg24[%c6, %c0_138, %c0_139] : memref<16x32x32xf32, #tpu.memory_space<vmem>>, vector<1x32x32xf32>
    %269 = vector.shape_cast %268 : vector<1x32x32xf32> to vector<32x32xf32>
    %cst_140 = arith.constant dense<0.000000e+00> : vector<16x32xf32>
    %270 = tpu.matmul %162, %269, %cst_140 {dimension_numbers = #tpu.dot_dimension_numbers<[1], [0], [0], [1], [0, 0, 1, 1], [], []>} : vector<16x32xf32>, vector<32x32xf32>, vector<16x32xf32> -> vector<16x32xf32>
    %c6_141 = arith.constant 6 : index
    %c0_142 = arith.constant 0 : index
    %271 = vector.load %arg25[%c6_141, %c0_142] : memref<16x32xf32, #tpu.memory_space<vmem>>, vector<1x32xf32>
    %272 = vector.broadcast %271 : vector<1x32xf32> to vector<16x32xf32>
    %273 = arith.addf %270, %272 : vector<16x32xf32>
    %c7 = arith.constant 7 : index
    %c0_143 = arith.constant 0 : index
    %c0_144 = arith.constant 0 : index
    %274 = vector.load %arg24[%c7, %c0_143, %c0_144] : memref<16x32x32xf32, #tpu.memory_space<vmem>>, vector<1x32x32xf32>
    %275 = vector.shape_cast %274 : vector<1x32x32xf32> to vector<32x32xf32>
    %276 = vector.extract_strided_slice %261 {offsets = [0, 0], sizes = [7, 16], strides = [1, 1]} : vector<7x32xf32> to vector<7x16xf32>
    %277 = vector.extract_strided_slice %267 {offsets = [0, 0], sizes = [16, 16], strides = [1, 1]} : vector<16x32xf32> to vector<16x16xf32>
    %cst_145 = arith.constant dense<0.000000e+00> : vector<7x16xf32>
    %278 = tpu.matmul %276, %277, %cst_145 {dimension_numbers = #tpu.dot_dimension_numbers<[1], [1], [0], [0], [0, 0, 1, 0], [], []>} : vector<7x16xf32>, vector<16x16xf32>, vector<7x16xf32> -> vector<7x16xf32>
    %cst_146 = arith.constant 2.500000e-01 : f32
    %279 = vector.broadcast %cst_146 : f32 to vector<7x16xf32>
    %280 = arith.mulf %278, %279 : vector<7x16xf32>
    %cst_147 = arith.constant dense<0xFF800000> : vector<7xf32>
    %281 = vector.multi_reduction <maximumf>, %280, %cst_147 [1] : vector<7x16xf32> to vector<7xf32>
    %cst_148 = arith.constant 0xFF800000 : f32
    %282 = vector.broadcast %cst_148 : f32 to vector<7xf32>
    %283 = arith.maximumf %282, %281 : vector<7xf32>
    %284 = vector.shape_cast %283 : vector<7xf32> to vector<7x1xf32>
    %285 = vector.broadcast %284 : vector<7x1xf32> to vector<7x16xf32>
    %286 = arith.subf %280, %285 : vector<7x16xf32>
    %287 = math.exp %286 : vector<7x16xf32>
    %cst_149 = arith.constant dense<0.000000e+00> : vector<7xf32>
    %288 = vector.multi_reduction <add>, %287, %cst_149 [1] : vector<7x16xf32> to vector<7xf32>
    %289 = vector.shape_cast %288 : vector<7xf32> to vector<7x1xf32>
    %290 = vector.broadcast %289 : vector<7x1xf32> to vector<7x16xf32>
    %291 = arith.divf %287, %290 : vector<7x16xf32>
    %292 = vector.extract_strided_slice %273 {offsets = [0, 0], sizes = [16, 16], strides = [1, 1]} : vector<16x32xf32> to vector<16x16xf32>
    %cst_150 = arith.constant dense<0.000000e+00> : vector<7x16xf32>
    %293 = tpu.matmul %291, %292, %cst_150 {dimension_numbers = #tpu.dot_dimension_numbers<[1], [0], [0], [1], [0, 0, 1, 1], [], []>} : vector<7x16xf32>, vector<16x16xf32>, vector<7x16xf32> -> vector<7x16xf32>
    %294 = vector.extract_strided_slice %275 {offsets = [0, 0], sizes = [16, 32], strides = [1, 1]} : vector<32x32xf32> to vector<16x32xf32>
    %cst_151 = arith.constant dense<0.000000e+00> : vector<7x32xf32>
    %295 = tpu.matmul %293, %294, %cst_151 {dimension_numbers = #tpu.dot_dimension_numbers<[1], [0], [0], [1], [0, 0, 1, 1], [], []>} : vector<7x16xf32>, vector<16x32xf32>, vector<7x32xf32> -> vector<7x32xf32>
    %296 = vector.extract_strided_slice %261 {offsets = [0, 16], sizes = [7, 16], strides = [1, 1]} : vector<7x32xf32> to vector<7x16xf32>
    %297 = vector.extract_strided_slice %267 {offsets = [0, 16], sizes = [16, 16], strides = [1, 1]} : vector<16x32xf32> to vector<16x16xf32>
    %cst_152 = arith.constant dense<0.000000e+00> : vector<7x16xf32>
    %298 = tpu.matmul %296, %297, %cst_152 {dimension_numbers = #tpu.dot_dimension_numbers<[1], [1], [0], [0], [0, 0, 1, 0], [], []>} : vector<7x16xf32>, vector<16x16xf32>, vector<7x16xf32> -> vector<7x16xf32>
    %cst_153 = arith.constant 2.500000e-01 : f32
    %299 = vector.broadcast %cst_153 : f32 to vector<7x16xf32>
    %300 = arith.mulf %298, %299 : vector<7x16xf32>
    %cst_154 = arith.constant dense<0xFF800000> : vector<7xf32>
    %301 = vector.multi_reduction <maximumf>, %300, %cst_154 [1] : vector<7x16xf32> to vector<7xf32>
    %cst_155 = arith.constant 0xFF800000 : f32
    %302 = vector.broadcast %cst_155 : f32 to vector<7xf32>
    %303 = arith.maximumf %302, %301 : vector<7xf32>
    %304 = vector.shape_cast %303 : vector<7xf32> to vector<7x1xf32>
    %305 = vector.broadcast %304 : vector<7x1xf32> to vector<7x16xf32>
    %306 = arith.subf %300, %305 : vector<7x16xf32>
    %307 = math.exp %306 : vector<7x16xf32>
    %cst_156 = arith.constant dense<0.000000e+00> : vector<7xf32>
    %308 = vector.multi_reduction <add>, %307, %cst_156 [1] : vector<7x16xf32> to vector<7xf32>
    %309 = vector.shape_cast %308 : vector<7xf32> to vector<7x1xf32>
    %310 = vector.broadcast %309 : vector<7x1xf32> to vector<7x16xf32>
    %311 = arith.divf %307, %310 : vector<7x16xf32>
    %312 = vector.extract_strided_slice %273 {offsets = [0, 16], sizes = [16, 16], strides = [1, 1]} : vector<16x32xf32> to vector<16x16xf32>
    %cst_157 = arith.constant dense<0.000000e+00> : vector<7x16xf32>
    %313 = tpu.matmul %311, %312, %cst_157 {dimension_numbers = #tpu.dot_dimension_numbers<[1], [0], [0], [1], [0, 0, 1, 1], [], []>} : vector<7x16xf32>, vector<16x16xf32>, vector<7x16xf32> -> vector<7x16xf32>
    %314 = vector.extract_strided_slice %275 {offsets = [16, 0], sizes = [16, 32], strides = [1, 1]} : vector<32x32xf32> to vector<16x32xf32>
    %cst_158 = arith.constant dense<0.000000e+00> : vector<7x32xf32>
    %315 = tpu.matmul %313, %314, %cst_158 {dimension_numbers = #tpu.dot_dimension_numbers<[1], [0], [0], [1], [0, 0, 1, 1], [], []>} : vector<7x16xf32>, vector<16x32xf32>, vector<7x32xf32> -> vector<7x32xf32>
    %316 = arith.addf %295, %315 : vector<7x32xf32>
    %c7_159 = arith.constant 7 : index
    %c0_160 = arith.constant 0 : index
    %317 = vector.load %arg25[%c7_159, %c0_160] : memref<16x32xf32, #tpu.memory_space<vmem>>, vector<1x32xf32>
    %318 = vector.broadcast %317 : vector<1x32xf32> to vector<7x32xf32>
    %319 = arith.addf %316, %318 : vector<7x32xf32>
    %320 = arith.addf %253, %319 : vector<7x32xf32>
    %c1_161 = arith.constant 1 : index
    %c0_162 = arith.constant 0 : index
    %321 = vector.load %arg26[%c1_161, %c0_162] : memref<5x32xf32, #tpu.memory_space<vmem>>, vector<1x32xf32>
    %c1_163 = arith.constant 1 : index
    %c0_164 = arith.constant 0 : index
    %322 = vector.load %arg27[%c1_163, %c0_164] : memref<5x32xf32, #tpu.memory_space<vmem>>, vector<1x32xf32>
    %cst_165 = arith.constant dense<0.000000e+00> : vector<7xf32>
    %323 = vector.multi_reduction <add>, %320, %cst_165 [1] : vector<7x32xf32> to vector<7xf32>
    %324 = vector.shape_cast %323 : vector<7xf32> to vector<7x1xf32>
    %cst_166 = arith.constant 3.200000e+01 : f32
    %325 = vector.broadcast %cst_166 : f32 to vector<7x1xf32>
    %326 = arith.divf %324, %325 : vector<7x1xf32>
    %327 = vector.broadcast %326 : vector<7x1xf32> to vector<7x32xf32>
    %328 = arith.subf %320, %327 : vector<7x32xf32>
    %329 = arith.mulf %328, %328 : vector<7x32xf32>
    %cst_167 = arith.constant dense<0.000000e+00> : vector<7xf32>
    %330 = vector.multi_reduction <add>, %329, %cst_167 [1] : vector<7x32xf32> to vector<7xf32>
    %331 = vector.shape_cast %330 : vector<7xf32> to vector<7x1xf32>
    %cst_168 = arith.constant 3.200000e+01 : f32
    %332 = vector.broadcast %cst_168 : f32 to vector<7x1xf32>
    %333 = arith.divf %331, %332 : vector<7x1xf32>
    %334 = vector.broadcast %326 : vector<7x1xf32> to vector<7x32xf32>
    %335 = arith.subf %320, %334 : vector<7x32xf32>
    %cst_169 = arith.constant 9.99999974E-6 : f32
    %336 = vector.broadcast %cst_169 : f32 to vector<7x1xf32>
    %337 = arith.addf %333, %336 : vector<7x1xf32>
    %338 = math.rsqrt %337 : vector<7x1xf32>
    %339 = vector.broadcast %338 : vector<7x1xf32> to vector<7x32xf32>
    %340 = arith.mulf %335, %339 : vector<7x32xf32>
    %341 = vector.broadcast %321 : vector<1x32xf32> to vector<7x32xf32>
    %342 = arith.mulf %340, %341 : vector<7x32xf32>
    %343 = vector.broadcast %322 : vector<1x32xf32> to vector<7x32xf32>
    %344 = arith.addf %342, %343 : vector<7x32xf32>
    %c0_170 = arith.constant 0 : index
    %c0_171 = arith.constant 0 : index
    %345 = vector.load %arg28[%c0_170, %c0_171] : memref<32x64xf32, #tpu.memory_space<vmem>>, vector<32x64xf32>
    %cst_172 = arith.constant dense<0.000000e+00> : vector<7x64xf32>
    %346 = tpu.matmul %344, %345, %cst_172 {dimension_numbers = #tpu.dot_dimension_numbers<[1], [0], [0], [1], [0, 0, 1, 1], [], []>} : vector<7x32xf32>, vector<32x64xf32>, vector<7x64xf32> -> vector<7x64xf32>
    %c0_173 = arith.constant 0 : index
    %c0_174 = arith.constant 0 : index
    %347 = vector.load %arg29[%c0_173, %c0_174] : memref<1x64xf32, #tpu.memory_space<vmem>>, vector<1x64xf32>
    %348 = vector.broadcast %347 : vector<1x64xf32> to vector<7x64xf32>
    %349 = arith.addf %346, %348 : vector<7x64xf32>
    %cst_175 = arith.constant 0.000000e+00 : f32
    %350 = vector.broadcast %cst_175 : f32 to vector<7x64xf32>
    %351 = arith.maximumf %349, %350 : vector<7x64xf32>
    %c0_176 = arith.constant 0 : index
    %c0_177 = arith.constant 0 : index
    %352 = vector.load %arg30[%c0_176, %c0_177] : memref<64x32xf32, #tpu.memory_space<vmem>>, vector<64x32xf32>
    %cst_178 = arith.constant dense<0.000000e+00> : vector<7x32xf32>
    %353 = tpu.matmul %351, %352, %cst_178 {dimension_numbers = #tpu.dot_dimension_numbers<[1], [0], [0], [1], [0, 0, 1, 1], [], []>} : vector<7x64xf32>, vector<64x32xf32>, vector<7x32xf32> -> vector<7x32xf32>
    %c0_179 = arith.constant 0 : index
    %c0_180 = arith.constant 0 : index
    %354 = vector.load %arg31[%c0_179, %c0_180] : memref<1x32xf32, #tpu.memory_space<vmem>>, vector<1x32xf32>
    %355 = vector.broadcast %354 : vector<1x32xf32> to vector<7x32xf32>
    %356 = arith.addf %353, %355 : vector<7x32xf32>
    %357 = arith.addf %344, %356 : vector<7x32xf32>
    %c2_181 = arith.constant 2 : index
    %c0_182 = arith.constant 0 : index
    %358 = vector.load %arg26[%c2_181, %c0_182] : memref<5x32xf32, #tpu.memory_space<vmem>>, vector<1x32xf32>
    %c2_183 = arith.constant 2 : index
    %c0_184 = arith.constant 0 : index
    %359 = vector.load %arg27[%c2_183, %c0_184] : memref<5x32xf32, #tpu.memory_space<vmem>>, vector<1x32xf32>
    %cst_185 = arith.constant dense<0.000000e+00> : vector<7xf32>
    %360 = vector.multi_reduction <add>, %357, %cst_185 [1] : vector<7x32xf32> to vector<7xf32>
    %361 = vector.shape_cast %360 : vector<7xf32> to vector<7x1xf32>
    %cst_186 = arith.constant 3.200000e+01 : f32
    %362 = vector.broadcast %cst_186 : f32 to vector<7x1xf32>
    %363 = arith.divf %361, %362 : vector<7x1xf32>
    %364 = vector.broadcast %363 : vector<7x1xf32> to vector<7x32xf32>
    %365 = arith.subf %357, %364 : vector<7x32xf32>
    %366 = arith.mulf %365, %365 : vector<7x32xf32>
    %cst_187 = arith.constant dense<0.000000e+00> : vector<7xf32>
    %367 = vector.multi_reduction <add>, %366, %cst_187 [1] : vector<7x32xf32> to vector<7xf32>
    %368 = vector.shape_cast %367 : vector<7xf32> to vector<7x1xf32>
    %cst_188 = arith.constant 3.200000e+01 : f32
    %369 = vector.broadcast %cst_188 : f32 to vector<7x1xf32>
    %370 = arith.divf %368, %369 : vector<7x1xf32>
    %371 = vector.broadcast %363 : vector<7x1xf32> to vector<7x32xf32>
    %372 = arith.subf %357, %371 : vector<7x32xf32>
    %cst_189 = arith.constant 9.99999974E-6 : f32
    %373 = vector.broadcast %cst_189 : f32 to vector<7x1xf32>
    %374 = arith.addf %370, %373 : vector<7x1xf32>
    %375 = math.rsqrt %374 : vector<7x1xf32>
    %376 = vector.broadcast %375 : vector<7x1xf32> to vector<7x32xf32>
    %377 = arith.mulf %372, %376 : vector<7x32xf32>
    %378 = vector.broadcast %358 : vector<1x32xf32> to vector<7x32xf32>
    %379 = arith.mulf %377, %378 : vector<7x32xf32>
    %380 = vector.broadcast %359 : vector<1x32xf32> to vector<7x32xf32>
    %381 = arith.addf %379, %380 : vector<7x32xf32>
    %382 = arith.addf %381, %165 : vector<7x32xf32>
    %383 = arith.addf %162, %163 : vector<16x32xf32>
    %c8 = arith.constant 8 : index
    %c0_190 = arith.constant 0 : index
    %c0_191 = arith.constant 0 : index
    %384 = vector.load %arg24[%c8, %c0_190, %c0_191] : memref<16x32x32xf32, #tpu.memory_space<vmem>>, vector<1x32x32xf32>
    %385 = vector.shape_cast %384 : vector<1x32x32xf32> to vector<32x32xf32>
    %cst_192 = arith.constant dense<0.000000e+00> : vector<16x32xf32>
    %386 = tpu.matmul %383, %385, %cst_192 {dimension_numbers = #tpu.dot_dimension_numbers<[1], [0], [0], [1], [0, 0, 1, 1], [], []>} : vector<16x32xf32>, vector<32x32xf32>, vector<16x32xf32> -> vector<16x32xf32>
    %c8_193 = arith.constant 8 : index
    %c0_194 = arith.constant 0 : index
    %387 = vector.load %arg25[%c8_193, %c0_194] : memref<16x32xf32, #tpu.memory_space<vmem>>, vector<1x32xf32>
    %388 = vector.broadcast %387 : vector<1x32xf32> to vector<16x32xf32>
    %389 = arith.addf %386, %388 : vector<16x32xf32>
    %c9 = arith.constant 9 : index
    %c0_195 = arith.constant 0 : index
    %c0_196 = arith.constant 0 : index
    %390 = vector.load %arg24[%c9, %c0_195, %c0_196] : memref<16x32x32xf32, #tpu.memory_space<vmem>>, vector<1x32x32xf32>
    %391 = vector.shape_cast %390 : vector<1x32x32xf32> to vector<32x32xf32>
    %cst_197 = arith.constant dense<0.000000e+00> : vector<7x32xf32>
    %392 = tpu.matmul %382, %391, %cst_197 {dimension_numbers = #tpu.dot_dimension_numbers<[1], [0], [0], [1], [0, 0, 1, 1], [], []>} : vector<7x32xf32>, vector<32x32xf32>, vector<7x32xf32> -> vector<7x32xf32>
    %c9_198 = arith.constant 9 : index
    %c0_199 = arith.constant 0 : index
    %393 = vector.load %arg25[%c9_198, %c0_199] : memref<16x32xf32, #tpu.memory_space<vmem>>, vector<1x32xf32>
    %394 = vector.broadcast %393 : vector<1x32xf32> to vector<7x32xf32>
    %395 = arith.addf %392, %394 : vector<7x32xf32>
    %c10 = arith.constant 10 : index
    %c0_200 = arith.constant 0 : index
    %c0_201 = arith.constant 0 : index
    %396 = vector.load %arg24[%c10, %c0_200, %c0_201] : memref<16x32x32xf32, #tpu.memory_space<vmem>>, vector<1x32x32xf32>
    %397 = vector.shape_cast %396 : vector<1x32x32xf32> to vector<32x32xf32>
    %cst_202 = arith.constant dense<0.000000e+00> : vector<7x32xf32>
    %398 = tpu.matmul %381, %397, %cst_202 {dimension_numbers = #tpu.dot_dimension_numbers<[1], [0], [0], [1], [0, 0, 1, 1], [], []>} : vector<7x32xf32>, vector<32x32xf32>, vector<7x32xf32> -> vector<7x32xf32>
    %c10_203 = arith.constant 10 : index
    %c0_204 = arith.constant 0 : index
    %399 = vector.load %arg25[%c10_203, %c0_204] : memref<16x32xf32, #tpu.memory_space<vmem>>, vector<1x32xf32>
    %400 = vector.broadcast %399 : vector<1x32xf32> to vector<7x32xf32>
    %401 = arith.addf %398, %400 : vector<7x32xf32>
    %c11 = arith.constant 11 : index
    %c0_205 = arith.constant 0 : index
    %c0_206 = arith.constant 0 : index
    %402 = vector.load %arg24[%c11, %c0_205, %c0_206] : memref<16x32x32xf32, #tpu.memory_space<vmem>>, vector<1x32x32xf32>
    %403 = vector.shape_cast %402 : vector<1x32x32xf32> to vector<32x32xf32>
    %404 = vector.extract_strided_slice %389 {offsets = [0, 0], sizes = [16, 16], strides = [1, 1]} : vector<16x32xf32> to vector<16x16xf32>
    %405 = vector.extract_strided_slice %395 {offsets = [0, 0], sizes = [7, 16], strides = [1, 1]} : vector<7x32xf32> to vector<7x16xf32>
    %cst_207 = arith.constant dense<0.000000e+00> : vector<16x7xf32>
    %406 = tpu.matmul %404, %405, %cst_207 {dimension_numbers = #tpu.dot_dimension_numbers<[1], [1], [0], [0], [0, 0, 1, 0], [], []>} : vector<16x16xf32>, vector<7x16xf32>, vector<16x7xf32> -> vector<16x7xf32>
    %cst_208 = arith.constant 2.500000e-01 : f32
    %407 = vector.broadcast %cst_208 : f32 to vector<16x7xf32>
    %408 = arith.mulf %406, %407 : vector<16x7xf32>
    %cst_209 = arith.constant dense<0xFF800000> : vector<16xf32>
    %409 = vector.multi_reduction <maximumf>, %408, %cst_209 [1] : vector<16x7xf32> to vector<16xf32>
    %cst_210 = arith.constant 0xFF800000 : f32
    %410 = vector.broadcast %cst_210 : f32 to vector<16xf32>
    %411 = arith.maximumf %410, %409 : vector<16xf32>
    %412 = vector.shape_cast %411 : vector<16xf32> to vector<16x1xf32>
    %413 = vector.broadcast %412 : vector<16x1xf32> to vector<16x7xf32>
    %414 = arith.subf %408, %413 : vector<16x7xf32>
    %415 = math.exp %414 : vector<16x7xf32>
    %cst_211 = arith.constant dense<0.000000e+00> : vector<16xf32>
    %416 = vector.multi_reduction <add>, %415, %cst_211 [1] : vector<16x7xf32> to vector<16xf32>
    %417 = vector.shape_cast %416 : vector<16xf32> to vector<16x1xf32>
    %418 = vector.broadcast %417 : vector<16x1xf32> to vector<16x7xf32>
    %419 = arith.divf %415, %418 : vector<16x7xf32>
    %420 = vector.extract_strided_slice %401 {offsets = [0, 0], sizes = [7, 16], strides = [1, 1]} : vector<7x32xf32> to vector<7x16xf32>
    %cst_212 = arith.constant dense<0.000000e+00> : vector<16x16xf32>
    %421 = tpu.matmul %419, %420, %cst_212 {dimension_numbers = #tpu.dot_dimension_numbers<[1], [0], [0], [1], [0, 0, 1, 1], [], []>} : vector<16x7xf32>, vector<7x16xf32>, vector<16x16xf32> -> vector<16x16xf32>
    %422 = vector.extract_strided_slice %403 {offsets = [0, 0], sizes = [16, 32], strides = [1, 1]} : vector<32x32xf32> to vector<16x32xf32>
    %cst_213 = arith.constant dense<0.000000e+00> : vector<16x32xf32>
    %423 = tpu.matmul %421, %422, %cst_213 {dimension_numbers = #tpu.dot_dimension_numbers<[1], [0], [0], [1], [0, 0, 1, 1], [], []>} : vector<16x16xf32>, vector<16x32xf32>, vector<16x32xf32> -> vector<16x32xf32>
    %424 = vector.extract_strided_slice %389 {offsets = [0, 16], sizes = [16, 16], strides = [1, 1]} : vector<16x32xf32> to vector<16x16xf32>
    %425 = vector.extract_strided_slice %395 {offsets = [0, 16], sizes = [7, 16], strides = [1, 1]} : vector<7x32xf32> to vector<7x16xf32>
    %cst_214 = arith.constant dense<0.000000e+00> : vector<16x7xf32>
    %426 = tpu.matmul %424, %425, %cst_214 {dimension_numbers = #tpu.dot_dimension_numbers<[1], [1], [0], [0], [0, 0, 1, 0], [], []>} : vector<16x16xf32>, vector<7x16xf32>, vector<16x7xf32> -> vector<16x7xf32>
    %cst_215 = arith.constant 2.500000e-01 : f32
    %427 = vector.broadcast %cst_215 : f32 to vector<16x7xf32>
    %428 = arith.mulf %426, %427 : vector<16x7xf32>
    %cst_216 = arith.constant dense<0xFF800000> : vector<16xf32>
    %429 = vector.multi_reduction <maximumf>, %428, %cst_216 [1] : vector<16x7xf32> to vector<16xf32>
    %cst_217 = arith.constant 0xFF800000 : f32
    %430 = vector.broadcast %cst_217 : f32 to vector<16xf32>
    %431 = arith.maximumf %430, %429 : vector<16xf32>
    %432 = vector.shape_cast %431 : vector<16xf32> to vector<16x1xf32>
    %433 = vector.broadcast %432 : vector<16x1xf32> to vector<16x7xf32>
    %434 = arith.subf %428, %433 : vector<16x7xf32>
    %435 = math.exp %434 : vector<16x7xf32>
    %cst_218 = arith.constant dense<0.000000e+00> : vector<16xf32>
    %436 = vector.multi_reduction <add>, %435, %cst_218 [1] : vector<16x7xf32> to vector<16xf32>
    %437 = vector.shape_cast %436 : vector<16xf32> to vector<16x1xf32>
    %438 = vector.broadcast %437 : vector<16x1xf32> to vector<16x7xf32>
    %439 = arith.divf %435, %438 : vector<16x7xf32>
    %440 = vector.extract_strided_slice %401 {offsets = [0, 16], sizes = [7, 16], strides = [1, 1]} : vector<7x32xf32> to vector<7x16xf32>
    %cst_219 = arith.constant dense<0.000000e+00> : vector<16x16xf32>
    %441 = tpu.matmul %439, %440, %cst_219 {dimension_numbers = #tpu.dot_dimension_numbers<[1], [0], [0], [1], [0, 0, 1, 1], [], []>} : vector<16x7xf32>, vector<7x16xf32>, vector<16x16xf32> -> vector<16x16xf32>
    %442 = vector.extract_strided_slice %403 {offsets = [16, 0], sizes = [16, 32], strides = [1, 1]} : vector<32x32xf32> to vector<16x32xf32>
    %cst_220 = arith.constant dense<0.000000e+00> : vector<16x32xf32>
    %443 = tpu.matmul %441, %442, %cst_220 {dimension_numbers = #tpu.dot_dimension_numbers<[1], [0], [0], [1], [0, 0, 1, 1], [], []>} : vector<16x16xf32>, vector<16x32xf32>, vector<16x32xf32> -> vector<16x32xf32>
    %444 = arith.addf %423, %443 : vector<16x32xf32>
    %c11_221 = arith.constant 11 : index
    %c0_222 = arith.constant 0 : index
    %445 = vector.load %arg25[%c11_221, %c0_222] : memref<16x32xf32, #tpu.memory_space<vmem>>, vector<1x32xf32>
    %446 = vector.broadcast %445 : vector<1x32xf32> to vector<16x32xf32>
    %447 = arith.addf %444, %446 : vector<16x32xf32>
    %448 = arith.addf %162, %447 : vector<16x32xf32>
    %c3_223 = arith.constant 3 : index
    %c0_224 = arith.constant 0 : index
    %449 = vector.load %arg26[%c3_223, %c0_224] : memref<5x32xf32, #tpu.memory_space<vmem>>, vector<1x32xf32>
    %c3_225 = arith.constant 3 : index
    %c0_226 = arith.constant 0 : index
    %450 = vector.load %arg27[%c3_225, %c0_226] : memref<5x32xf32, #tpu.memory_space<vmem>>, vector<1x32xf32>
    %cst_227 = arith.constant dense<0.000000e+00> : vector<16xf32>
    %451 = vector.multi_reduction <add>, %448, %cst_227 [1] : vector<16x32xf32> to vector<16xf32>
    %452 = vector.shape_cast %451 : vector<16xf32> to vector<16x1xf32>
    %cst_228 = arith.constant 3.200000e+01 : f32
    %453 = vector.broadcast %cst_228 : f32 to vector<16x1xf32>
    %454 = arith.divf %452, %453 : vector<16x1xf32>
    %455 = vector.broadcast %454 : vector<16x1xf32> to vector<16x32xf32>
    %456 = arith.subf %448, %455 : vector<16x32xf32>
    %457 = arith.mulf %456, %456 : vector<16x32xf32>
    %cst_229 = arith.constant dense<0.000000e+00> : vector<16xf32>
    %458 = vector.multi_reduction <add>, %457, %cst_229 [1] : vector<16x32xf32> to vector<16xf32>
    %459 = vector.shape_cast %458 : vector<16xf32> to vector<16x1xf32>
    %cst_230 = arith.constant 3.200000e+01 : f32
    %460 = vector.broadcast %cst_230 : f32 to vector<16x1xf32>
    %461 = arith.divf %459, %460 : vector<16x1xf32>
    %462 = vector.broadcast %454 : vector<16x1xf32> to vector<16x32xf32>
    %463 = arith.subf %448, %462 : vector<16x32xf32>
    %cst_231 = arith.constant 9.99999974E-6 : f32
    %464 = vector.broadcast %cst_231 : f32 to vector<16x1xf32>
    %465 = arith.addf %461, %464 : vector<16x1xf32>
    %466 = math.rsqrt %465 : vector<16x1xf32>
    %467 = vector.broadcast %466 : vector<16x1xf32> to vector<16x32xf32>
    %468 = arith.mulf %463, %467 : vector<16x32xf32>
    %469 = vector.broadcast %449 : vector<1x32xf32> to vector<16x32xf32>
    %470 = arith.mulf %468, %469 : vector<16x32xf32>
    %471 = vector.broadcast %450 : vector<1x32xf32> to vector<16x32xf32>
    %472 = arith.addf %470, %471 : vector<16x32xf32>
    %473 = arith.addf %381, %165 : vector<7x32xf32>
    %474 = arith.addf %472, %163 : vector<16x32xf32>
    %c12 = arith.constant 12 : index
    %c0_232 = arith.constant 0 : index
    %c0_233 = arith.constant 0 : index
    %475 = vector.load %arg24[%c12, %c0_232, %c0_233] : memref<16x32x32xf32, #tpu.memory_space<vmem>>, vector<1x32x32xf32>
    %476 = vector.shape_cast %475 : vector<1x32x32xf32> to vector<32x32xf32>
    %cst_234 = arith.constant dense<0.000000e+00> : vector<7x32xf32>
    %477 = tpu.matmul %473, %476, %cst_234 {dimension_numbers = #tpu.dot_dimension_numbers<[1], [0], [0], [1], [0, 0, 1, 1], [], []>} : vector<7x32xf32>, vector<32x32xf32>, vector<7x32xf32> -> vector<7x32xf32>
    %c12_235 = arith.constant 12 : index
    %c0_236 = arith.constant 0 : index
    %478 = vector.load %arg25[%c12_235, %c0_236] : memref<16x32xf32, #tpu.memory_space<vmem>>, vector<1x32xf32>
    %479 = vector.broadcast %478 : vector<1x32xf32> to vector<7x32xf32>
    %480 = arith.addf %477, %479 : vector<7x32xf32>
    %c13 = arith.constant 13 : index
    %c0_237 = arith.constant 0 : index
    %c0_238 = arith.constant 0 : index
    %481 = vector.load %arg24[%c13, %c0_237, %c0_238] : memref<16x32x32xf32, #tpu.memory_space<vmem>>, vector<1x32x32xf32>
    %482 = vector.shape_cast %481 : vector<1x32x32xf32> to vector<32x32xf32>
    %cst_239 = arith.constant dense<0.000000e+00> : vector<16x32xf32>
    %483 = tpu.matmul %474, %482, %cst_239 {dimension_numbers = #tpu.dot_dimension_numbers<[1], [0], [0], [1], [0, 0, 1, 1], [], []>} : vector<16x32xf32>, vector<32x32xf32>, vector<16x32xf32> -> vector<16x32xf32>
    %c13_240 = arith.constant 13 : index
    %c0_241 = arith.constant 0 : index
    %484 = vector.load %arg25[%c13_240, %c0_241] : memref<16x32xf32, #tpu.memory_space<vmem>>, vector<1x32xf32>
    %485 = vector.broadcast %484 : vector<1x32xf32> to vector<16x32xf32>
    %486 = arith.addf %483, %485 : vector<16x32xf32>
    %c14 = arith.constant 14 : index
    %c0_242 = arith.constant 0 : index
    %c0_243 = arith.constant 0 : index
    %487 = vector.load %arg24[%c14, %c0_242, %c0_243] : memref<16x32x32xf32, #tpu.memory_space<vmem>>, vector<1x32x32xf32>
    %488 = vector.shape_cast %487 : vector<1x32x32xf32> to vector<32x32xf32>
    %cst_244 = arith.constant dense<0.000000e+00> : vector<16x32xf32>
    %489 = tpu.matmul %472, %488, %cst_244 {dimension_numbers = #tpu.dot_dimension_numbers<[1], [0], [0], [1], [0, 0, 1, 1], [], []>} : vector<16x32xf32>, vector<32x32xf32>, vector<16x32xf32> -> vector<16x32xf32>
    %c14_245 = arith.constant 14 : index
    %c0_246 = arith.constant 0 : index
    %490 = vector.load %arg25[%c14_245, %c0_246] : memref<16x32xf32, #tpu.memory_space<vmem>>, vector<1x32xf32>
    %491 = vector.broadcast %490 : vector<1x32xf32> to vector<16x32xf32>
    %492 = arith.addf %489, %491 : vector<16x32xf32>
    %c15 = arith.constant 15 : index
    %c0_247 = arith.constant 0 : index
    %c0_248 = arith.constant 0 : index
    %493 = vector.load %arg24[%c15, %c0_247, %c0_248] : memref<16x32x32xf32, #tpu.memory_space<vmem>>, vector<1x32x32xf32>
    %494 = vector.shape_cast %493 : vector<1x32x32xf32> to vector<32x32xf32>
    %495 = vector.extract_strided_slice %480 {offsets = [0, 0], sizes = [7, 16], strides = [1, 1]} : vector<7x32xf32> to vector<7x16xf32>
    %496 = vector.extract_strided_slice %486 {offsets = [0, 0], sizes = [16, 16], strides = [1, 1]} : vector<16x32xf32> to vector<16x16xf32>
    %cst_249 = arith.constant dense<0.000000e+00> : vector<7x16xf32>
    %497 = tpu.matmul %495, %496, %cst_249 {dimension_numbers = #tpu.dot_dimension_numbers<[1], [1], [0], [0], [0, 0, 1, 0], [], []>} : vector<7x16xf32>, vector<16x16xf32>, vector<7x16xf32> -> vector<7x16xf32>
    %cst_250 = arith.constant 2.500000e-01 : f32
    %498 = vector.broadcast %cst_250 : f32 to vector<7x16xf32>
    %499 = arith.mulf %497, %498 : vector<7x16xf32>
    %cst_251 = arith.constant dense<0xFF800000> : vector<7xf32>
    %500 = vector.multi_reduction <maximumf>, %499, %cst_251 [1] : vector<7x16xf32> to vector<7xf32>
    %cst_252 = arith.constant 0xFF800000 : f32
    %501 = vector.broadcast %cst_252 : f32 to vector<7xf32>
    %502 = arith.maximumf %501, %500 : vector<7xf32>
    %503 = vector.shape_cast %502 : vector<7xf32> to vector<7x1xf32>
    %504 = vector.broadcast %503 : vector<7x1xf32> to vector<7x16xf32>
    %505 = arith.subf %499, %504 : vector<7x16xf32>
    %506 = math.exp %505 : vector<7x16xf32>
    %cst_253 = arith.constant dense<0.000000e+00> : vector<7xf32>
    %507 = vector.multi_reduction <add>, %506, %cst_253 [1] : vector<7x16xf32> to vector<7xf32>
    %508 = vector.shape_cast %507 : vector<7xf32> to vector<7x1xf32>
    %509 = vector.broadcast %508 : vector<7x1xf32> to vector<7x16xf32>
    %510 = arith.divf %506, %509 : vector<7x16xf32>
    %511 = vector.extract_strided_slice %492 {offsets = [0, 0], sizes = [16, 16], strides = [1, 1]} : vector<16x32xf32> to vector<16x16xf32>
    %cst_254 = arith.constant dense<0.000000e+00> : vector<7x16xf32>
    %512 = tpu.matmul %510, %511, %cst_254 {dimension_numbers = #tpu.dot_dimension_numbers<[1], [0], [0], [1], [0, 0, 1, 1], [], []>} : vector<7x16xf32>, vector<16x16xf32>, vector<7x16xf32> -> vector<7x16xf32>
    %513 = vector.extract_strided_slice %494 {offsets = [0, 0], sizes = [16, 32], strides = [1, 1]} : vector<32x32xf32> to vector<16x32xf32>
    %cst_255 = arith.constant dense<0.000000e+00> : vector<7x32xf32>
    %514 = tpu.matmul %512, %513, %cst_255 {dimension_numbers = #tpu.dot_dimension_numbers<[1], [0], [0], [1], [0, 0, 1, 1], [], []>} : vector<7x16xf32>, vector<16x32xf32>, vector<7x32xf32> -> vector<7x32xf32>
    %515 = vector.extract_strided_slice %480 {offsets = [0, 16], sizes = [7, 16], strides = [1, 1]} : vector<7x32xf32> to vector<7x16xf32>
    %516 = vector.extract_strided_slice %486 {offsets = [0, 16], sizes = [16, 16], strides = [1, 1]} : vector<16x32xf32> to vector<16x16xf32>
    %cst_256 = arith.constant dense<0.000000e+00> : vector<7x16xf32>
    %517 = tpu.matmul %515, %516, %cst_256 {dimension_numbers = #tpu.dot_dimension_numbers<[1], [1], [0], [0], [0, 0, 1, 0], [], []>} : vector<7x16xf32>, vector<16x16xf32>, vector<7x16xf32> -> vector<7x16xf32>
    %cst_257 = arith.constant 2.500000e-01 : f32
    %518 = vector.broadcast %cst_257 : f32 to vector<7x16xf32>
    %519 = arith.mulf %517, %518 : vector<7x16xf32>
    %cst_258 = arith.constant dense<0xFF800000> : vector<7xf32>
    %520 = vector.multi_reduction <maximumf>, %519, %cst_258 [1] : vector<7x16xf32> to vector<7xf32>
    %cst_259 = arith.constant 0xFF800000 : f32
    %521 = vector.broadcast %cst_259 : f32 to vector<7xf32>
    %522 = arith.maximumf %521, %520 : vector<7xf32>
    %523 = vector.shape_cast %522 : vector<7xf32> to vector<7x1xf32>
    %524 = vector.broadcast %523 : vector<7x1xf32> to vector<7x16xf32>
    %525 = arith.subf %519, %524 : vector<7x16xf32>
    %526 = math.exp %525 : vector<7x16xf32>
    %cst_260 = arith.constant dense<0.000000e+00> : vector<7xf32>
    %527 = vector.multi_reduction <add>, %526, %cst_260 [1] : vector<7x16xf32> to vector<7xf32>
    %528 = vector.shape_cast %527 : vector<7xf32> to vector<7x1xf32>
    %529 = vector.broadcast %528 : vector<7x1xf32> to vector<7x16xf32>
    %530 = arith.divf %526, %529 : vector<7x16xf32>
    %531 = vector.extract_strided_slice %492 {offsets = [0, 16], sizes = [16, 16], strides = [1, 1]} : vector<16x32xf32> to vector<16x16xf32>
    %cst_261 = arith.constant dense<0.000000e+00> : vector<7x16xf32>
    %532 = tpu.matmul %530, %531, %cst_261 {dimension_numbers = #tpu.dot_dimension_numbers<[1], [0], [0], [1], [0, 0, 1, 1], [], []>} : vector<7x16xf32>, vector<16x16xf32>, vector<7x16xf32> -> vector<7x16xf32>
    %533 = vector.extract_strided_slice %494 {offsets = [16, 0], sizes = [16, 32], strides = [1, 1]} : vector<32x32xf32> to vector<16x32xf32>
    %cst_262 = arith.constant dense<0.000000e+00> : vector<7x32xf32>
    %534 = tpu.matmul %532, %533, %cst_262 {dimension_numbers = #tpu.dot_dimension_numbers<[1], [0], [0], [1], [0, 0, 1, 1], [], []>} : vector<7x16xf32>, vector<16x32xf32>, vector<7x32xf32> -> vector<7x32xf32>
    %535 = arith.addf %514, %534 : vector<7x32xf32>
    %c15_263 = arith.constant 15 : index
    %c0_264 = arith.constant 0 : index
    %536 = vector.load %arg25[%c15_263, %c0_264] : memref<16x32xf32, #tpu.memory_space<vmem>>, vector<1x32xf32>
    %537 = vector.broadcast %536 : vector<1x32xf32> to vector<7x32xf32>
    %538 = arith.addf %535, %537 : vector<7x32xf32>
    %539 = arith.addf %381, %538 : vector<7x32xf32>
    %c4_265 = arith.constant 4 : index
    %c0_266 = arith.constant 0 : index
    %540 = vector.load %arg26[%c4_265, %c0_266] : memref<5x32xf32, #tpu.memory_space<vmem>>, vector<1x32xf32>
    %c4_267 = arith.constant 4 : index
    %c0_268 = arith.constant 0 : index
    %541 = vector.load %arg27[%c4_267, %c0_268] : memref<5x32xf32, #tpu.memory_space<vmem>>, vector<1x32xf32>
    %cst_269 = arith.constant dense<0.000000e+00> : vector<7xf32>
    %542 = vector.multi_reduction <add>, %539, %cst_269 [1] : vector<7x32xf32> to vector<7xf32>
    %543 = vector.shape_cast %542 : vector<7xf32> to vector<7x1xf32>
    %cst_270 = arith.constant 3.200000e+01 : f32
    %544 = vector.broadcast %cst_270 : f32 to vector<7x1xf32>
    %545 = arith.divf %543, %544 : vector<7x1xf32>
    %546 = vector.broadcast %545 : vector<7x1xf32> to vector<7x32xf32>
    %547 = arith.subf %539, %546 : vector<7x32xf32>
    %548 = arith.mulf %547, %547 : vector<7x32xf32>
    %cst_271 = arith.constant dense<0.000000e+00> : vector<7xf32>
    %549 = vector.multi_reduction <add>, %548, %cst_271 [1] : vector<7x32xf32> to vector<7xf32>
    %550 = vector.shape_cast %549 : vector<7xf32> to vector<7x1xf32>
    %cst_272 = arith.constant 3.200000e+01 : f32
    %551 = vector.broadcast %cst_272 : f32 to vector<7x1xf32>
    %552 = arith.divf %550, %551 : vector<7x1xf32>
    %553 = vector.broadcast %545 : vector<7x1xf32> to vector<7x32xf32>
    %554 = arith.subf %539, %553 : vector<7x32xf32>
    %cst_273 = arith.constant 9.99999974E-6 : f32
    %555 = vector.broadcast %cst_273 : f32 to vector<7x1xf32>
    %556 = arith.addf %552, %555 : vector<7x1xf32>
    %557 = math.rsqrt %556 : vector<7x1xf32>
    %558 = vector.broadcast %557 : vector<7x1xf32> to vector<7x32xf32>
    %559 = arith.mulf %554, %558 : vector<7x32xf32>
    %560 = vector.broadcast %540 : vector<1x32xf32> to vector<7x32xf32>
    %561 = arith.mulf %559, %560 : vector<7x32xf32>
    %562 = vector.broadcast %541 : vector<1x32xf32> to vector<7x32xf32>
    %563 = arith.addf %561, %562 : vector<7x32xf32>
    %c0_274 = arith.constant 0 : index
    %c0_275 = arith.constant 0 : index
    %564 = vector.load %arg32[%c0_274, %c0_275] : memref<32x32xf32, #tpu.memory_space<vmem>>, vector<32x32xf32>
    %cst_276 = arith.constant dense<0.000000e+00> : vector<16x32xf32>
    %565 = tpu.matmul %472, %564, %cst_276 {dimension_numbers = #tpu.dot_dimension_numbers<[1], [0], [0], [1], [0, 0, 1, 1], [], []>} : vector<16x32xf32>, vector<32x32xf32>, vector<16x32xf32> -> vector<16x32xf32>
    %c0_277 = arith.constant 0 : index
    %c0_278 = arith.constant 0 : index
    %566 = vector.load %arg33[%c0_277, %c0_278] : memref<1x32xf32, #tpu.memory_space<vmem>>, vector<1x32xf32>
    %567 = vector.broadcast %566 : vector<1x32xf32> to vector<16x32xf32>
    %568 = arith.addf %565, %567 : vector<16x32xf32>
    %c0_279 = arith.constant 0 : index
    %c0_280 = arith.constant 0 : index
    %569 = vector.load %arg34[%c0_279, %c0_280] : memref<32x32xf32, #tpu.memory_space<vmem>>, vector<32x32xf32>
    %cst_281 = arith.constant dense<0.000000e+00> : vector<16x32xf32>
    %570 = tpu.matmul %568, %569, %cst_281 {dimension_numbers = #tpu.dot_dimension_numbers<[1], [0], [0], [1], [0, 0, 1, 1], [], []>} : vector<16x32xf32>, vector<32x32xf32>, vector<16x32xf32> -> vector<16x32xf32>
    %571 = arith.subf %568, %570 : vector<16x32xf32>
    %572 = arith.mulf %571, %571 : vector<16x32xf32>
    %cst_282 = arith.constant dense<0.000000e+00> : vector<16x32xf32>
    %573 = tpu.matmul %572, %569, %cst_282 {dimension_numbers = #tpu.dot_dimension_numbers<[1], [0], [0], [1], [0, 0, 1, 1], [], []>} : vector<16x32xf32>, vector<32x32xf32>, vector<16x32xf32> -> vector<16x32xf32>
    %cst_283 = arith.constant 9.99999997E-7 : f32
    %574 = vector.broadcast %cst_283 : f32 to vector<16x32xf32>
    %575 = arith.addf %573, %574 : vector<16x32xf32>
    %576 = math.rsqrt %575 : vector<16x32xf32>
    %577 = arith.mulf %571, %576 : vector<16x32xf32>
    %c0_284 = arith.constant 0 : index
    %c0_285 = arith.constant 0 : index
    %578 = vector.load %arg35[%c0_284, %c0_285] : memref<1x32xf32, #tpu.memory_space<vmem>>, vector<1x32xf32>
    %579 = vector.broadcast %578 : vector<1x32xf32> to vector<16x32xf32>
    %580 = arith.mulf %577, %579 : vector<16x32xf32>
    %c0_286 = arith.constant 0 : index
    %c0_287 = arith.constant 0 : index
    %581 = vector.load %arg36[%c0_286, %c0_287] : memref<1x32xf32, #tpu.memory_space<vmem>>, vector<1x32xf32>
    %582 = vector.broadcast %581 : vector<1x32xf32> to vector<16x32xf32>
    %583 = arith.addf %580, %582 : vector<16x32xf32>
    %584 = arith.mulf %583, %583 : vector<16x32xf32>
    %585 = arith.mulf %583, %584 : vector<16x32xf32>
    %cst_288 = arith.constant 4.471500e-02 : f32
    %586 = vector.broadcast %cst_288 : f32 to vector<16x32xf32>
    %587 = arith.mulf %586, %585 : vector<16x32xf32>
    %588 = arith.addf %583, %587 : vector<16x32xf32>
    %cst_289 = arith.constant 0.797884583 : f32
    %589 = vector.broadcast %cst_289 : f32 to vector<16x32xf32>
    %590 = arith.mulf %589, %588 : vector<16x32xf32>
    %591 = math.tanh %590 : vector<16x32xf32>
    %cst_290 = arith.constant 1.000000e+00 : f32
    %592 = vector.broadcast %cst_290 : f32 to vector<16x32xf32>
    %593 = arith.addf %592, %591 : vector<16x32xf32>
    %cst_291 = arith.constant 5.000000e-01 : f32
    %594 = vector.broadcast %cst_291 : f32 to vector<16x32xf32>
    %595 = arith.mulf %594, %593 : vector<16x32xf32>
    %596 = arith.mulf %583, %595 : vector<16x32xf32>
    %c0_292 = arith.constant 0 : index
    %c0_293 = arith.constant 0 : index
    %597 = vector.load %arg37[%c0_292, %c0_293] : memref<32x64xf32, #tpu.memory_space<vmem>>, vector<32x64xf32>
    %cst_294 = arith.constant dense<0.000000e+00> : vector<16x64xf32>
    %598 = tpu.matmul %596, %597, %cst_294 {dimension_numbers = #tpu.dot_dimension_numbers<[1], [0], [0], [1], [0, 0, 1, 1], [], []>} : vector<16x32xf32>, vector<32x64xf32>, vector<16x64xf32> -> vector<16x64xf32>
    %c0_295 = arith.constant 0 : index
    %c0_296 = arith.constant 0 : index
    %599 = vector.load %arg38[%c0_295, %c0_296] : memref<1x64xf32, #tpu.memory_space<vmem>>, vector<1x64xf32>
    %600 = vector.broadcast %599 : vector<1x64xf32> to vector<16x64xf32>
    %601 = arith.addf %598, %600 : vector<16x64xf32>
    %602 = arith.mulf %601, %601 : vector<16x64xf32>
    %603 = arith.mulf %601, %602 : vector<16x64xf32>
    %cst_297 = arith.constant 4.471500e-02 : f32
    %604 = vector.broadcast %cst_297 : f32 to vector<16x64xf32>
    %605 = arith.mulf %604, %603 : vector<16x64xf32>
    %606 = arith.addf %601, %605 : vector<16x64xf32>
    %cst_298 = arith.constant 0.797884583 : f32
    %607 = vector.broadcast %cst_298 : f32 to vector<16x64xf32>
    %608 = arith.mulf %607, %606 : vector<16x64xf32>
    %609 = math.tanh %608 : vector<16x64xf32>
    %cst_299 = arith.constant 1.000000e+00 : f32
    %610 = vector.broadcast %cst_299 : f32 to vector<16x64xf32>
    %611 = arith.addf %610, %609 : vector<16x64xf32>
    %cst_300 = arith.constant 5.000000e-01 : f32
    %612 = vector.broadcast %cst_300 : f32 to vector<16x64xf32>
    %613 = arith.mulf %612, %611 : vector<16x64xf32>
    %614 = arith.mulf %601, %613 : vector<16x64xf32>
    %615 = vector.extract_strided_slice %563 {offsets = [1, 0], sizes = [1, 32], strides = [1, 1]} : vector<7x32xf32> to vector<1x32xf32>
    %c0_301 = arith.constant 0 : index
    %c0_302 = arith.constant 0 : index
    %616 = vector.load %arg39[%c0_301, %c0_302] : memref<32x32xf32, #tpu.memory_space<vmem>>, vector<32x32xf32>
    %cst_303 = arith.constant dense<0.000000e+00> : vector<1x32xf32>
    %617 = tpu.matmul %615, %616, %cst_303 {dimension_numbers = #tpu.dot_dimension_numbers<[1], [0], [0], [1], [0, 0, 1, 1], [], []>} : vector<1x32xf32>, vector<32x32xf32>, vector<1x32xf32> -> vector<1x32xf32>
    %c0_304 = arith.constant 0 : index
    %c0_305 = arith.constant 0 : index
    %618 = vector.load %arg40[%c0_304, %c0_305] : memref<1x32xf32, #tpu.memory_space<vmem>>, vector<1x32xf32>
    %619 = arith.addf %617, %618 : vector<1x32xf32>
    %cst_306 = arith.constant 0.000000e+00 : f32
    %620 = vector.broadcast %cst_306 : f32 to vector<1x32xf32>
    %621 = arith.maximumf %619, %620 : vector<1x32xf32>
    %c0_307 = arith.constant 0 : index
    %c0_308 = arith.constant 0 : index
    %622 = vector.load %arg41[%c0_307, %c0_308] : memref<32x32xf32, #tpu.memory_space<vmem>>, vector<32x32xf32>
    %cst_309 = arith.constant dense<0.000000e+00> : vector<1x32xf32>
    %623 = tpu.matmul %621, %622, %cst_309 {dimension_numbers = #tpu.dot_dimension_numbers<[1], [0], [0], [1], [0, 0, 1, 1], [], []>} : vector<1x32xf32>, vector<32x32xf32>, vector<1x32xf32> -> vector<1x32xf32>
    %c0_310 = arith.constant 0 : index
    %c0_311 = arith.constant 0 : index
    %624 = vector.load %arg42[%c0_310, %c0_311] : memref<1x32xf32, #tpu.memory_space<vmem>>, vector<1x32xf32>
    %625 = arith.addf %623, %624 : vector<1x32xf32>
    %cst_312 = arith.constant 0.000000e+00 : f32
    %626 = vector.broadcast %cst_312 : f32 to vector<1x32xf32>
    %627 = arith.maximumf %625, %626 : vector<1x32xf32>
    %c0_313 = arith.constant 0 : index
    %c0_314 = arith.constant 0 : index
    %628 = vector.load %arg43[%c0_313, %c0_314] : memref<32x64xf32, #tpu.memory_space<vmem>>, vector<32x64xf32>
    %cst_315 = arith.constant dense<0.000000e+00> : vector<1x64xf32>
    %629 = tpu.matmul %627, %628, %cst_315 {dimension_numbers = #tpu.dot_dimension_numbers<[1], [0], [0], [1], [0, 0, 1, 1], [], []>} : vector<1x32xf32>, vector<32x64xf32>, vector<1x64xf32> -> vector<1x64xf32>
    %c0_316 = arith.constant 0 : index
    %c0_317 = arith.constant 0 : index
    %630 = vector.load %arg44[%c0_316, %c0_317] : memref<1x64xf32, #tpu.memory_space<vmem>>, vector<1x64xf32>
    %631 = arith.addf %629, %630 : vector<1x64xf32>
    %632 = vector.broadcast %631 : vector<1x64xf32> to vector<16x64xf32>
    %633 = arith.mulf %614, %632 : vector<16x64xf32>
    %c0_318 = arith.constant 0 : index
    %c0_319 = arith.constant 0 : index
    %634 = vector.load %arg47[%c0_318, %c0_319] : memref<1x16xf32, #tpu.memory_space<vmem>>, vector<1x16xf32>
    %c0_320 = arith.constant 0 : index
    %c0_321 = arith.constant 0 : index
    %635 = vector.load %arg45[%c0_320, %c0_321] : memref<64x256xf32, #tpu.memory_space<vmem>>, vector<64x256xf32>
    %cst_322 = arith.constant dense<0.000000e+00> : vector<16x256xf32>
    %636 = tpu.matmul %633, %635, %cst_322 {dimension_numbers = #tpu.dot_dimension_numbers<[1], [0], [0], [1], [0, 0, 1, 1], [], []>} : vector<16x64xf32>, vector<64x256xf32>, vector<16x256xf32> -> vector<16x256xf32>
    %c0_323 = arith.constant 0 : index
    %c0_324 = arith.constant 0 : index
    %637 = vector.load %arg46[%c0_323, %c0_324] : memref<16x256xf32, #tpu.memory_space<vmem>>, vector<16x256xf32>
    %638 = arith.mulf %636, %637 : vector<16x256xf32>
    %cst_325 = arith.constant dense<0.000000e+00> : vector<1x256xf32>
    %639 = tpu.matmul %634, %638, %cst_325 {dimension_numbers = #tpu.dot_dimension_numbers<[1], [0], [0], [1], [0, 0, 1, 1], [], []>} : vector<1x16xf32>, vector<16x256xf32>, vector<1x256xf32> -> vector<1x256xf32>
    %c0_326 = arith.constant 0 : index
    %c0_327 = arith.constant 0 : index
    %640 = vector.load %arg48[%c0_326, %c0_327] : memref<256x1024xf32, #tpu.memory_space<vmem>>, vector<256x1024xf32>
    %cst_328 = arith.constant dense<0.000000e+00> : vector<1x1024xf32>
    %641 = tpu.matmul %639, %640, %cst_328 {dimension_numbers = #tpu.dot_dimension_numbers<[1], [0], [0], [1], [0, 0, 1, 1], [], []>} : vector<1x256xf32>, vector<256x1024xf32>, vector<1x1024xf32> -> vector<1x1024xf32>
    %c0_329 = arith.constant 0 : index
    %c0_330 = arith.constant 0 : index
    %c0_331 = arith.constant 0 : index
    %642 = vector.load %arg49[%c0_329, %c0_330, %c0_331] : memref<1x1x1024xf32, #tpu.memory_space<vmem>>, vector<1x1x1024xf32>
    %643 = vector.shape_cast %642 : vector<1x1x1024xf32> to vector<1x1024xf32>
    %644 = vector.shape_cast %641 : vector<1x1024xf32> to vector<1x1x1024xf32>
    tpu.vector_store %arg49[%c0_329, %c0_330, %c0_331], %644 {strides = array<i32>} : memref<1x1x1024xf32, #tpu.memory_space<vmem>>, vector<1x1x1024xf32>,
    return
  }
  func.func @transform_0(%arg0: i32) -> (i32, i32, i32) {
    %c0_i32 = arith.constant 0 : i32
    %c0_i32_0 = arith.constant 0 : i32
    %c0_i32_1 = arith.constant 0 : i32
    return %arg0, %c0_i32, %c0_i32_0 : i32, i32, i32
  }
  func.func @transform_1(%arg0: i32) -> (i32, i32, i32) {
    %c0_i32 = arith.constant 0 : i32
    %c0_i32_0 = arith.constant 0 : i32
    %c0_i32_1 = arith.constant 0 : i32
    return %arg0, %c0_i32, %c0_i32_0 : i32, i32, i32
  }
  func.func @transform_2(%arg0: i32) -> (i32, i32) {
    %c0_i32 = arith.constant 0 : i32
    %c0_i32_0 = arith.constant 0 : i32
    %c0_i32_1 = arith.constant 0 : i32
    return %c0_i32, %c0_i32_0 : i32, i32
  }
  func.func @transform_3(%arg0: i32) -> (i32, i32) {
    %c0_i32 = arith.constant 0 : i32
    %c0_i32_0 = arith.constant 0 : i32
    %c0_i32_1 = arith.constant 0 : i32
    return %c0_i32, %c0_i32_0 : i32, i32
  }
  func.func @transform_4(%arg0: i32) -> (i32, i32) {
    %c0_i32 = arith.constant 0 : i32
    %c0_i32_0 = arith.constant 0 : i32
    %c0_i32_1 = arith.constant 0 : i32
    return %c0_i32, %c0_i32_0 : i32, i32
  }
  func.func @transform_5(%arg0: i32) -> (i32, i32) {
    %c0_i32 = arith.constant 0 : i32
    %c0_i32_0 = arith.constant 0 : i32
    %c0_i32_1 = arith.constant 0 : i32
    return %c0_i32, %c0_i32_0 : i32, i32
  }
  func.func @transform_6(%arg0: i32) -> (i32, i32) {
    %c0_i32 = arith.constant 0 : i32
    %c0_i32_0 = arith.constant 0 : i32
    %c0_i32_1 = arith.constant 0 : i32
    return %c0_i32, %c0_i32_0 : i32, i32
  }
  func.func @transform_7(%arg0: i32) -> (i32, i32) {
    %c0_i32 = arith.constant 0 : i32
    %c0_i32_0 = arith.constant 0 : i32
    %c0_i32_1 = arith.constant 0 : i32
    return %c0_i32, %c0_i32_0 : i32, i32
  }
  func.func @transform_8(%arg0: i32) -> (i32, i32) {
    %c0_i32 = arith.constant 0 : i32
    %c0_i32_0 = arith.constant 0 : i32
    %c0_i32_1 = arith.constant 0 : i32
    return %c0_i32, %c0_i32_0 : i32, i32
  }
  func.func @transform_9(%arg0: i32) -> (i32, i32) {
    %c0_i32 = arith.constant 0 : i32
    %c0_i32_0 = arith.constant 0 : i32
    %c0_i32_1 = arith.constant 0 : i32
    return %c0_i32, %c0_i32_0 : i32, i32
  }
  func.func @transform_10(%arg0: i32) -> (i32, i32) {
    %c0_i32 = arith.constant 0 : i32
    %c0_i32_0 = arith.constant 0 : i32
    %c0_i32_1 = arith.constant 0 : i32
    return %c0_i32, %c0_i32_0 : i32, i32
  }
  func.func @transform_11(%arg0: i32) -> (i32, i32) {
    %c0_i32 = arith.constant 0 : i32
    %c0_i32_0 = arith.constant 0 : i32
    %c0_i32_1 = arith.constant 0 : i32
    return %c0_i32, %c0_i32_0 : i32, i32
  }
  func.func @transform_12(%arg0: i32) -> (i32, i32) {
    %c0_i32 = arith.constant 0 : i32
    %c0_i32_0 = arith.constant 0 : i32
    %c0_i32_1 = arith.constant 0 : i32
    return %c0_i32, %c0_i32_0 : i32, i32
  }
  func.func @transform_13(%arg0: i32) -> (i32, i32) {
    %c0_i32 = arith.constant 0 : i32
    %c0_i32_0 = arith.constant 0 : i32
    %c0_i32_1 = arith.constant 0 : i32
    return %c0_i32, %c0_i32_0 : i32, i32
  }
  func.func @transform_14(%arg0: i32) -> (i32, i32) {
    %c0_i32 = arith.constant 0 : i32
    %c0_i32_0 = arith.constant 0 : i32
    %c0_i32_1 = arith.constant 0 : i32
    return %c0_i32, %c0_i32_0 : i32, i32
  }
  func.func @transform_15(%arg0: i32) -> (i32, i32) {
    %c0_i32 = arith.constant 0 : i32
    %c0_i32_0 = arith.constant 0 : i32
    %c0_i32_1 = arith.constant 0 : i32
    return %c0_i32, %c0_i32_0 : i32, i32
  }
  func.func @transform_16(%arg0: i32) -> (i32, i32) {
    %c0_i32 = arith.constant 0 : i32
    %c0_i32_0 = arith.constant 0 : i32
    %c0_i32_1 = arith.constant 0 : i32
    return %c0_i32, %c0_i32_0 : i32, i32
  }
  func.func @transform_17(%arg0: i32) -> (i32, i32) {
    %c0_i32 = arith.constant 0 : i32
    %c0_i32_0 = arith.constant 0 : i32
    %c0_i32_1 = arith.constant 0 : i32
    return %c0_i32, %c0_i32_0 : i32, i32
  }
  func.func @transform_18(%arg0: i32) -> (i32, i32) {
    %c0_i32 = arith.constant 0 : i32
    %c0_i32_0 = arith.constant 0 : i32
    %c0_i32_1 = arith.constant 0 : i32
    return %c0_i32, %c0_i32_0 : i32, i32
  }
  func.func @transform_19(%arg0: i32) -> (i32, i32) {
    %c0_i32 = arith.constant 0 : i32
    %c0_i32_0 = arith.constant 0 : i32
    %c0_i32_1 = arith.constant 0 : i32
    return %c0_i32, %c0_i32_0 : i32, i32
  }
  func.func @transform_20(%arg0: i32) -> (i32, i32) {
    %c0_i32 = arith.constant 0 : i32
    %c0_i32_0 = arith.constant 0 : i32
    %c0_i32_1 = arith.constant 0 : i32
    return %c0_i32, %c0_i32_0 : i32, i32
  }
  func.func @transform_21(%arg0: i32) -> (i32, i32) {
    %c0_i32 = arith.constant 0 : i32
    %c0_i32_0 = arith.constant 0 : i32
    %c0_i32_1 = arith.constant 0 : i32
    return %c0_i32, %c0_i32_0 : i32, i32
  }
  func.func @transform_22(%arg0: i32) -> (i32, i32) {
    %c0_i32 = arith.constant 0 : i32
    %c0_i32_0 = arith.constant 0 : i32
    %c0_i32_1 = arith.constant 0 : i32
    return %c0_i32, %c0_i32_0 : i32, i32
  }
  func.func @transform_23(%arg0: i32) -> (i32, i32, i32) {
    %c0_i32 = arith.constant 0 : i32
    %c0_i32_0 = arith.constant 0 : i32
    %c0_i32_1 = arith.constant 0 : i32
    %c0_i32_2 = arith.constant 0 : i32
    return %c0_i32, %c0_i32_0, %c0_i32_1 : i32, i32, i32
  }
  func.func @transform_24(%arg0: i32) -> (i32, i32) {
    %c0_i32 = arith.constant 0 : i32
    %c0_i32_0 = arith.constant 0 : i32
    %c0_i32_1 = arith.constant 0 : i32
    return %c0_i32, %c0_i32_0 : i32, i32
  }
  func.func @transform_25(%arg0: i32) -> (i32, i32) {
    %c0_i32 = arith.constant 0 : i32
    %c0_i32_0 = arith.constant 0 : i32
    %c0_i32_1 = arith.constant 0 : i32
    return %c0_i32, %c0_i32_0 : i32, i32
  }
  func.func @transform_26(%arg0: i32) -> (i32, i32) {
    %c0_i32 = arith.constant 0 : i32
    %c0_i32_0 = arith.constant 0 : i32
    %c0_i32_1 = arith.constant 0 : i32
    return %c0_i32, %c0_i32_0 : i32, i32
  }
  func.func @transform_27(%arg0: i32) -> (i32, i32) {
    %c0_i32 = arith.constant 0 : i32
    %c0_i32_0 = arith.constant 0 : i32
    %c0_i32_1 = arith.constant 0 : i32
    return %c0_i32, %c0_i32_0 : i32, i32
  }
  func.func @transform_28(%arg0: i32) -> (i32, i32) {
    %c0_i32 = arith.constant 0 : i32
    %c0_i32_0 = arith.constant 0 : i32
    %c0_i32_1 = arith.constant 0 : i32
    return %c0_i32, %c0_i32_0 : i32, i32
  }
  func.func @transform_29(%arg0: i32) -> (i32, i32) {
    %c0_i32 = arith.constant 0 : i32
    %c0_i32_0 = arith.constant 0 : i32
    %c0_i32_1 = arith.constant 0 : i32
    return %c0_i32, %c0_i32_0 : i32, i32
  }
  func.func @transform_30(%arg0: i32) -> (i32, i32) {
    %c0_i32 = arith.constant 0 : i32
    %c0_i32_0 = arith.constant 0 : i32
    %c0_i32_1 = arith.constant 0 : i32
    return %c0_i32, %c0_i32_0 : i32, i32
  }
  func.func @transform_31(%arg0: i32) -> (i32, i32) {
    %c0_i32 = arith.constant 0 : i32
    %c0_i32_0 = arith.constant 0 : i32
    %c0_i32_1 = arith.constant 0 : i32
    return %c0_i32, %c0_i32_0 : i32, i32
  }
  func.func @transform_32(%arg0: i32) -> (i32, i32) {
    %c0_i32 = arith.constant 0 : i32
    %c0_i32_0 = arith.constant 0 : i32
    %c0_i32_1 = arith.constant 0 : i32
    return %c0_i32, %c0_i32_0 : i32, i32
  }
  func.func @transform_33(%arg0: i32) -> (i32, i32) {
    %c0_i32 = arith.constant 0 : i32
    %c0_i32_0 = arith.constant 0 : i32
    %c0_i32_1 = arith.constant 0 : i32
    return %c0_i32, %c0_i32_0 : i32, i32
  }
  func.func @transform_34(%arg0: i32) -> (i32, i32) {
    %c0_i32 = arith.constant 0 : i32
    %c0_i32_0 = arith.constant 0 : i32
    %c0_i32_1 = arith.constant 0 : i32
    return %c0_i32, %c0_i32_0 : i32, i32
  }
  func.func @transform_35(%arg0: i32) -> (i32, i32) {
    %c0_i32 = arith.constant 0 : i32
    %c0_i32_0 = arith.constant 0 : i32
    %c0_i32_1 = arith.constant 0 : i32
    return %c0_i32, %c0_i32_0 : i32, i32
  }
  func.func @transform_36(%arg0: i32) -> (i32, i32) {
    %c0_i32 = arith.constant 0 : i32
    %c0_i32_0 = arith.constant 0 : i32
    %c0_i32_1 = arith.constant 0 : i32
    return %c0_i32, %c0_i32_0 : i32, i32
  }
  func.func @transform_37(%arg0: i32) -> (i32, i32) {
    %c0_i32 = arith.constant 0 : i32
    %c0_i32_0 = arith.constant 0 : i32
    %c0_i32_1 = arith.constant 0 : i32
    return %c0_i32, %c0_i32_0 : i32, i32
  }
  func.func @transform_38(%arg0: i32) -> (i32, i32) {
    %c0_i32 = arith.constant 0 : i32
    %c0_i32_0 = arith.constant 0 : i32
    %c0_i32_1 = arith.constant 0 : i32
    return %c0_i32, %c0_i32_0 : i32, i32
  }
  func.func @transform_39(%arg0: i32) -> (i32, i32) {
    %c0_i32 = arith.constant 0 : i32
    %c0_i32_0 = arith.constant 0 : i32
    %c0_i32_1 = arith.constant 0 : i32
    return %c0_i32, %c0_i32_0 : i32, i32
  }
  func.func @transform_40(%arg0: i32) -> (i32, i32) {
    %c0_i32 = arith.constant 0 : i32
    %c0_i32_0 = arith.constant 0 : i32
    %c0_i32_1 = arith.constant 0 : i32
    return %c0_i32, %c0_i32_0 : i32, i32
  }
  func.func @transform_41(%arg0: i32) -> (i32, i32) {
    %c0_i32 = arith.constant 0 : i32
    %c0_i32_0 = arith.constant 0 : i32
    %c0_i32_1 = arith.constant 0 : i32
    return %c0_i32, %c0_i32_0 : i32, i32
  }
  func.func @transform_42(%arg0: i32) -> (i32, i32) {
    %c0_i32 = arith.constant 0 : i32
    %c0_i32_0 = arith.constant 0 : i32
    %c0_i32_1 = arith.constant 0 : i32
    return %c0_i32, %c0_i32_0 : i32, i32
  }
  func.func @transform_43(%arg0: i32) -> (i32, i32) {
    %c0_i32 = arith.constant 0 : i32
    %c0_i32_0 = arith.constant 0 : i32
    %c0_i32_1 = arith.constant 0 : i32
    return %c0_i32, %c0_i32_0 : i32, i32
  }
  func.func @transform_44(%arg0: i32) -> (i32, i32) {
    %c0_i32 = arith.constant 0 : i32
    %c0_i32_0 = arith.constant 0 : i32
    %c0_i32_1 = arith.constant 0 : i32
    return %c0_i32, %c0_i32_0 : i32, i32
  }
  func.func @transform_45(%arg0: i32) -> (i32, i32) {
    %c0_i32 = arith.constant 0 : i32
    %c0_i32_0 = arith.constant 0 : i32
    %c0_i32_1 = arith.constant 0 : i32
    return %c0_i32, %c0_i32_0 : i32, i32
  }
  func.func @transform_46(%arg0: i32) -> (i32, i32) {
    %c0_i32 = arith.constant 0 : i32
    %c0_i32_0 = arith.constant 0 : i32
    %c0_i32_1 = arith.constant 0 : i32
    return %c0_i32, %c0_i32_0 : i32, i32
  }
  func.func @transform_47(%arg0: i32) -> (i32, i32) {
    %c0_i32 = arith.constant 0 : i32
    %c0_i32_0 = arith.constant 0 : i32
    %c0_i32_1 = arith.constant 0 : i32
    return %c0_i32, %c0_i32_0 : i32, i32
  }
  func.func @transform_48(%arg0: i32) -> (i32, i32, i32) {
    %c0_i32 = arith.constant 0 : i32
    %c0_i32_0 = arith.constant 0 : i32
    %c0_i32_1 = arith.constant 0 : i32
    return %arg0, %c0_i32, %c0_i32_0 : i32, i32, i32
  }
}

</mosaic_0001>

<bundles_post_ra>
// kernel: medsam_forward.1
= control target key start
LH: loop header
LB: loop body
LE: loop exit
PB: predicated region body
PF: predicated region fallthrough
CT: control target
= control target key end

     0   :  { %s9951_s6 = smov 1   ;;  %s9952_s10 = smov 2   ;;  %s11338_s0 = inlined_call_operand.smem [shape: u32[49], index: -1, kind: input, shape index: {}] }
   0x1   :  { %s10025_s5 = sld [smem:[%s11338_s0]]   ;;  %s9953_s14 = smov 3  }
   0x2   :  { %s10030_s9 = sld [smem:[%s11338_s0 + %s9951_s6]]   ;;  %s9954_s18 = smov 4  }
   0x3   :  { %s10035_s13 = sld [smem:[%s11338_s0 + %s9952_s10]]   ;;  %s9955_s22 = smov 5  }
   0x4   :  { %s10040_s17 = sld [smem:[%s11338_s0 + %s9953_s14]]   ;;  %s9956_s26 = smov 6  }
   0x5   :  { %s10045_s21 = sld [smem:[%s11338_s0 + %s9954_s18]]   ;;  %s9957_s30 = smov 7  }
   0x6   :  { %s10050_s25 = sld [smem:[%s11338_s0 + %s9955_s22]]   ;;  %s9958_s4 = smov 8  }
   0x7   :  { %s10055_s29 = sld [smem:[%s11338_s0 + %s9956_s26]]   ;;  %s9959_s10 = smov 9  }
   0x8   :  { %11371 = sst [smem:[#allocation21_spill]] %s10030_s9  ;;  %s9960_s15 = smov 10  }
   0x9   :  { %s10060_s3 = sld [smem:[%s11338_s0 + %s9957_s30]]   ;;  %s9961_s20 = smov 11  }
   0xa   :  { %s10065_s8 = sld [smem:[%s11338_s0 + %s9958_s4]]   ;;  %s9962_s26 = smov 12  }
   0xb   :  { %s10070_s14 = sld [smem:[%s11338_s0 + %s9959_s10]]   ;;  %s9963_s1 = smov 13  }
   0xc   :  { %s10075_s19 = sld [smem:[%s11338_s0 + %s9960_s15]]   ;;  %s9964_s7 = smov 14  }
   0xd   :  { %11372 = sst [smem:[#allocation22_spill]] %s10055_s29  ;;  %s9965_s15 = smov 15  }
   0xe   :  { %s10080_s24 = sld [smem:[%s11338_s0 + %s9961_s20]]   ;;  %s9966_s22 = smov 16  }
   0xf   :  { %s10085_s30 = sld [smem:[%s11338_s0 + %s9962_s26]]   ;;  %s9967_s28 = smov 17  }
  0x10   :  { %11373 = sst [smem:[#allocation23_spill]] %s10065_s8 }
  0x11   :  { %11374 = sst [smem:[#allocation24_spill]] %s10070_s14 }
  0x12   :  { %11375 = sst [smem:[#allocation25_spill]] %s10075_s19 }
  0x13   :  { %s10090_s6 = sld [smem:[%s11338_s0 + %s9963_s1]]  }
  0x14   :  { %11376 = sst [smem:[#allocation26_spill]] %s10080_s24 }
  0x15   :  { %11377 = sst [smem:[#allocation27_spill]] %s10085_s30 }
  0x16   :  { %s10095_s12 = sld [smem:[%s11338_s0 + %s9964_s7]]   ;;  %s9968_s7 = smov 18  }
  0x17   :  { %s10100_s20 = sld [smem:[%s11338_s0 + %s9965_s15]]   ;;  %s9969_s15 = smov 19  }
  0x18   :  { %s10105_s27 = sld [smem:[%s11338_s0 + %s9966_s22]]   ;;  %s9970_s22 = smov 20  }
  0x19   :  { %11378 = sst [smem:[#allocation28_spill]] %s10090_s6 }
  0x1a   :  { %s10110_s4 = sld [smem:[%s11338_s0 + %s9967_s28]]   ;;  %s9971_s28 = smov 21  }
  0x1b   :  { %s10115_s9 = sld [smem:[%s11338_s0 + %s9968_s7]]   ;;  %s9972_s7 = smov 22  }
  0x1c   :  { %11379 = sst [smem:[#allocation29_spill]] %s10095_s12 }
  0x1d   :  { %11380 = sst [smem:[#allocation30_spill]] %s10100_s20 }
  0x1e   :  { %11381 = sst [smem:[#allocation31_spill]] %s10105_s27 }
  0x1f   :  { %s10120_s12 = sld [smem:[%s11338_s0 + %s9969_s15]]   ;;  %s9973_s15 = smov 23  }
  0x20   :  { %11382 = sst [smem:[#allocation32_spill]] %s10110_s4 }
  0x21   :  { %11383 = sst [smem:[#allocation33_spill]] %s10115_s9 }
  0x22   :  { %s10125_s27 = sld [smem:[%s11338_s0 + %s9970_s22]]   ;;  %s9974_s22 = smov 24  }
  0x23   :  { %s10130_s4 = sld [smem:[%s11338_s0 + %s9971_s28]]   ;;  %s9975_s28 = smov 25  }
  0x24   :  { %s10135_s9 = sld [smem:[%s11338_s0 + %s9972_s7]]   ;;  %s9976_s7 = smov 26  }
  0x25   :  { %11384 = sst [smem:[#allocation34_spill]] %s10120_s12 }
  0x26   :  { %s10140_s12 = sld [smem:[%s11338_s0 + %s9973_s15]]   ;;  %s9977_s15 = smov 27  }
  0x28   :  { %11385 = sst [smem:[#allocation35_spill]] %s10125_s27 }
  0x29   :  { %11386 = sst [smem:[#allocation36_spill]] %s10130_s4 }
  0x2a   :  { %11387 = sst [smem:[#allocation37_spill]] %s10135_s9 }
  0x2b   :  { %s10145_s27 = sld [smem:[%s11338_s0 + %s9974_s22]]   ;;  %s9978_s22 = smov 28  }
  0x2c   :  { %11388 = sst [smem:[#allocation38_spill]] %s10140_s12 }
  0x2d   :  { %s10150_s4 = sld [smem:[%s11338_s0 + %s9975_s28]]   ;;  %s9979_s28 = smov 29  }
  0x2e   :  { %s10155_s9 = sld [smem:[%s11338_s0 + %s9976_s7]]   ;;  %s9980_s7 = smov 30  }
  0x2f   :  { %s10160_s12 = sld [smem:[%s11338_s0 + %s9977_s15]]   ;;  %s9981_s15 = smov 31  }
  0x31   :  { %11389 = sst [smem:[#allocation39_spill]] %s10145_s27 }
  0x32   :  { %s10165_s27 = sld [smem:[%s11338_s0 + %s9978_s22]]   ;;  %s9982_s22 = smov 32  }
  0x33   :  { %11390 = sst [smem:[#allocation40_spill]] %s10150_s4 }
  0x34   :  { %11391 = sst [smem:[#allocation41_spill]] %s10155_s9 }
  0x35   :  { %11392 = sst [smem:[#allocation42_spill]] %s10160_s12 }
  0x36   :  { %s10170_s4 = sld [smem:[%s11338_s0 + %s9979_s28]]   ;;  %s9983_s28 = smov 33  }
  0x37   :  { %s10175_s9 = sld [smem:[%s11338_s0 + %s9980_s7]]   ;;  %s9984_s7 = smov 34  }
  0x38   :  { %11393 = sst [smem:[#allocation43_spill]] %s10165_s27 }
  0x39   :  { %s10180_s12 = sld [smem:[%s11338_s0 + %s9981_s15]]   ;;  %s9985_s15 = smov 35  }
  0x3a   :  { %s10185_s27 = sld [smem:[%s11338_s0 + %s9982_s22]]   ;;  %s9986_s22 = smov 36  }
  0x3b   :  { %s10195_s20 = sld [smem:[%s11338_s0 + %s9984_s7]]   ;;  %s9988_s7 = smov 38  }
  0x3c   :  { %11394 = sst [smem:[#allocation44_spill]] %s10170_s4 }
  0x3d   :  { %s10190_s4 = sld [smem:[%s11338_s0 + %s9983_s28]]   ;;  %s9987_s28 = smov 37  }
  0x3e   :  { %s10205_s30 = sld [smem:[%s11338_s0 + %s9986_s22]]   ;;  %s9990_s22 = smov 40  }
  0x3f   :  { %11395 = sst [smem:[#allocation45_spill]] %s10180_s12 }
  0x40   :  { %s10200_s12 = sld [smem:[%s11338_s0 + %s9985_s15]]   ;;  %s9989_s15 = smov 39  }
  0x41   :  { %s10215_s24 = sld [smem:[%s11338_s0 + %s9988_s7]]   ;;  %s9992_s7 = smov 42  }
  0x42   :  { %s10220_s6 = sld [smem:[%s11338_s0 + %s9989_s15]]   ;;  %s9993_s15 = smov 43  }
  0x43   :  { %11396 = sst [smem:[#allocation46_spill]] %s10190_s4 }
  0x44   :  { %11397 = sst [smem:[#allocation47_spill]] %s10205_s30 }
  0x45   :  { %s10210_s4 = sld [smem:[%s11338_s0 + %s9987_s28]]   ;;  %s9991_s28 = smov 41  }
  0x46   :  { %s10225_s30 = sld [smem:[%s11338_s0 + %s9990_s22]]   ;;  %s9994_s22 = smov 44  }
  0x47   :  { %11398 = sst [smem:[#allocation48_spill]] %s10215_s24 }
  0x48   :  { %s10230_s19 = sld [smem:[%s11338_s0 + %s9991_s28]]   ;;  %s9995_s28 = smov 45  }
  0x49   :  { %s10235_s24 = sld [smem:[%s11338_s0 + %s9992_s7]]   ;;  %s9996_s7 = smov 46  }
  0x4a   :  { %s10240_s14 = sld [smem:[%s11338_s0 + %s9993_s15]]   ;;  %s9997_s15 = smov 47  }
  0x4b   :  { %s10250_s8 = sld [smem:[%s11338_s0 + %s9995_s28]]  }
  0x4c   :  { %11399 = sst [smem:[#allocation49_spill]] %s10225_s30 }
  0x4d   :  { %s10245_s30 = sld [smem:[%s11338_s0 + %s9994_s22]]   ;;  %s9998_s22 = smov 48  }
  0x4e   :  { %s10260_s29 = sld [smem:[%s11338_s0 + %s9997_s15]]  }
  0x4f   :  { %11400 = sst [smem:[#allocation50_spill]] %s10235_s24 }
  0x50   :  { %s10255_s24 = sld [smem:[%s11338_s0 + %s9996_s7]]  }
  0x53   :  { %11401 = sst [smem:[#allocation51_spill]] %s10245_s30 }
  0x54   :  { %s10265_s30 = sld [smem:[%s11338_s0 + %s9998_s22]]  }
  0x55   :  { %102 = vsyncpa [#allocation3], 0 }
  0x56   :  { %103 = vsyncpa [#allocation5], 0 }
  0x57   :  { %104 = vsyncpa [#allocation8], 0 }
  0x58   :  { %105 = vsyncpa [#allocation11], 0 }
  0x59   :  { %106 = vsyncpa [#allocation14], 0  ;;  %s10267_s28 = smov 0  }
  0x5a LB: > { %s9999_s1 = smov [#allocation4]   ;;  %s10273_s7 = sadd.s32 4294967295, %s9949_s28   ;;  %s9949_s28 = sphi %s10267_s28, %s112_s28  }
  0x5b   : > { %s1272_s2 = sshll.u32 %s9999_s1, 4  ;;  %p7828_p0 = scmp.ge.s32.totalorder %s9949_s28, 1  ;;  %s10278_s2 = int_to_ptr.vmem [resolvable:$true] %s1272_s2 }
  0x5c   : > { %p1161_p1 = scmp.lt.s32.totalorder %s9949_s28, 3  ;;  %p11357_p2 = scmp.eq.s32.totalorder %s10273_s7, 0 }
  0x5d   : > { %s10000_s10 = smov [#allocation7]   ;;  %s10001_s15 = smov [#allocation10]  }
  0x5e   : > { %p10280_p3 = pnand %p7828_p0, %p1161_p1  ;;  %s1297_s11 = sshll.u32 %s10000_s10, 4  ;;  %s10286_s11 = int_to_ptr.vmem [resolvable:$true] %s1297_s11 }
  0x5f   : > { %s1325_s16 = sshll.u32 %s10001_s15, 4  ;;  %s10002_s22 = smov [#allocation13]   ;;  %s10294_s16 = int_to_ptr.vmem [resolvable:$true] %s1325_s16 }
  0x60   : > { %s11402_s0 = scalar_select %p10280_p3, 1, 0 }
  0x61   : > { %p9415_p4 = pneg %p10280_p3  ;;  %s1353_s23 = sshll.u32 %s10002_s22, 4  ;;  %s10296_s23 = int_to_ptr.vmem [resolvable:$true] %s1353_s23 }
  0x62   : > { %s9671_s26 = scalar_lea.hbm %s10185_s27, 16 }
  0x63   : > { %p10290_p5 = pnand %p11357_p2, %p9415_p4  ;;  %p9672_p6 = scmp.ne.s32.totalorder %s10185_s27, %s9671_s26 }
  0x64   : > { %p9678_p10 = scmp.lt.u32.totalorder %s9671_s26, %s10185_s27 }
  0x65   : > { %p10302_p7 = pneg %p10290_p5 }
  0x67   : > { %p9674_p8 = pnand %p10302_p7, %p9672_p6 }
  0x69   : > { %p9675_p9 = pneg %p9674_p8 }
  0x6b   : > { %p9680_p11 = pnand %p9678_p10, %p9675_p9 }
  0x6d   : > { %9683 = shalt.err (!%p9680_p11)
}
  0x6e   : > { %s9684_s10 = scalar_lea.vmem %s10278_s2, 16  ;;  %s9691_s15 = scalar_lea.vmem %s10278_s2, 32 }
  0x6f   : > { %p9685_p12 = scmp.ne.s32.totalorder %s10278_s2, %s9684_s10  ;;  %p9692_p1 = scmp.lt.s32.totalorder %s10278_s2, %s10278_s2 }
  0x70   : > { %p9693_p4 = scmp.lt.s32.totalorder %s9691_s15, %s9684_s10 }
  0x71   : > { %p9687_p13 = pnand %p9685_p12, %p10302_p7 }
  0x72   : > { %p9694_p2 = por %p9693_p4, %p9692_p1 }
  0x73   : > { %p9688_p0 = pneg %p9687_p13 }
  0x75   : > { %p9695_p6 = pnand %p9694_p2, %p9688_p0 }
  0x77   : > { %9698 = shalt.err (!%p9695_p6)
}
  0x78   : > { %9421 = dma.hbm_to_vmem [thread:$0]  (!%p10290_p5), %s10185_s27, 16, %s10278_s2, [#allocation5]  }
  0x79   : > { %s9699_s22 = scalar_lea.hbm %s10200_s12, 16 }
  0x7a   : > { %p9700_p8 = scmp.ne.s32.totalorder %s10200_s12, %s9699_s22  ;;  %p9706_p11 = scmp.lt.u32.totalorder %s9699_s22, %s10200_s12 }
  0x7c   : > { %p9702_p9 = pnand %p9700_p8, %p10302_p7 }
  0x7e   : > { %p9703_p10 = pneg %p9702_p9 }
  0x80   : > { %p9708_p12 = pnand %p9706_p11, %p9703_p10 }
  0x82   : > { %9711 = shalt.err (!%p9708_p12)
}
  0x83   : > { %s9712_s26 = scalar_lea.vmem %s10286_s11, 16  ;;  %s9719_s10 = scalar_lea.vmem %s10286_s11, 32 }
  0x84   : > { %p9713_p2 = scmp.ne.s32.totalorder %s10286_s11, %s9712_s26  ;;  %p9720_p1 = scmp.lt.s32.totalorder %s10286_s11, %s10286_s11 }
  0x85   : > { %p9721_p4 = scmp.lt.s32.totalorder %s9719_s10, %s9712_s26 }
  0x86   : > { %p9715_p13 = pnand %p9713_p2, %p10302_p7 }
  0x87   : > { %p9722_p6 = por %p9721_p4, %p9720_p1 }
  0x88   : > { %p9716_p0 = pneg %p9715_p13 }
  0x8a   : > { %p9723_p8 = pnand %p9722_p6, %p9716_p0 }
  0x8c   : > { %9726 = shalt.err (!%p9723_p8)
}
  0x8d   : > { %9427 = dma.hbm_to_vmem [thread:$0]  (!%p10290_p5), %s10200_s12, 16, %s10286_s11, [#allocation8]  }
  0x8e   : > { %s9727_s2 = scalar_lea.hbm %s10220_s6, 16 }
  0x8f   : > { %p9728_p9 = scmp.ne.s32.totalorder %s10220_s6, %s9727_s2  ;;  %p9734_p12 = scmp.lt.u32.totalorder %s9727_s2, %s10220_s6 }
  0x91   : > { %p9730_p10 = pnand %p9728_p9, %p10302_p7 }
  0x93   : > { %p9731_p11 = pneg %p9730_p10 }
  0x95   : > { %p9736_p2 = pnand %p9734_p12, %p9731_p11 }
  0x97   : > { %9739 = shalt.err (!%p9736_p2)
}
  0x98   : > { %s9740_s15 = scalar_lea.vmem %s10294_s16, 16  ;;  %s9747_s22 = scalar_lea.vmem %s10294_s16, 32 }
  0x99   : > { %p9741_p13 = scmp.ne.s32.totalorder %s10294_s16, %s9740_s15  ;;  %p9748_p4 = scmp.lt.s32.totalorder %s10294_s16, %s10294_s16 }
  0x9a   : > { %p9749_p6 = scmp.lt.s32.totalorder %s9747_s22, %s9740_s15 }
  0x9b   : > { %p9743_p0 = pnand %p9741_p13, %p10302_p7 }
  0x9c   : > { %p9750_p8 = por %p9749_p6, %p9748_p4 }
  0x9d   : > { %p9744_p1 = pneg %p9743_p0 }
  0x9f   : > { %p9751_p9 = pnand %p9750_p8, %p9744_p1 }
  0xa1   : > { %9754 = shalt.err (!%p9751_p9)
}
  0xa2   : > { %9433 = dma.hbm_to_vmem [thread:$0]  (!%p10290_p5), %s10220_s6, 16, %s10294_s16, [#allocation11]  }
  0xa3   : > { %s9755_s11 = scalar_lea.hbm %s10240_s14, 16 }
  0xa4   : > { %p9756_p10 = scmp.ne.s32.totalorder %s10240_s14, %s9755_s11  ;;  %p9762_p2 = scmp.lt.u32.totalorder %s9755_s11, %s10240_s14 }
  0xa6   : > { %p9758_p11 = pnand %p9756_p10, %p10302_p7 }
  0xa8   : > { %p9759_p12 = pneg %p9758_p11 }
  0xaa   : > { %p9764_p13 = pnand %p9762_p2, %p9759_p12 }
  0xac   : > { %9767 = shalt.err (!%p9764_p13)
}
  0xad   : > { %s9768_s26 = scalar_lea.vmem %s10296_s23, 16  ;;  %s9775_s10 = scalar_lea.vmem %s10296_s23, 32 }
  0xae   : > { %p9769_p0 = scmp.ne.s32.totalorder %s10296_s23, %s9768_s26  ;;  %p9776_p6 = scmp.lt.s32.totalorder %s10296_s23, %s10296_s23 }
  0xaf   : > { %p9777_p8 = scmp.lt.s32.totalorder %s9775_s10, %s9768_s26 }
  0xb0   : > { %p9771_p1 = pnand %p9769_p0, %p10302_p7 }
  0xb1   : > { %p9778_p9 = por %p9777_p8, %p9776_p6 }
  0xb2   : > { %p9772_p4 = pneg %p9771_p1 }
  0xb4   : > { %p9779_p10 = pnand %p9778_p9, %p9772_p4 }
  0xb6   : > { %9782 = shalt.err (!%p9779_p10)
}
  0xb7   : > { %9439 = dma.hbm_to_vmem [thread:$0]  (!%p10290_p5), %s10240_s14, 16, %s10296_s23, [#allocation14]  }
  0xb8   : > { %s10003_s16 = smov [#allocation2]   ;;  %s10004_s15 = smov [#allocation6]  }
  0xb9   : > { %s1258_s2 = sshll.u32 %s10003_s16, 4  ;;  %s1286_s22 = sshll.u32 %s10004_s15, 4  ;;  %s1259_s2 = int_to_ptr.vmem [resolvable:$true] %s1258_s2  ;;  %s1287_s22 = int_to_ptr.vmem [resolvable:$true] %s1286_s22 }
  0xba   : > { %s9783_s11 = scalar_lea.hbm %s10175_s9, 16 }
  0xbb   : > { %p9784_p11 = scmp.ne.s32.totalorder %s10175_s9, %s9783_s11  ;;  %p9790_p13 = scmp.lt.u32.totalorder %s9783_s11, %s10175_s9 }
  0xbd   : > { %p9786_p12 = pnand %p9784_p11, %p10302_p7 }
  0xbf   : > { %p9787_p2 = pneg %p9786_p12 }
  0xc1   : > { %p9792_p0 = pnand %p9790_p13, %p9787_p2 }
  0xc3   : > { %9795 = shalt.err (!%p9792_p0)
}
  0xc4   : > { %s9796_s26 = scalar_lea.vmem %s1259_s2, 16  ;;  %s9803_s23 = scalar_lea.vmem %s1259_s2, 32 }
  0xc5   : > { %p9797_p1 = scmp.ne.s32.totalorder %s1259_s2, %s9796_s26  ;;  %p9804_p8 = scmp.lt.s32.totalorder %s1259_s2, %s1259_s2 }
  0xc6   : > { %p9805_p9 = scmp.lt.s32.totalorder %s9803_s23, %s9796_s26 }
  0xc7   : > { %p9799_p4 = pnand %p9797_p1, %p10302_p7 }
  0xc8   : > { %p9806_p10 = por %p9805_p9, %p9804_p8 }
  0xc9   : > { %p9800_p6 = pneg %p9799_p4 }
  0xcb   : > { %p9807_p3 = pnand %p9806_p10, %p9800_p6 }
  0xcd   : > { %9810 = shalt.err (!%p9807_p3)
}
  0xce   : > { %9418 = dma.hbm_to_vmem [thread:$0]  (!%p10290_p5), %s10175_s9, 16, %s1259_s2, [#allocation3]  }
  0xcf   : > { %s9811_s10 = scalar_lea.hbm %s10195_s20, 16 }
  0xd0   : > { %p9812_p11 = scmp.ne.s32.totalorder %s10195_s20, %s9811_s10  ;;  %p9818_p13 = scmp.lt.u32.totalorder %s9811_s10, %s10195_s20 }
  0xd2   : > { %p9814_p12 = pnand %p9812_p11, %p10302_p7 }
  0xd4   : > { %p9815_p2 = pneg %p9814_p12 }
  0xd6   : > { %p9820_p0 = pnand %p9818_p13, %p9815_p2 }
  0xd8   : > { %9823 = shalt.err (!%p9820_p0)
}
  0xd9   : > { %s9824_s16 = scalar_lea.vmem %s1287_s22, 16  ;;  %s9831_s15 = scalar_lea.vmem %s1287_s22, 32 }
  0xda   : > { %p9825_p3 = scmp.ne.s32.totalorder %s1287_s22, %s9824_s16  ;;  %p9832_p6 = scmp.lt.s32.totalorder %s1287_s22, %s1287_s22 }
  0xdb   : > { %p9833_p8 = scmp.lt.s32.totalorder %s9831_s15, %s9824_s16 }
  0xdc   : > { %p9827_p1 = pnand %p9825_p3, %p10302_p7 }
  0xdd   : > { %p9834_p9 = por %p9833_p8, %p9832_p6 }
  0xde   : > { %p9828_p4 = pneg %p9827_p1 }
  0xe0   : > { %p9835_p10 = pnand %p9834_p9, %p9828_p4 }
  0xe2   : > { %9838 = shalt.err (!%p9835_p10)
}
  0xe3   : > { %9424 = dma.hbm_to_vmem [thread:$0]  (!%p10290_p5), %s10195_s20, 16, %s1287_s22, [#allocation5]  }
  0xe4   : > { %s10005_s2 = smov [#allocation9]   ;;  %s10006_s26 = smov [#allocation12]  }
  0xe5   : > { %s1311_s11 = sshll.u32 %s10005_s2, 4  ;;  %s1339_s23 = sshll.u32 %s10006_s26, 4  ;;  %s1312_s11 = int_to_ptr.vmem [resolvable:$true] %s1311_s11  ;;  %s1340_s23 = int_to_ptr.vmem [resolvable:$true] %s1339_s23 }
  0xe6   : > { %s9839_s10 = scalar_lea.hbm %s10210_s4, 16 }
  0xe7   : > { %p9840_p11 = scmp.ne.s32.totalorder %s10210_s4, %s9839_s10  ;;  %p9846_p13 = scmp.lt.u32.totalorder %s9839_s10, %s10210_s4 }
  0xe9   : > { %p9842_p12 = pnand %p9840_p11, %p10302_p7 }
  0xeb   : > { %p9843_p2 = pneg %p9842_p12 }
  0xed   : > { %p9848_p0 = pnand %p9846_p13, %p9843_p2 }
  0xef   : > { %9851 = shalt.err (!%p9848_p0)
}
  0xf0   : > { %s9852_s16 = scalar_lea.vmem %s1312_s11, 16  ;;  %s9859_s22 = scalar_lea.vmem %s1312_s11, 32 }
  0xf1   : > { %p9853_p3 = scmp.ne.s32.totalorder %s1312_s11, %s9852_s16  ;;  %p9860_p6 = scmp.lt.s32.totalorder %s1312_s11, %s1312_s11 }
  0xf2   : > { %p9861_p8 = scmp.lt.s32.totalorder %s9859_s22, %s9852_s16 }
  0xf3   : > { %p9855_p1 = pnand %p9853_p3, %p10302_p7 }
  0xf4   : > { %p9862_p9 = por %p9861_p8, %p9860_p6 }
  0xf5   : > { %p9856_p4 = pneg %p9855_p1 }
  0xf7   : > { %p9863_p10 = pnand %p9862_p9, %p9856_p4 }
  0xf9   : > { %9866 = shalt.err (!%p9863_p10)
}
  0xfa   : > { %9430 = dma.hbm_to_vmem [thread:$0]  (!%p10290_p5), %s10210_s4, 16, %s1312_s11, [#allocation8]  }
  0xfb   : > { %s9867_s15 = scalar_lea.hbm %s10230_s19, 16 }
  0xfc   : > { %p9868_p11 = scmp.ne.s32.totalorder %s10230_s19, %s9867_s15  ;;  %p9874_p13 = scmp.lt.u32.totalorder %s9867_s15, %s10230_s19 }
  0xfe   : > { %p9870_p12 = pnand %p9868_p11, %p10302_p7 }
 0x100   : > { %p9871_p2 = pneg %p9870_p12 }
 0x102   : > { %p9876_p0 = pnand %p9874_p13, %p9871_p2 }
 0x104   : > { %9879 = shalt.err (!%p9876_p0)
}
 0x105   : > { %s9880_s2 = scalar_lea.vmem %s1340_s23, 16  ;;  %s9887_s26 = scalar_lea.vmem %s1340_s23, 32 }
 0x106   : > { %p9881_p3 = scmp.ne.s32.totalorder %s1340_s23, %s9880_s2  ;;  %p9888_p6 = scmp.lt.s32.totalorder %s1340_s23, %s1340_s23 }
 0x107   : > { %p9889_p8 = scmp.lt.s32.totalorder %s9887_s26, %s9880_s2 }
 0x108   : > { %p9883_p1 = pnand %p9881_p3, %p10302_p7 }
 0x109   : > { %p9890_p9 = por %p9889_p8, %p9888_p6 }
 0x10a   : > { %p9884_p4 = pneg %p9883_p1 }
 0x10c   : > { %p9891_p10 = pnand %p9890_p9, %p9884_p4 }
 0x10e   : > { %9894 = shalt.err (!%p9891_p10)
}
 0x10f   : > { %9436 = dma.hbm_to_vmem [thread:$0]  (!%p10290_p5), %s10230_s19, 16, %s1340_s23, [#allocation11]  }
 0x110   : > { %s10007_s11 = smov [#allocation15]   ;;  %s9895_s16 = scalar_lea.hbm %s10255_s24, 16 }
 0x111   : > { %s1370_s10 = sshll.u32 %s10007_s11, 4  ;;  %p9896_p11 = scmp.ne.s32.totalorder %s10255_s24, %s9895_s16  ;;  %s1371_s10 = int_to_ptr.vmem [resolvable:$true] %s1370_s10 }
 0x112   : > { %p9902_p13 = scmp.lt.u32.totalorder %s9895_s16, %s10255_s24 }
 0x113   : > { %p9898_p12 = pnand %p9896_p11, %p10302_p7 }
 0x115   : > { %p9899_p2 = pneg %p9898_p12 }
 0x117   : > { %p9904_p0 = pnand %p9902_p13, %p9899_p2 }
 0x119   : > { %9907 = shalt.err (!%p9904_p0)
}
 0x11a   : > { %s9908_s22 = scalar_lea.vmem %s1371_s10, 16  ;;  %s9915_s15 = scalar_lea.vmem %s1371_s10, 32 }
 0x11b   : > { %p9909_p3 = scmp.ne.s32.totalorder %s1371_s10, %s9908_s22  ;;  %p9916_p6 = scmp.lt.s32.totalorder %s1371_s10, %s1371_s10 }
 0x11c   : > { %p9917_p8 = scmp.lt.s32.totalorder %s9915_s15, %s9908_s22 }
 0x11d   : > { %p9911_p1 = pnand %p9909_p3, %p10302_p7 }
 0x11e   : > { %p9918_p9 = por %p9917_p8, %p9916_p6 }
 0x11f   : > { %p9912_p4 = pneg %p9911_p1 }
 0x121   : > { %p9919_p10 = pnand %p9918_p9, %p9912_p4 }
 0x123   : > { %9922 = shalt.err (!%p9919_p10)
}
 0x124   : > { %9442 = dma.hbm_to_vmem [thread:$0]  (!%p10290_p5), %s10255_s24, 16, %s1371_s10, [#allocation14]  }
 0x125   : > { %p11405_p11 = scmp.ne.s32.totalorder %s11402_s0, 0 }
 0x126   : > { %p11406_p12 = scmp.eq.s32.totalorder (!%p11405_p11), %s10273_s7, 0 }
 0x127   : > { %1401 = sbr.rel (%p11405_p11) target bundleno = 12531 (0x30f3), region = 212 }
 0x12e   : > { %9928 = dma.done.wait (%p11406_p12), [#allocation3], 16   ;;  %p11407_p2 = pmov %p11406_p12 }
 0x130   : > { %9930 = vsyncadd (%p11407_p2), [#allocation3], 4294967280  ;;  %p11408_p7 = pmov %p11407_p2 }
 0x131   : > { %p11409_p13 = pmov %p11407_p2 }
 0x132   : > { %9932 = dma.done.wait (%p11408_p7), [#allocation5], 32  }
 0x133   : > { %9934 = vsyncadd (%p11409_p13), [#allocation5], 4294967264  ;;  %p11410_p0 = pmov %p11407_p2 }
 0x135   : > { %9936 = dma.done.wait (%p11410_p0), [#allocation8], 32   ;;  %p11411_p5 = pmov %p11410_p0 }
 0x136   : > { %p11412_p3 = pmov %p11410_p0 }
 0x137   : > { %9938 = vsyncadd (%p11411_p5), [#allocation8], 4294967264 }
 0x138   : > { %9940 = dma.done.wait (%p11412_p3), [#allocation11], 32   ;;  %p11413_p1 = pmov %p11410_p0 }
 0x139   : > { %p11414_p4 = pmov %p11410_p0 }
 0x13a   : > { %9942 = vsyncadd (%p11413_p1), [#allocation11], 4294967264 }
 0x13b   : > { %9944 = dma.done.wait (%p11414_p4), [#allocation14], 32   ;;  %p11415_p6 = pmov %p11410_p0 }
 0x13c   : > { %v10008_v0 = vmov 0.0|0.0   ;;  %p1550_p8 = scmp.lt.s32.totalorder %s10273_s7, 1  ;;  %v1567_v1 = vld [vmem:[%s10040_s17] sm:$0xff]  ;;  %v1568_v2 = vld [vmem:[%s10040_s17 + $0x8] sm:$0xff]  ;;  %v1569_v3 = vld [vmem:[%s10040_s17 + $0x10] sm:$0xff]  ;;  %vm1598_vm0 = vcmask 523264  }
 0x13d   : > { %9946 = vsyncadd (%p11415_p6), [#allocation14], 4294967264  ;;  %8791 = vmatprep.subr.bf16.mxu0 %v10008_v0  ;;  %v8792_v4 = vpack.c.bf16 %v1568_v2, %v1567_v1  ;;  %v1570_v5 = vld [vmem:[%s10040_s17 + $0x18] sm:$0xff]  ;;  %v1571_v7 = vld [vmem:[%s10040_s17 + $0x20] sm:$0xff]  ;;  %vm1686_vm1 = vcmask 261120   ;;  %s11416_s1 = sld [smem:[#allocation22_spill]] }
 0x13e   : > { %s11452_s7 = smov (!%p1550_p8, %s10273_s7), 1  ;;  %v8795_v6 = vpack.c.bf16 %v1570_v5, %v1569_v3  ;;  %v1572_v8 = vld [vmem:[%s10040_s17 + $0x28] sm:$0xff]  ;;  %v1573_v10 = vld [vmem:[%s10040_s17 + $0x30] sm:$0xff]  ;;  %v1574_v11 = vld [vmem:[%s10040_s17 + $0x38] sm:$0xff]  ;;  %s11417_s23 = sld [smem:[#allocation23_spill]]  ;;  %vm1828_vm2 = vcmask 130048  }
 0x13f   : > { %s8065_s0 = sshll.u32 %s11452_s7, 5  ;;  %8793 = vmatpush1.bf16.msra.mxu0 %v8792_v4  ;;  %v8798_v9 = vpack.c.bf16 %v1572_v8, %v1571_v7  ;;  %v8801_v13 = vpack.c.bf16 %v1574_v11, %v1573_v10  ;;  %v1575_v14 = vld [vmem:[%s10040_s17 + $0x40] sm:$0xff]  ;;  %v1576_v15 = vld [vmem:[%s10040_s17 + $0x48] sm:$0xff]  ;;  %v1577_v17 = vld [vmem:[%s10040_s17 + $0x50] sm:$0xff]  ;;  %s10009_s2 = smov 96   ;;  %vm10014_vm4 = vmmov 0  }
 0x140   : > { %8794 = vmatprep.subr.bf16.mxu0 %v10008_v0  ;;  %s10454_s18 = scalar_lea.vmem %s10025_s5, %s8065_s0  ;;  %v8804_v16 = vpack.c.bf16 %v1576_v15, %v1575_v14  ;;  %v1578_v18 = vld [vmem:[%s10040_s17 + $0x58] sm:$0xff]  ;;  %v1579_v20 = vld [vmem:[%s10040_s17 + $0x60] sm:$0xff]  ;;  %v1580_v21 = vld [vmem:[%s10040_s17 + $0x68] sm:$0xff]  ;;  %s10010_s26 = smov 80   ;;  %vm3128_vm5 = vcmask 55296   ;;  %vm3144_vm6 = vcmask 1046528  }
 0x141   : > { %v1564_v12 = vld [vmem:[%s10454_s18 + $0x8] sm:$0xff]  ;;  %v8807_v19 = vpack.c.bf16 %v1578_v18, %v1577_v17  ;;  %v8810_v22 = vpack.c.bf16 %v1580_v21, %v1579_v20  ;;  %v1581_v23 = vld [vmem:[%s10040_s17 + $0x70] sm:$0xff]  ;;  %v1582_v24 = vld [vmem:[%s10040_s17 + $0x78] sm:$0xff]  ;;  %s11360_s11 = smov 112   ;;  %s10012_s10 = smov 64   ;;  %vm3140_vm7 = vcmask 56320  }
 0x142   : > { %7854 = vmatprep.mubr.msk.f32.mxu0 %vm1598_vm0, %v1564_v12  ;;  %v8813_v25 = vpack.c.bf16 %v1582_v24, %v1581_v23  ;;  %v1583_v26 = vld [vmem:[%s10040_s17 + $0x80] sm:$0xff]  ;;  %v1584_v27 = vld [vmem:[%s10040_s17 + $0x88] sm:$0xff]  ;;  %v1585_v29 = vld [vmem:[%s10040_s17 + $0x90] sm:$0xff]  ;;  %s10013_s16 = smov 48   ;;  %s11420_s22 = sld [smem:[#allocation24_spill]]  ;;  %vm3539_vm8 = vcmask 260096  }
 0x143   : > { %8796 = vmatpush1.bf16.msra.mxu0 %v8795_v6  ;;  %v8816_v28 = vpack.c.bf16 %v1584_v27, %v1583_v26  ;;  %v1586_v30 = vld [vmem:[%s10040_s17 + $0x98] sm:$0xff]  ;;  %v1587_v32 = vld [vmem:[%s10040_s17 + $0xa0] sm:$0xff]  ;;  %v1588_v33 = vld [vmem:[%s10040_s17 + $0xa8] sm:$0xff]  ;;  %s11421_s15 = sld [smem:[#allocation25_spill]]  ;;  %s11422_s0 = sld [smem:[#allocation28_spill]]  ;;  %vm3916_vm9 = vcmask 129024  }
 0x144   : > { %8797 = vmatprep.subr.bf16.mxu0 %v10008_v0  ;;  %v8819_v31 = vpack.c.bf16 %v1586_v30, %v1585_v29  ;;  %v8822_v34 = vpack.c.bf16 %v1588_v33, %v1587_v32  ;;  %v1589_v35 = vld [vmem:[%s10040_s17 + $0xb0] sm:$0xff]  ;;  %v1590_v36 = vld [vmem:[%s10040_s17 + $0xb8] sm:$0xff]  ;;  %v1563_v38 = vld [vmem:[%s10454_s18] sm:$0xff] }
 0x145   : > { %v8825_v37 = vpack.c.bf16 %v1590_v36, %v1589_v35  ;;  %v1566_v39 = vld [vmem:[%s10454_s18 + $0x18] sm:$0xff]  ;;  %v1565_v40 = vld [vmem:[%s10454_s18 + $0x10] sm:$0xff]  ;;  %v7853_v41 = vld [vmem:[%s10045_s21] ss:$0 sm:$0xff]  ;;  %s11423_s18 = sld [smem:[#allocation26_spill]] }
 0x146   : > { %v1680_v43 = vld [vmem:[%s10035_s13] sm:$0xff]  ;;  %v1681_v48 = vld [vmem:[%s10035_s13 + $0x8] sm:$0xff]  ;;  %v1732_v3 = vld [vmem:[%s10060_s3 + $0x10] sm:$0xff] }
 0x147   : > { %8799 = vmatpush1.bf16.msra.mxu0 %v8798_v9  ;;  %v1730_v1 = vld [vmem:[%s10060_s3] sm:$0xff]  ;;  %v1731_v2 = vld [vmem:[%s10060_s3 + $0x8] sm:$0xff]  ;;  %v1733_v5 = vld [vmem:[%s10060_s3 + $0x18] sm:$0xff] }
 0x148   : > { %8800 = vmatprep.subr.bf16.mxu0 %v10008_v0  ;;  %v8827_v4 = vpack.c.bf16 %v1731_v2, %v1730_v1  ;;  %v8831_v6 = vpack.c.bf16 %v1733_v5, %v1732_v3  ;;  %v7856_v14 = vld [vmem:[%s10050_s25] ss:$0 sm:$0xff]  ;;  %vm10523_vm3 = vmpackc.low %vm1828_vm2, %vm1828_vm2 }
 0x149   : > { %v7858_v23 = vld [vmem:[%s11417_s23] ss:$0 sm:$0xff]  ;;  %s11425_s23 = sld [smem:[#allocation30_spill]] }
 0x14a   : > { %8828 = vmatprep.subr.bf16.mxu1 %v8827_v4 }
 0x14b   : > { %8802 = vmatpush1.bf16.msra.mxu0 %v8801_v13  ;;  %8830 = vmatpush3.bf16.msra.mxu1 %v8827_v4 }
 0x14c   : > { %8803 = vmatprep.subr.bf16.mxu0 %v10008_v0  ;;  %8832 = vmatprep.subr.bf16.mxu1 %v8831_v6 }
 0x14f   : > { %8805 = vmatpush1.bf16.msra.mxu0 %v8804_v16  ;;  %8834 = vmatpush3.bf16.msra.mxu1 %v8831_v6  ;;  %v7857_v16 = vld [vmem:[%s11416_s1] ss:$0 sm:$0xff]  ;;  %s11424_s1 = sld [smem:[#allocation27_spill]] }
 0x150   : > { %8806 = vmatprep.subr.bf16.mxu0 %v10008_v0 }
 0x153   : > { %8808 = vmatpush1.bf16.msra.mxu0 %v8807_v19 }
 0x154   : > { %8809 = vmatprep.subr.bf16.mxu0 %v10008_v0 }
 0x157   : > { %8811 = vmatpush1.bf16.msra.mxu0 %v8810_v22 }
 0x158   : > { %8812 = vmatprep.subr.bf16.mxu0 %v10008_v0 }
 0x15b   : > { %8814 = vmatpush1.bf16.msra.mxu0 %v8813_v25 }
 0x15c   : > { %8815 = vmatprep.subr.bf16.mxu0 %v10008_v0 }
 0x15f   : > { %8817 = vmatpush1.bf16.msra.mxu0 %v8816_v28 }
 0x160   : > { %8818 = vmatprep.subr.bf16.mxu0 %v10008_v0 }
 0x163   : > { %8820 = vmatpush1.bf16.msra.mxu0 %v8819_v31 }
 0x164   : > { %8821 = vmatprep.subr.bf16.mxu0 %v10008_v0 }
 0x167   : > { %8823 = vmatpush1.bf16.msra.mxu0 %v8822_v34 }
 0x168   : > { %8824 = vmatprep.subr.bf16.mxu0 %v10008_v0 }
 0x16b   : > { %8826 = vmatpush1.bf16.msra.mxu0 %v8825_v37 }
 0x16e   : > { %1670 = vmatmul.mubr.f32.vlgmr.msra.gmra.mrb[0].mxu0 %v1563_v38 }
 0x16f   : > { %7855 = vmatprep.mubr.msk.f32.mxu0 %vm1598_vm0, %v1566_v39 }
 0x172   : > { %1675 = vmatmul.mubr.f32.gmra.mrb[2].mxu0 %v1565_v40 }
 0x241   : > { %v1671_v42 = vpop.f32.mrb[0].mxu0 }
 0x242   : > { %v1672_v44 = vadd.f32 %v7853_v41, %v1671_v42  ;;  %v1673_v45 = vpop.f32.mrb[1].mxu0 }
 0x244   : > { %v10492_v46 = vadd.f32 %v1680_v43, %v1672_v44 }
 0x245   : > { %v1676_v47 = vpop.f32.mrb[2].mxu0 }
 0x246   : > { %v1677_v49 = vadd.f32 %v7853_v41, %v1676_v47  ;;  %v1678_v50 = vpop.f32.mrb[3].mxu0  ;;  %v1687_v51 = vsel %vm1686_vm1, %v10492_v46, 0.0 }
 0x247   : > { %1688 = vadd.xlane.f32.xlu0 %v1687_v51 }
 0x248   : > { %v10497_v52 = vadd.f32 %v1681_v48, %v1677_v49 }
 0x24a   : > { %v1690_v53 = vsel %vm1686_vm1, %v10497_v52, 0.0 }
 0x24b   : > { %1691 = vadd.xlane.f32.xlu0 %v1690_v53 }
 0x2d4   : > { %v1689_v54 = vpop.xlane.xlu0 %1688 }
 0x2d5   : > { %v1694_v55 = vmul.f32 0.03125, %v1689_v54 }
 0x2d7   : > { %v1696_v56 = vsub.f32 %v10492_v46, %v1694_v55 }
 0x2d8   : > { %v1692_v57 = vpop.xlane.xlu0 %1691 }
 0x2d9   : > { %v1695_v58 = vmul.f32 0.03125, %v1692_v57  ;;  %v1698_v59 = vmul.f32 %v1696_v56, %v1696_v56 }
 0x2db   : > { %v1697_v60 = vsub.f32 %v10497_v52, %v1695_v58  ;;  %v1700_v61 = vsel %vm1686_vm1, %v1698_v59, 0.0 }
 0x2dc   : > { %1701 = vadd.xlane.f32.xlu1 %v1700_v61 }
 0x2dd   : > { %v1699_v62 = vmul.f32 %v1697_v60, %v1697_v60 }
 0x2df   : > { %v1703_v63 = vsel %vm1686_vm1, %v1699_v62, 0.0 }
 0x2e0   : > { %1704 = vadd.xlane.f32.xlu1 %v1703_v63 }
 0x369   : > { %v1702_v7 = vpop.xlane.xlu1 %1701 }
 0x36a   : > { %v1706_v8 = vmul.f32 0.03125, %v1702_v7 }
 0x36c   : > { %v1708_v9 = vadd.f32 1e-05, %v1706_v8 }
 0x36d   : > { %v1705_v10 = vpop.xlane.xlu1 %1704 }
 0x36e   : > { %9575 = vrsqrt.f32 %v1708_v9  ;;  %v1707_v11 = vmul.f32 0.03125, %v1705_v10 }
 0x370   : > { %v1709_v12 = vadd.f32 1e-05, %v1707_v11 }
 0x372   : > { %9577 = vrsqrt.f32 %v1709_v12 }
 0x378   : > { %v9576_v13 = vpop.eup %9575 }
 0x379   : > { %v1712_v15 = vmul.f32 %v9576_v13, %v1696_v56 }
 0x37b   : > { %v1720_v17 = vmul.f32 %v7856_v14, %v1712_v15 }
 0x37c   : > { %v9578_v18 = vpop.eup %9577 }
 0x37d   : > { %v1713_v19 = vmul.f32 %v9578_v18, %v1697_v60  ;;  %v1728_v20 = vadd.f32 %v7857_v16, %v1720_v17 }
 0x37f   : > { %v1721_v21 = vmul.f32 %v7856_v14, %v1713_v19  ;;  %8314 = vmatprep.mubr.msk.f32.mxu1 %vm1686_vm1, %v1728_v20 }
 0x381   : > { %v1729_v22 = vadd.f32 %v7857_v16, %v1721_v21 }
 0x383   : > { %8315 = vmatmul.mubr.msk.f32.vlgmr.msra.gmra.mrb[0].mxu1 %vm1686_vm1, %v1729_v22 }
 0x456   : > { %v8316_v24 = vpop.f32.mrb[0].mxu1 }
 0x457   : > { %v1819_v25 = vadd.f32 %v8316_v24, %v7858_v23  ;;  %v1813_v26 = vpop.f32.mrb[1].mxu1 }
 0x458   : > { %v1814_v27 = vadd.f32 %v7858_v23, %v1813_v26 }
 0x45a   : > { %8321 = vmatprep.mubr.msk.f32.mxu1 %vm1828_vm2, %v1814_v27  ;;  %v10515_v28 = vpack.i.bf16 %v1819_v25, %v1814_v27 }
 0x45c   : > { %9536 = vrot.lane.b32.xlu0 %v10515_v28, %s10009_s2  ;;  %s11426_s2 = sld [smem:[#allocation32_spill]] }
 0x460   : > { %9546 = vrot.lane.b32.xlu0 %v10515_v28, %s10010_s26  ;;  %s11427_s26 = sld [smem:[#allocation29_spill]] }
 0x464   : > { %2025 = vrot.lane.b32.xlu0 %v1814_v27, %s11360_s11  ;;  %v2227_v27 = vld [vmem:[%s11420_s22 + $0x10] sm:$0xff] }
 0x468   : > { %2027 = vrot.lane.b32.xlu0 %v1819_v25, %s11360_s11 }
 0x4ce   : > { %v9537_v29 = vpop.permute.xlu0 %9536 }
 0x4cf   : > { %v9539_v30 = vunpack.i.h.bf16 %v9537_v29  ;;  %v9538_v31 = vunpack.i.l.bf16 %v9537_v29 }
 0x4d1   : > { %v8835_v33 = vpack.c.bf16 %v9539_v30, %v9538_v31 }
 0x4d2   : > { %v9547_v54 = vpop.permute.xlu0 %9546 }
 0x4d3   : > { %8837 = vmatprep.subr.msk.bf16.mxu1 %vm10523_vm3, %v8835_v33  ;;  %v9549_v56 = vunpack.i.h.bf16 %v9547_v54  ;;  %v9548_v57 = vunpack.i.l.bf16 %v9547_v54 }
 0x4d4   : > { %8840 = vmatpush3.bf16.xpose.msk.msra.mxu1 %vm10523_vm3, %v8835_v33 }
 0x4d5   : > { %v8845_v61 = vpack.c.bf16 %v9549_v56, %v9548_v57 }
 0x4d6   : > { %v2026_v3 = vpop.permute.xlu0 %2025 }
 0x4da   : > { %v2028_v4 = vpop.permute.xlu0 %2027 }
 0x4db   : > { %8322 = vmatmul.mubr.msk.f32.vlgmr.msra.gmra.mrb[2].mxu1 %vm1828_vm2, %v1819_v25 }
 0x5ae   : > { %v8323_v34 = vpop.f32.mrb[2].mxu1 }
 0x5af   : > { %v1903_v35 = vpop.f32.mrb[3].mxu1  ;;  %v1913_v37 = vmul.f32 0.25, %v8323_v34 }
 0x5b0   : > { %v1912_v36 = vmul.f32 0.25, %v1903_v35 }
 0x5b1   : > { %v1917_v39 = vsel %vm1828_vm2, %v1913_v37, -inf }
 0x5b2   : > { %v1914_v38 = vsel %vm1828_vm2, %v1912_v36, -inf }
 0x5b3   : > { %1915 = vmax.xlane.f32.xlu1 %v1914_v38  ;;  %v2024_v38 = vld [vmem:[%s11420_s22 + $0x8] sm:$0xff] }
 0x5b7   : > { %1918 = vmax.xlane.f32.xlu1 %v1917_v39 }
 0x640   : > { %v1916_v40 = vpop.xlane.xlu1 %1915 }
 0x641   : > { %v1920_v41 = vsub.f32 %v1912_v36, %v1916_v40 }
 0x643   : > { %v1922_v44 = vmul.f32 1.442695, %v1920_v41 }
 0x644   : > { %v1919_v42 = vpop.xlane.xlu1 %1918 }
 0x645   : > { %v1921_v43 = vsub.f32 %v1913_v37, %v1919_v42  ;;  %v2023_v37 = vld [vmem:[%s11420_s22] sm:$0xff] }
 0x646   : > { %v8859_v39 = vpack.c.bf16 %v2024_v38, %v2023_v37 }
 0x647   : > { %v1924_v45 = vmul.f32 1.442695, %v1921_v43  ;;  %v7877_v43 = vld [vmem:[%s11421_s15] ss:$0 sm:$0xff]  ;;  %s11430_s15 = sld [smem:[#allocation31_spill]] }
 0x649   : > { %9579 = vpow2.f32 %v1924_v45 }
 0x64a   : > { %9581 = vpow2.f32 %v1922_v44 }
 0x653   : > { %v9580_v47 = vpop.eup %9579 }
 0x654   : > { %v1929_v48 = vsel %vm1828_vm2, %v9580_v47, 0.0  ;;  %v9582_v49 = vpop.eup %9581 }
 0x655   : > { %1930 = vadd.xlane.f32.xlu1 %v1929_v48  ;;  %v1926_v50 = vsel %vm1828_vm2, %v9582_v49, 0.0 }
 0x659   : > { %1927 = vadd.xlane.f32.xlu1 %v1926_v50 }
 0x66a   : > { %9541 = vrot.lane.b32.xlu1 %v10515_v28, %s10012_s10  ;;  %s11428_s10 = sld [smem:[#allocation38_spill]] }
 0x6e2   : > { %v1931_v51 = vpop.xlane.xlu1 %1930 }
 0x6e3   : > { %9583 = vrcp.f32 %v1931_v51 }
 0x6e6   : > { %v1928_v53 = vpop.xlane.xlu1 %1927 }
 0x6e7   : > { %9585 = vrcp.f32 %v1928_v53 }
 0x6ea   : > { %v9542_v55 = vpop.permute.xlu1 %9541 }
 0x6eb   : > { %v9544_v58 = vunpack.i.h.bf16 %v9542_v55  ;;  %v9543_v59 = vunpack.i.l.bf16 %v9542_v55 }
 0x6ed   : > { %v8841_v60 = vpack.c.bf16 %v9544_v58, %v9543_v59  ;;  %v9584_v62 = vpop.eup %9583 }
 0x6ee   : > { %v1935_v2 = vmul.f32 %v9584_v62, %v9580_v47  ;;  %v2447_v62 = vld [vmem:[%s11422_s0 + $0x8] sm:$0xff] }
 0x6ef   : > { %8842 = vmatprep.subr.bf16.mxu1 %v8841_v60 }
 0x6f0   : > { %8844 = vmatpush3.bf16.msra.mxu1 %v8841_v60 }
 0x6f1   : > { %v9586_v63 = vpop.eup %9585  ;;  %8847 = vmatprep.subr.msk.bf16.mxu1 %vm10523_vm3, %v8845_v61 }
 0x6f2   : > { %v1933_v1 = vmul.f32 %v9586_v63, %v9582_v49 }
 0x6f4   : > { %8328 = vmatprep.mubr.msk.f32.mxu1 %vm1828_vm2, %v1933_v1  ;;  %v2448_v1 = vld [vmem:[%s11422_s0 + $0x10] sm:$0xff] }
 0x6f5   : > { %8329 = vmatmul.mubr.msk.f32.vlgmr.msra.gmra.mrb[4].mxu1 %vm1828_vm2, %v1935_v2  ;;  %v2449_v2 = vld [vmem:[%s11422_s0 + $0x18] sm:$0xff] }
 0x6f6   : > { %8335 = vmatprep.mubr.msk.f32.mxu1 %vm1828_vm2, %v2026_v3  ;;  %v8867_v3 = vpack.c.bf16 %v2449_v2, %v2448_v1  ;;  %v7894_v1 = vld [vmem:[%s11428_s10 + $0x20] sm:$0xff]  ;;  %v7895_v2 = vld [vmem:[%s11428_s10 + $0x28] sm:$0xff] }
 0x6f9   : > { %8850 = vmatpush3.bf16.xpose.msk.msra.mxu1 %vm10523_vm3, %v8845_v61  ;;  %v2446_v61 = vld [vmem:[%s11422_s0] sm:$0xff]  ;;  %s11441_s0 = sld [smem:[#allocation43_spill]] }
 0x6fa   : > { %v8863_v63 = vpack.c.bf16 %v2447_v62, %v2446_v61  ;;  %v2658_v61 = vld [vmem:[%s11426_s2 + $0x10] sm:$0xff]  ;;  %v2659_v62 = vld [vmem:[%s11426_s2 + $0x18] sm:$0xff] }
 0x700   : > { %8336 = vmatmul.mubr.msk.f32.vlgmr.msra.gmra.mrb[6].mxu1 %vm1828_vm2, %v2028_v4 }
 0x7c8   : > { %v8330_v5 = vpop.f32.mrb[4].mxu1 }
 0x7c9   : > { %v2014_v6 = vpop.f32.mrb[5].mxu1 }
 0x7d3   : > { %v8337_v7 = vpop.f32.mrb[6].mxu1 }
 0x7d4   : > { %v2117_v8 = vmul.f32 0.25, %v8337_v7  ;;  %v2107_v9 = vpop.f32.mrb[7].mxu1 }
 0x7d5   : > { %v2116_v10 = vmul.f32 0.25, %v2107_v9 }
 0x7d6   : > { %v2121_v11 = vsel %vm1828_vm2, %v2117_v8, -inf }
 0x7d7   : > { %2122 = vmax.xlane.f32.xlu0 %v2121_v11  ;;  %v2118_v12 = vsel %vm1828_vm2, %v2116_v10, -inf  ;;  %v7878_v11 = vld [vmem:[%s11423_s18] ss:$0 sm:$0xff]  ;;  %s11359_s18 = sshll.u32 %s11452_s7, 3 }
 0x7d8   : > { %2119 = vmax.xlane.f32.xlu1 %v2118_v12 }
 0x7e9   : > { %9551 = vrot.lane.b32.xlu1 %v10515_v28, %s10013_s16  ;;  %v2228_v28 = vld [vmem:[%s11420_s22 + $0x18] sm:$0xff]  ;;  %s11429_s16 = sld [smem:[#allocation21_spill]] }
 0x7ea   : > { %v8855_v29 = vpack.c.bf16 %v2228_v28, %v2227_v27  ;;  %v2561_v27 = vld [vmem:[%s11425_s23 + $0x28] sm:$0xff] }
 0x864   : > { %v2123_v13 = vpop.xlane.xlu0 %2122 }
 0x865   : > { %v2125_v14 = vsub.f32 %v2117_v8, %v2123_v13  ;;  %v2120_v15 = vpop.xlane.xlu1 %2119  ;;  %v7879_v13 = vld [vmem:[%s11424_s1] ss:$0 sm:$0xff]  ;;  %s1558_s1 = scalar_lea.vmem %s11429_s16, %s11359_s18  ;;  %s11432_s16 = sld [smem:[#allocation33_spill]] }
 0x866   : > { %v2124_v16 = vsub.f32 %v2116_v10, %v2120_v15  ;;  %s11436_s18 = sld [smem:[#allocation37_spill]] }
 0x867   : > { %v2128_v17 = vmul.f32 1.442695, %v2125_v14 }
 0x868   : > { %v2126_v18 = vmul.f32 1.442695, %v2124_v16 }
 0x869   : > { %v9552_v19 = vpop.permute.xlu1 %9551 }
 0x86a   : > { %9587 = vpow2.f32 %v2126_v18  ;;  %v9554_v20 = vunpack.i.h.bf16 %v9552_v19  ;;  %v9553_v21 = vunpack.i.l.bf16 %v9552_v19 }
 0x86b   : > { %9589 = vpow2.f32 %v2128_v17 }
 0x86c   : > { %v8851_v22 = vpack.c.bf16 %v9554_v20, %v9553_v21  ;;  %v2556_v20 = vld [vmem:[%s11425_s23] sm:$0xff]  ;;  %v2557_v21 = vld [vmem:[%s11425_s23 + $0x8] sm:$0xff] }
 0x86e   : > { %8852 = vmatprep.subr.bf16.mxu1 %v8851_v22 }
 0x86f   : > { %8854 = vmatpush3.bf16.msra.mxu1 %v8851_v22  ;;  %v8871_v22 = vpack.c.bf16 %v2557_v21, %v2556_v20  ;;  %v2807_v20 = vld [vmem:[%s11428_s10 + $0x18] sm:$0xff] }
 0x870   : > { %8856 = vmatprep.subr.bf16.mxu1 %v8855_v29 }
 0x871   : > { %8872 = vmatprep.subr.bf16.mxu0 %v8871_v22 }
 0x872   : > { %8874 = vmatpush3.bf16.msra.mxu0 %v8871_v22 }
 0x874   : > { %v9588_v23 = vpop.eup %9587 }
 0x875   : > { %v2130_v24 = vsel %vm1828_vm2, %v9588_v23, 0.0  ;;  %v9590_v25 = vpop.eup %9589 }
 0x876   : > { %2131 = vadd.xlane.f32.xlu0 %v2130_v24  ;;  %v2133_v26 = vsel %vm1828_vm2, %v9590_v25, 0.0  ;;  %v2559_v24 = vld [vmem:[%s11425_s23 + $0x18] sm:$0xff] }
 0x87a   : > { %2134 = vadd.xlane.f32.xlu0 %v2133_v26  ;;  %v2560_v26 = vld [vmem:[%s11425_s23 + $0x20] sm:$0xff] }
 0x87b   : > { %v8879_v28 = vpack.c.bf16 %v2561_v27, %v2560_v26 }
 0x903   : > { %v2132_v30 = vpop.xlane.xlu0 %2131 }
 0x904   : > { %9591 = vrcp.f32 %v2132_v30  ;;  %v2563_v30 = vld [vmem:[%s11425_s23 + $0x38] sm:$0xff] }
 0x907   : > { %v2135_v31 = vpop.xlane.xlu0 %2134 }
 0x908   : > { %9593 = vrcp.f32 %v2135_v31 }
 0x90e   : > { %v9592_v33 = vpop.eup %9591 }
 0x90f   : > { %v2137_v34 = vmul.f32 %v9592_v33, %v9588_v23  ;;  %v2558_v23 = vld [vmem:[%s11425_s23 + $0x10] sm:$0xff]  ;;  %v2656_v33 = vld [vmem:[%s11426_s2] sm:$0xff] }
 0x911   : > { %8342 = vmatprep.mubr.msk.f32.mxu1 %vm1828_vm2, %v2137_v34  ;;  %v2657_v34 = vld [vmem:[%s11426_s2 + $0x8] sm:$0xff]  ;;  %s11442_s2 = smov 112  }
 0x912   : > { %v9594_v35 = vpop.eup %9593 }
 0x913   : > { %v2139_v36 = vmul.f32 %v9594_v35, %v9590_v25  ;;  %v8875_v25 = vpack.c.bf16 %v2559_v24, %v2558_v23  ;;  %v8887_v35 = vpack.c.bf16 %v2657_v34, %v2656_v33  ;;  %v7901_v33 = vld [vmem:[%s11428_s10 + $0x48] sm:$0xff]  ;;  %v7902_v34 = vld [vmem:[%s11428_s10 + $0x50] sm:$0xff] }
 0x915   : > { %8343 = vmatmul.mubr.msk.f32.vlgmr.msra.gmra.mrb[8].mxu1 %vm1828_vm2, %v2139_v36  ;;  %8876 = vmatprep.subr.bf16.mxu0 %v8875_v25  ;;  %v7880_v36 = vld [vmem:[%s11427_s26] ss:$0 sm:$0xff]  ;;  %s11431_s26 = sld [smem:[#allocation39_spill]] }
 0x916   : > { %8858 = vmatpush3.bf16.msra.mxu1 %v8855_v29  ;;  %8878 = vmatpush3.bf16.msra.mxu0 %v8875_v25  ;;  %v2562_v29 = vld [vmem:[%s11425_s23 + $0x30] sm:$0xff] }
 0x917   : > { %8860 = vmatprep.subr.bf16.mxu1 %v8859_v39  ;;  %8880 = vmatprep.subr.bf16.mxu0 %v8879_v28  ;;  %v8883_v31 = vpack.c.bf16 %v2563_v30, %v2562_v29 }
 0x91a   : > { %8882 = vmatpush3.bf16.msra.mxu0 %v8879_v28 }
 0x91b   : > { %8884 = vmatprep.subr.bf16.mxu0 %v8883_v31  ;;  %v7892_v26 = vld [vmem:[%s11431_s26] ss:$0 sm:$0xff] }
 0x91e   : > { %8886 = vmatpush3.bf16.msra.mxu0 %v8883_v31  ;;  %v7900_v31 = vld [vmem:[%s11428_s10 + $0x40] sm:$0xff] }
 0x91f   : > { %8901 = vmatprep.subr.bf16.mxu0 %v10008_v0 }
 0x9e8   : > { %v8344_v40 = vpop.f32.mrb[8].mxu1 }
 0x9e9   : > { %v2218_v41 = vpop.f32.mrb[9].mxu1 }
 0x9ea   : > { %8349 = vmatprep.mubr.msk.f32.mxu1 %vm1828_vm2, %v2218_v41 }
 0x9eb   : > { %8350 = vmatmul.mubr.msk.f32.vlgmr.msra.gmra.mrb[10].mxu1 %vm1828_vm2, %v8344_v40 }
 0x9ec   : > { %8862 = vmatpush3.bf16.msra.mxu1 %v8859_v39  ;;  %8356 = vmatprep.mubr.msk.f32.mxu1 %vm1828_vm2, %v2014_v6 }
 0x9ed   : > { %8864 = vmatprep.subr.bf16.mxu1 %v8863_v63 }
 0x9f3   : > { %8357 = vmatmul.mubr.msk.f32.vlgmr.msra.gmra.mrb[10].mxu1 %vm1828_vm2, %v8330_v5 }
 0x9f4   : > { %8866 = vmatpush3.bf16.msra.mxu1 %v8863_v63  ;;  %v8891_v63 = vpack.c.bf16 %v2659_v62, %v2658_v61  ;;  %v7904_v61 = vld [vmem:[%s11431_s26 + $0x2] ss:$0 sm:$0xff] }
 0x9f5   : > { %8868 = vmatprep.subr.bf16.mxu1 %v8867_v3 }
 0x9f8   : > { %8870 = vmatpush3.bf16.msra.mxu1 %v8867_v3  ;;  %v8902_v3 = vpack.c.bf16 %v7895_v2, %v7894_v1 }
 0x9f9   : > { %8888 = vmatprep.subr.bf16.mxu1 %v8887_v35 }
 0xac6   : > { %v8358_v42 = vpop.f32.mrb[10].mxu1 }
 0xac7   : > { %v2382_v44 = vpop.f32.mrb[11].mxu1  ;;  %v2392_v45 = vadd.f32 %v8358_v42, %v10497_v52 }
 0xac8   : > { %v2391_v47 = vadd.f32 %v2382_v44, %v10492_v46 }
 0xac9   : > { %v10565_v49 = vadd.f32 %v7877_v43, %v2392_v45 }
 0xaca   : > { %v10563_v48 = vadd.f32 %v7877_v43, %v2391_v47 }
 0xacb   : > { %v2407_v51 = vsel %vm1686_vm1, %v10565_v49, 0.0 }
 0xacc   : > { %v2404_v50 = vsel %vm1686_vm1, %v10563_v48, 0.0 }
 0xacd   : > { %2405 = vadd.xlane.f32.xlu0 %v2404_v50 }
 0xad1   : > { %2408 = vadd.xlane.f32.xlu0 %v2407_v51 }
 0xb5a   : > { %v2406_v53 = vpop.xlane.xlu0 %2405 }
 0xb5b   : > { %v2410_v54 = vmul.f32 0.03125, %v2406_v53 }
 0xb5d   : > { %v2412_v52 = vsub.f32 %v10563_v48, %v2410_v54 }
 0xb5e   : > { %v2409_v46 = vpop.xlane.xlu0 %2408 }
 0xb5f   : > { %v2411_v55 = vmul.f32 0.03125, %v2409_v46  ;;  %v2414_v56 = vmul.f32 %v2412_v52, %v2412_v52 }
 0xb61   : > { %v2413_v57 = vsub.f32 %v10565_v49, %v2411_v55  ;;  %v2416_v58 = vsel %vm1686_vm1, %v2414_v56, 0.0 }
 0xb62   : > { %2417 = vadd.xlane.f32.xlu0 %v2416_v58 }
 0xb63   : > { %v2415_v59 = vmul.f32 %v2413_v57, %v2413_v57 }
 0xb65   : > { %v2419_v60 = vsel %vm1686_vm1, %v2415_v59, 0.0 }
 0xb66   : > { %2420 = vadd.xlane.f32.xlu0 %v2419_v60 }
 0xbef   : > { %v2418_v4 = vpop.xlane.xlu0 %2417 }
 0xbf0   : > { %v2422_v5 = vmul.f32 0.03125, %v2418_v4  ;;  %v7896_v4 = vld [vmem:[%s11428_s10 + $0x30] sm:$0xff] }
 0xbf2   : > { %v2424_v6 = vadd.f32 1e-05, %v2422_v5  ;;  %v7897_v5 = vld [vmem:[%s11428_s10 + $0x38] sm:$0xff] }
 0xbf3   : > { %v2421_v7 = vpop.xlane.xlu0 %2420 }
 0xbf4   : > { %9595 = vrsqrt.f32 %v2424_v6  ;;  %v2423_v8 = vmul.f32 0.03125, %v2421_v7  ;;  %v8905_v6 = vpack.c.bf16 %v7897_v5, %v7896_v4  ;;  %v10015_v7 = vmov 0.0  }
 0xbf6   : > { %v2425_v9 = vadd.f32 1e-05, %v2423_v8  ;;  %v10612_v8 = vld [vmem:[%s1558_s1] sm:$0x7f]  ;;  %s11434_s1 = sld [smem:[#allocation35_spill]] }
 0xbf8   : > { %9597 = vrsqrt.f32 %v2425_v9 }
 0xbfe   : > { %v9596_v10 = vpop.eup %9595 }
 0xbff   : > { %v2428_v12 = vmul.f32 %v9596_v10, %v2412_v52 }
 0xc01   : > { %v2436_v14 = vmul.f32 %v7878_v11, %v2428_v12 }
 0xc02   : > { %v9598_v15 = vpop.eup %9597 }
 0xc03   : > { %v2429_v16 = vmul.f32 %v9598_v15, %v2413_v57  ;;  %v2444_v17 = vadd.f32 %v7879_v13, %v2436_v14  ;;  %v2805_v14 = vld [vmem:[%s11428_s10 + $0x8] sm:$0xff] }
 0xc05   : > { %v2437_v18 = vmul.f32 %v7878_v11, %v2429_v16  ;;  %8367 = vmatprep.mubr.msk.f32.mxu1 %vm1686_vm1, %v2444_v17  ;;  %v7885_v11 = vld [vmem:[%s11430_s15] ss:$0 sm:$0xff]  ;;  %s11433_s15 = sld [smem:[#allocation34_spill]] }
 0xc07   : > { %v2445_v19 = vadd.f32 %v7879_v13, %v2437_v18  ;;  %v2804_v13 = vld [vmem:[%s11428_s10] sm:$0xff] }
 0xc08   : > { %v8896_v17 = vpack.c.bf16 %v2805_v14, %v2804_v13 }
 0xc09   : > { %8368 = vmatmul.mubr.msk.f32.vlgmr.msra.gmra.mrb[12].mxu1 %vm1686_vm1, %v2445_v19  ;;  %v2806_v19 = vld [vmem:[%s11428_s10 + $0x10] sm:$0xff] }
 0xc0a   : > { %8890 = vmatpush3.bf16.msra.mxu1 %v8887_v35  ;;  %v8899_v21 = vpack.c.bf16 %v2807_v20, %v2806_v19  ;;  %v8908_v35 = vpack.c.bf16 %v7901_v33, %v7900_v31  ;;  %v7906_v20 = vld [vmem:[%s11428_s10 + $0x60] sm:$0xff] }
 0xc0b   : > { %8892 = vmatprep.subr.bf16.mxu1 %v8891_v63 }
 0xc0e   : > { %8894 = vmatpush3.bf16.msra.mxu1 %v8891_v63 }
 0xc0f   : > { %8895 = vmatprep.subr.bf16.mxu1 %v10008_v0 }
 0xcdc   : > { %v8369_v37 = vpop.f32.mrb[12].mxu1 }
 0xcdd   : > { %v2535_v38 = vadd.f32 %v8369_v37, %v7880_v36  ;;  %v2529_v39 = vpop.f32.mrb[13].mxu1 }
 0xcde   : > { %v2530_v40 = vadd.f32 %v7880_v36, %v2529_v39  ;;  %v7903_v36 = vld [vmem:[%s11428_s10 + $0x58] sm:$0xff] }
 0xcdf   : > { %v2539_v41 = vmul.f32 %v2535_v38, %v2535_v38  ;;  %v8911_v37 = vpack.c.bf16 %v7903_v36, %v7902_v34 }
 0xce0   : > { %v2538_v42 = vmul.f32 %v2530_v40, %v2530_v40 }
 0xce1   : > { %v2541_v43 = vmul.f32 %v2539_v41, %v2535_v38 }
 0xce2   : > { %v2540_v44 = vmul.f32 %v2538_v42, %v2530_v40 }
 0xce3   : > { %v2543_v45 = vmul.f32 0.044715, %v2541_v43  ;;  %v7886_v43 = vld [vmem:[%s11432_s16] ss:$0 sm:$0xff]  ;;  %s11435_s16 = sld [smem:[#allocation36_spill]] }
 0xce4   : > { %v2542_v47 = vmul.f32 0.044715, %v2540_v44 }
 0xce5   : > { %v2545_v50 = vadd.f32 %v2543_v45, %v2535_v38 }
 0xce6   : > { %v2544_v51 = vadd.f32 %v2542_v47, %v2530_v40 }
 0xce7   : > { %v2547_v53 = vmul.f32 0.7978846, %v2545_v50 }
 0xce8   : > { %v2546_v54 = vmul.f32 0.7978846, %v2544_v51 }
 0xce9   : > { %9599 = vtanh.f32 %v2547_v53  ;;  %v7891_v33 = vld [vmem:[%s11435_s16] ss:$0 sm:$0xff]  ;;  %s11439_s16 = sld [smem:[#allocation42_spill]] }
 0xcea   : > { %9601 = vtanh.f32 %v2546_v54 }
 0xcf3   : > { %v9600_v52 = vpop.eup %9599 }
 0xcf4   : > { %v9602_v46 = vpop.eup %9601  ;;  %v2551_v55 = vadd.f32 1.0, %v9600_v52 }
 0xcf5   : > { %v2550_v56 = vadd.f32 1.0, %v9602_v46 }
 0xcf6   : > { %v2553_v57 = vmul.f32 0.5, %v2551_v55 }
 0xcf7   : > { %v2552_v58 = vmul.f32 0.5, %v2550_v56 }
 0xcf8   : > { %v2555_v60 = vmul.f32 %v2553_v57, %v2535_v38 }
 0xcf9   : > { %v2554_v59 = vmul.f32 %v2552_v58, %v2530_v40 }
 0xcfb   : > { %8386 = vmatprep.mubr.msk.f32.mxu0 %vm1598_vm0, %v2554_v59 }
 0xcfc   : > { %8387 = vmatmul.mubr.msk.f32.vlgmr.msra.gmra.mrb[4].mxu0 %vm1598_vm0, %v2555_v60 }
 0xcfd   : > { %8903 = vmatpush3.bf16.msra.mxu0 %v8902_v3  ;;  %8419 = vmatprep.mubr.msk.f32.mxu0 %vm10014_vm4, %v10015_v7 }
 0xcfe   : > { %8904 = vmatprep.subr.bf16.mxu0 %v10008_v0 }
 0xd01   : > { %8906 = vmatpush3.bf16.msra.mxu0 %v8905_v6 }
 0xd02   : > { %8433 = vmatprep.subr.mxu0 %v10015_v7 }
 0xd04   : > { %8420 = vmatmul.mubr.msk.f32.vlgmr.msra.gmra.mrb[6].mxu0 %vm1686_vm1, %v10612_v8 }
 0xd05   : > { %8435 = vmatprep.mubr.msk.f32.mxu0 %vm10014_vm4, %v10015_v7 }
 0xdcf   : > { %v8388_v9 = vpop.f32.mrb[4].mxu0 }
 0xdd0   : > { %v2646_v10 = vadd.f32 %v8388_v9, %v10565_v49  ;;  %v2636_v12 = vpop.f32.mrb[5].mxu0 }
 0xdd1   : > { %v2645_v15 = vadd.f32 %v2636_v12, %v10563_v48  ;;  %v7898_v48 = vld [vmem:[%s11431_s26 + $0x1] ss:$0 sm:$0xff] }
 0xdd2   : > { %v2655_v18 = vadd.f32 %v7885_v11, %v2646_v10 }
 0xdd3   : > { %v2654_v16 = vadd.f32 %v7885_v11, %v2645_v15  ;;  %v7908_v15 = vld [vmem:[%s11428_s10 + $0x70] sm:$0xff] }
 0xdd5   : > { %8397 = vmatprep.mubr.msk.f32.mxu1 %vm1686_vm1, %v2654_v16  ;;  %v7909_v16 = vld [vmem:[%s11428_s10 + $0x78] sm:$0xff] }
 0xdd6   : > { %8398 = vmatmul.mubr.msk.f32.vlgmr.msra.gmra.mrb[14].mxu1 %vm1686_vm1, %v2655_v18 }
 0xdd7   : > { %8897 = vmatpush3.bf16.msra.mxu1 %v8896_v17  ;;  %8408 = vmatprep.mubr.msk.f32.mxu1 %vm10014_vm4, %v10015_v7  ;;  %v2962_v49 = vpop.f32.mrb[6].mxu0  ;;  %v8914_v17 = vpack.c.bf16 %v7909_v16, %v7908_v15  ;;  %v7923_v16 = vld [vmem:[%s11428_s10 + $0x80] sm:$0xff] }
 0xdd8   : > { %8898 = vmatprep.subr.bf16.mxu1 %v10008_v0  ;;  %v2963_v22 = vadd.f32 %v7898_v48, %v2962_v49  ;;  %v8421_v23 = vpop.f32.mrb[7].mxu0 }
 0xdda   : > { %3220 = vrot.lane.b32.xlu1 %v2963_v22, %s11360_s11  ;;  %8434 = vmatpush3.xpose.msk.msra.mxu0 %vm1828_vm2, %v2963_v22 }
 0xddb   : > { %8900 = vmatpush3.bf16.msra.mxu1 %v8899_v21  ;;  %8443 = vmatprep.subr.mxu0 %v10015_v7  ;;  %v7907_v21 = vld [vmem:[%s11428_s10 + $0x68] sm:$0xff] }
 0xddc   : > { %8907 = vmatprep.subr.bf16.mxu1 %v10008_v0  ;;  %v8917_v49 = vpack.c.bf16 %v7907_v21, %v7906_v20  ;;  %v7926_v20 = vld [vmem:[%s11428_s10 + $0x98] sm:$0xff] }
 0xdde   : > { %8409 = vmatmul.mubr.msk.f32.vlgmr.msra.gmra.mrb[16].mxu1 %vm1686_vm1, %v10612_v8 }
 0xddf   : > { %8430 = vmatprep.mubr.msk.f32.mxu1 %vm10014_vm4, %v10015_v7  ;;  %8909 = vmatpush3.bf16.msra.mxu1 %v8908_v35  ;;  %v10693_v35 = vld [vmem:[%s11436_s18] sm:$0xff] }
 0xde0   : > { %8910 = vmatprep.subr.bf16.mxu1 %v10008_v0 }
 0xde3   : > { %8912 = vmatpush3.bf16.msra.mxu1 %v8911_v37 }
 0xde4   : > { %8438 = vmatprep.subr.mxu1 %v10015_v7 }
 0xde6   : > { %8431 = vmatmul.mubr.msk.f32.vlgmr.msra.gmra.mrb[18].mxu1 %vm1686_vm1, %v10612_v8 }
 0xde7   : > { %8440 = vmatprep.mubr.msk.f32.mxu1 %vm10014_vm4, %v10015_v7 }
 0xe4c   : > { %v3221_v30 = vpop.permute.xlu1 %3220 }
 0xea9   : > { %v8399_v24 = vpop.f32.mrb[14].mxu1 }
 0xeaa   : > { %v2739_v25 = vpop.f32.mrb[15].mxu1  ;;  %v10662_v53 = vadd.f32 %v8399_v24, %v7886_v43 }
 0xeab   : > { %v2740_v50 = vadd.f32 %v7886_v43, %v2739_v25 }
 0xeac   : > { %v2753_v52 = vsel %vm1686_vm1, %v10662_v53, 0.0 }
 0xead   : > { %v2750_v54 = vsel %vm1686_vm1, %v2740_v50, 0.0 }
 0xeb1   : > { %v2882_v27 = vpop.f32.mrb[16].mxu1 }
 0xeb2   : > { %v2883_v28 = vadd.f32 %v7892_v26, %v2882_v27  ;;  %v8410_v29 = vpop.f32.mrb[17].mxu1 }
 0xeb4   : > { %3218 = vrot.lane.b32.xlu0 %v2883_v28, %s11360_s11  ;;  %8436 = vmatmul.mubr.msk.f32.vlgmr.msra.gmra.mrb[8].mxu0 %vm1828_vm2, %v2883_v28  ;;  %v7889_v28 = vld [vmem:[%s11433_s15] ss:$0 sm:$0xff]  ;;  %s11437_s15 = sld [smem:[#allocation40_spill]] }
 0xeb5   : > { %8444 = vmatpush3.xpose.msk.msra.mxu0 %vm1828_vm2, %v3221_v30  ;;  %8445 = vmatprep.mubr.msk.f32.mxu0 %vm10014_vm4, %v10015_v7  ;;  %v7890_v30 = vld [vmem:[%s11434_s1] ss:$0 sm:$0xff]  ;;  %s11438_s1 = sld [smem:[#allocation41_spill]] }
 0xeb6   : > { %8913 = vmatprep.subr.bf16.mxu0 %v10008_v0 }
 0xeb9   : > { %v3042_v57 = vpop.f32.mrb[18].mxu1 }
 0xeba   : > { %v8432_v58 = vpop.f32.mrb[19].mxu1  ;;  %v3043_v62 = vadd.f32 %v7904_v61, %v3042_v57  ;;  %v7929_v57 = vld [vmem:[%s11428_s10 + $0xa0] sm:$0xff]  ;;  %v7932_v61 = vld [vmem:[%s11428_s10 + $0xb8] sm:$0xff] }
 0xebb   : > { %v7930_v58 = vld [vmem:[%s11428_s10 + $0xa8] sm:$0xff] }
 0xebc   : > { %8439 = vmatpush3.msk.msra.mxu1 %vm3144_vm6, %v3043_v62 }
 0xebd   : > { %8448 = vmatprep.subr.mxu1 %v10015_v7 }
 0xf26   : > { %v3219_v38 = vpop.permute.xlu0 %3218 }
 0xf27   : > { %8446 = vmatmul.mubr.msk.f32.vlgmr.msra.gmra.mrb[10].mxu0 %vm1828_vm2, %v3219_v38 }
 0xf28   : > { %8457 = vmatprep.mubr.msk.f32.mxu0 %vm10014_vm4, %v10015_v7  ;;  %8915 = vmatpush3.bf16.msra.mxu0 %v8914_v17  ;;  %v7924_v17 = vld [vmem:[%s11428_s10 + $0x88] sm:$0xff] }
 0xf29   : > { %8919 = vmatprep.subr.bf16.mxu0 %v10008_v0 }
 0xf87   : > { %v3123_v39 = vpop.f32.mrb[8].mxu0 }
 0xf88   : > { %v3127_v40 = vmul.f32 0.25, %v3123_v39  ;;  %v8437_v41 = vpop.f32.mrb[9].mxu0 }
 0xf8a   : > { %v3129_v42 = vsel %vm3128_vm5, %v3127_v40, -inf }
 0xf8b   : > { %3130 = vmax.xlane.f32.xlu1 %v3129_v42 }
 0xffa   : > { %v3292_v44 = vpop.f32.mrb[10].mxu0 }
 0xffb   : > { %v3296_v45 = vmul.f32 0.25, %v3292_v44  ;;  %v8447_v47 = vpop.f32.mrb[11].mxu0 }
 0xffc   : > { %v7920_v47 = vld [vmem:[%s11431_s26 + $0x3] ss:$0 sm:$0xff] }
 0xffd   : > { %v3297_v51 = vsel %vm3128_vm5, %v3296_v45, -inf }
 0xffe   : > { %3298 = vmax.xlane.f32.xlu0 %v3297_v51 }
0x1002   : > { %2751 = vadd.xlane.f32.xlu0 %v2750_v54 }
0x1006   : > { %2754 = vadd.xlane.f32.xlu0 %v2753_v52 }
0x1018   : > { %v3131_v46 = vpop.xlane.xlu1 %3130 }
0x1019   : > { %v3132_v55 = vsub.f32 %v3127_v40, %v3131_v46 }
0x101b   : > { %v3133_v56 = vmul.f32 1.442695, %v3132_v55 }
0x101d   : > { %9603 = vpow2.f32 %v3133_v56 }
0x1027   : > { %v9604_v59 = vpop.eup %9603 }
0x1028   : > { %v3135_v60 = vsel %vm3128_vm5, %v9604_v59, 0.0 }
0x1029   : > { %3136 = vadd.xlane.f32.xlu1 %v3135_v60  ;;  %v7931_v60 = vld [vmem:[%s11428_s10 + $0xb0] sm:$0xff] }
0x108b   : > { %v3299_v63 = vpop.xlane.xlu0 %3298 }
0x108c   : > { %v3300_v1 = vsub.f32 %v3296_v45, %v3299_v63 }
0x108e   : > { %v3301_v2 = vmul.f32 1.442695, %v3300_v1 }
0x108f   : > { %v2752_v9 = vpop.xlane.xlu0 %2751 }
0x1090   : > { %9605 = vpow2.f32 %v3301_v2  ;;  %v2756_v11 = vmul.f32 0.03125, %v2752_v9 }
0x1092   : > { %v2758_v12 = vsub.f32 %v2740_v50, %v2756_v11 }
0x1093   : > { %v2755_v43 = vpop.xlane.xlu0 %2754 }
0x1094   : > { %v2760_v13 = vmul.f32 %v2758_v12, %v2758_v12  ;;  %v2757_v44 = vmul.f32 0.03125, %v2755_v43 }
0x1096   : > { %v2762_v14 = vsel %vm1686_vm1, %v2760_v13, 0.0  ;;  %v2759_v50 = vsub.f32 %v10662_v53, %v2757_v44  ;;  %v8929_v53 = vpack.c.bf16 %v7932_v61, %v7931_v60  ;;  %v10716_v13 = vld [vmem:[%s11436_s18 + $0x8] sm:$0xff] }
0x1098   : > { %v2761_v55 = vmul.f32 %v2759_v50, %v2759_v50 }
0x109a   : > { %v9606_v3 = vpop.eup %9605  ;;  %v2765_v56 = vsel %vm1686_vm1, %v2761_v55, 0.0 }
0x109b   : > { %v3303_v4 = vsel %vm3128_vm5, %v9606_v3, 0.0 }
0x109c   : > { %3304 = vadd.xlane.f32.xlu1 %v3303_v4 }
0x10ad   : > { %3308 = vrot.lane.b32.xlu1 %v3043_v62, %s11360_s11 }
0x10b6   : > { %v3137_v5 = vpop.xlane.xlu1 %3136 }
0x10b7   : > { %9607 = vrcp.f32 %v3137_v5 }
0x10c1   : > { %v9608_v6 = vpop.eup %9607 }
0x10c2   : > { %v3139_v10 = vmul.f32 %v9608_v6, %v9604_v59  ;;  %v8925_v59 = vpack.c.bf16 %v7930_v58, %v7929_v57  ;;  %v7940_v58 = vld [vmem:[%s11431_s26 + $0x6] ss:$0 sm:$0xff] }
0x10c4   : > { %8441 = vmatmul.mubr.msk.f32.vlgmr.msra.gmra.mrb[20].mxu1 %vm3140_vm7, %v3139_v10 }
0x10c5   : > { %8450 = vmatprep.mubr.msk.f32.mxu1 %vm10014_vm4, %v10015_v7 }
0x10d1   : > { %2763 = vadd.xlane.f32.xlu1 %v2762_v14 }
0x1129   : > { %v3305_v18 = vpop.xlane.xlu1 %3304 }
0x112a   : > { %9609 = vrcp.f32 %v3305_v18  ;;  %v8920_v18 = vpack.c.bf16 %v7924_v17, %v7923_v16 }
0x112d   : > { %v3309_v19 = vpop.permute.xlu1 %3308 }
0x112e   : > { %8449 = vmatpush3.msk.msra.mxu1 %vm3144_vm6, %v3309_v19  ;;  %v7925_v19 = vld [vmem:[%s11428_s10 + $0x90] sm:$0xff] }
0x112f   : > { %8916 = vmatprep.subr.bf16.mxu1 %v10008_v0  ;;  %v8923_v21 = vpack.c.bf16 %v7926_v20, %v7925_v19 }
0x1134   : > { %v9610_v48 = vpop.eup %9609 }
0x1135   : > { %v3307_v22 = vmul.f32 %v9610_v48, %v9606_v3  ;;  %v7936_v48 = vld [vmem:[%s11428_s10 + $0xc0] sm:$0xff] }
0x1137   : > { %8451 = vmatmul.mubr.msk.f32.vlgmr.msra.gmra.mrb[22].mxu1 %vm3140_vm7, %v3307_v22 }
0x1138   : > { %8918 = vmatpush3.bf16.msra.mxu1 %v8917_v49  ;;  %8464 = vmatprep.mubr.msk.f32.mxu1 %vm10014_vm4, %v10015_v7  ;;  %v7937_v49 = vld [vmem:[%s11428_s10 + $0xc8] sm:$0xff] }
0x1139   : > { %8926 = vmatprep.subr.bf16.mxu1 %v8925_v59  ;;  %v8933_v22 = vpack.c.bf16 %v7937_v49, %v7936_v48 }
0x115e   : > { %v2764_v23 = vpop.xlane.xlu1 %2763 }
0x115f   : > { %v2768_v24 = vmul.f32 0.03125, %v2764_v23 }
0x1161   : > { %v2770_v25 = vadd.f32 1e-06, %v2768_v24 }
0x1163   : > { %9611 = vrsqrt.f32 %v2770_v25 }
0x116d   : > { %v9612_v26 = vpop.eup %9611 }
0x116e   : > { %v2774_v27 = vmul.f32 %v9612_v26, %v2758_v12 }
0x1170   : > { %v2782_v29 = vmul.f32 %v7889_v28, %v2774_v27  ;;  %v7921_v27 = vld [vmem:[%s11437_s15] ss:$0 sm:$0xff] }
0x1172   : > { %v2790_v31 = vadd.f32 %v7890_v30, %v2782_v29  ;;  %v7922_v29 = vld [vmem:[%s11438_s1] ss:$0 sm:$0xff] }
0x1174   : > { %v10690_v34 = vadd.f32 %v7891_v33, %v2790_v31  ;;  %v7938_v31 = vld [vmem:[%s11428_s10 + $0xd0] sm:$0xff] }
0x1176   : > { %v10697_v37 = vadd.f32 %v10693_v35, %v10690_v34 }
0x1197   : > { %v3214_v36 = vpop.f32.mrb[20].mxu1 }
0x1198   : > { %v8442_v38 = vpop.f32.mrb[21].mxu1  ;;  %8465 = vmatmul.mubr.msk.f32.vlgmr.msra.gmra.mrb[24].mxu1 %vm1828_vm2, %v3214_v36 }
0x1199   : > { %8486 = vmatprep.mubr.msk.f32.mxu1 %vm1686_vm1, %v10697_v37  ;;  %8928 = vmatpush3.bf16.msra.mxu1 %v8925_v59 }
0x119a   : > { %8930 = vmatprep.subr.bf16.mxu1 %v8929_v53 }
0x119d   : > { %8932 = vmatpush3.bf16.msra.mxu1 %v8929_v53 }
0x119e   : > { %8941 = vmatprep.subr.bf16.mxu1 %v10008_v0 }
0x120a   : > { %v3381_v39 = vpop.f32.mrb[22].mxu1 }
0x120b   : > { %v8452_v40 = vpop.f32.mrb[23].mxu1  ;;  %8458 = vmatmul.mubr.msk.f32.vlgmr.msra.gmra.mrb[12].mxu0 %vm1828_vm2, %v3381_v39 }
0x120c   : > { %8475 = vmatprep.mubr.msk.f32.mxu0 %vm10014_vm4, %v10015_v7  ;;  %8921 = vmatpush3.bf16.msra.mxu0 %v8920_v18  ;;  %v7933_v40 = vld [vmem:[%s11431_s26 + $0x5] ss:$0 sm:$0xff] }
0x120d   : > { %8922 = vmatprep.subr.bf16.mxu0 %v10008_v0 }
0x1210   : > { %8924 = vmatpush3.bf16.msra.mxu0 %v8923_v21 }
0x1211   : > { %8934 = vmatprep.subr.bf16.mxu0 %v8933_v22 }
0x126b   : > { %v3527_v41 = vpop.f32.mrb[24].mxu1 }
0x126c   : > { %v8466_v42 = vpop.f32.mrb[25].mxu1 }
0x12de   : > { %v3454_v45 = vpop.f32.mrb[12].mxu0 }
0x12df   : > { %v3528_v51 = vadd.f32 %v3527_v41, %v3454_v45  ;;  %v8459_v54 = vpop.f32.mrb[13].mxu0 }
0x12e1   : > { %v3536_v52 = vadd.f32 %v7920_v47, %v3528_v51 }
0x12e3   : > { %v3540_v46 = vsel %vm3539_vm8, %v3536_v52, 0.0 }
0x12e4   : > { %3541 = vadd.xlane.f32.xlu0 %v3540_v46 }
0x12e8   : > { %2766 = vadd.xlane.f32.xlu0 %v2765_v56 }
0x1371   : > { %v3542_v62 = vpop.xlane.xlu0 %3541 }
0x1372   : > { %v3543_v63 = vmul.f32 0.03125, %v3542_v62 }
0x1374   : > { %v3544_v1 = vsub.f32 %v3536_v52, %v3543_v63  ;;  %v7927_v52 = vld [vmem:[%s11431_s26 + $0x4] ss:$0 sm:$0xff] }
0x1375   : > { %v2767_v2 = vpop.xlane.xlu0 %2766 }
0x1376   : > { %v2769_v3 = vmul.f32 0.03125, %v2767_v2  ;;  %v3545_v4 = vmul.f32 %v3544_v1, %v3544_v1 }
0x1378   : > { %v2771_v5 = vadd.f32 1e-06, %v2769_v3  ;;  %v3546_v6 = vsel %vm3539_vm8, %v3545_v4, 0.0 }
0x1379   : > { %3547 = vadd.xlane.f32.xlu0 %v3546_v6 }
0x137a   : > { %9613 = vrsqrt.f32 %v2771_v5 }
0x1384   : > { %v9614_v9 = vpop.eup %9613 }
0x1385   : > { %v2775_v10 = vmul.f32 %v9614_v9, %v2759_v50 }
0x1387   : > { %v2783_v11 = vmul.f32 %v7889_v28, %v2775_v10 }
0x1389   : > { %v2791_v12 = vadd.f32 %v7890_v30, %v2783_v11 }
0x138b   : > { %v10718_v14 = vadd.f32 %v7891_v33, %v2791_v12  ;;  %v7939_v33 = vld [vmem:[%s11428_s10 + $0xd8] sm:$0xff] }
0x138c   : > { %v8937_v39 = vpack.c.bf16 %v7939_v33, %v7938_v31 }
0x138d   : > { %v10722_v15 = vadd.f32 %v10716_v13, %v10718_v14 }
0x138f   : > { %8487 = vmatmul.mubr.msk.f32.vlgmr.msra.gmra.mrb[26].mxu1 %vm1686_vm1, %v10722_v15 }
0x1390   : > { %8504 = vmatprep.mubr.msk.f32.mxu1 %vm10014_vm4, %v10015_v7 }
0x1406   : > { %v3548_v23 = vpop.xlane.xlu0 %3547 }
0x1407   : > { %v3549_v24 = vmul.f32 0.03125, %v3548_v23 }
0x1409   : > { %v3550_v25 = vadd.f32 1e-05, %v3549_v24  ;;  %v7943_v24 = vld [vmem:[%s11428_s10 + $0xe0] sm:$0xff] }
0x140b   : > { %9615 = vrsqrt.f32 %v3550_v25  ;;  %v7944_v25 = vld [vmem:[%s11428_s10 + $0xe8] sm:$0xff] }
0x1415   : > { %v9616_v26 = vpop.eup %9615 }
0x1416   : > { %v3552_v28 = vmul.f32 %v9616_v26, %v3544_v1  ;;  %v8959_v26 = vpack.c.bf16 %v7944_v25, %v7943_v24  ;;  %v7958_v25 = vld [vmem:[%s11437_s15 + $0x1] ss:$0 sm:$0xff] }
0x1418   : > { %v3557_v30 = vmul.f32 %v7921_v27, %v3552_v28 }
0x141a   : > { %v10739_v36 = vadd.f32 %v7922_v29, %v3557_v30 }
0x141c   : > { %v3563_v38 = vadd.f32 %v10739_v36, %v10612_v8 }
0x141e   : > { %8476 = vmatmul.mubr.msk.f32.vlgmr.msra.gmra.mrb[14].mxu0 %vm1686_vm1, %v3563_v38 }
0x141f   : > { %8936 = vmatpush3.bf16.msra.mxu0 %v8933_v22  ;;  %8497 = vmatprep.mubr.msk.f32.mxu0 %vm1686_vm1, %v10690_v34 }
0x1420   : > { %8938 = vmatprep.subr.bf16.mxu0 %v8937_v39 }
0x1423   : > { %8940 = vmatpush3.bf16.msra.mxu0 %v8937_v39  ;;  %v7945_v39 = vld [vmem:[%s11428_s10 + $0xf0] sm:$0xff] }
0x1424   : > { %8945 = vmatprep.subr.bf16.mxu0 %v10008_v0 }
0x1426   : > { %8498 = vmatmul.mubr.msk.f32.vlgmr.msra.gmra.mrb[16].mxu0 %vm1686_vm1, %v10718_v14 }
0x1427   : > { %8511 = vmatprep.mubr.msk.f32.mxu0 %vm10014_vm4, %v10015_v7 }
0x1462   : > { %v8488_v41 = vpop.f32.mrb[26].mxu1 }
0x1463   : > { %v3737_v42 = vadd.f32 %v8488_v41, %v7933_v40  ;;  %v3731_v43 = vpop.f32.mrb[27].mxu1 }
0x1464   : > { %v3732_v44 = vadd.f32 %v7933_v40, %v3731_v43  ;;  %v7946_v40 = vld [vmem:[%s11428_s10 + $0xf8] sm:$0xff] }
0x1466   : > { %v9555_v45 = vpack.i.bf16 %v3737_v42, %v3732_v44  ;;  %v8942_v47 = vpack.c.bf16 %v3737_v42, %v3732_v44  ;;  %v8956_v42 = vpack.c.bf16 %v7946_v40, %v7945_v39 }
0x1468   : > { %9556 = vrot.lane.b32.xlu0 %v9555_v45, %s11360_s11  ;;  %8944 = vmatpush3.bf16.xpose.msk.msra.mxu1 %vm10523_vm3, %v8942_v47 }
0x1469   : > { %8948 = vmatprep.subr.bf16.mxu1 %v10008_v0 }
0x14da   : > { %v9557_v50 = vpop.permute.xlu0 %9556 }
0x14db   : > { %v9559_v51 = vunpack.i.h.bf16 %v9557_v50  ;;  %v9558_v54 = vunpack.i.l.bf16 %v9557_v50 }
0x14dd   : > { %v8949_v57 = vpack.c.bf16 %v9559_v51, %v9558_v54 }
0x14f1   : > { %v3645_v46 = vpop.f32.mrb[14].mxu0 }
0x14f2   : > { %v3646_v55 = vadd.f32 %v7927_v52, %v3645_v46  ;;  %v8477_v56 = vpop.f32.mrb[15].mxu0  ;;  %v7957_v46 = vld [vmem:[%s11431_s26 + $0x7] ss:$0 sm:$0xff] }
0x14f4   : > { %4001 = vrot.lane.b32.xlu0 %v3646_v55, %s11360_s11  ;;  %8505 = vmatmul.mubr.msk.f32.vlgmr.msra.gmra.mrb[28].mxu1 %vm1828_vm2, %v3646_v55 }
0x14f5   : > { %8951 = vmatpush3.bf16.xpose.msk.msra.mxu1 %vm10523_vm3, %v8949_v57  ;;  %8518 = vmatprep.mubr.msk.f32.mxu1 %vm10014_vm4, %v10015_v7 }
0x14f6   : > { %8958 = vmatprep.subr.bf16.mxu1 %v10008_v0 }
0x14f9   : > { %v8499_v59 = vpop.f32.mrb[16].mxu0 }
0x14fa   : > { %v3828_v60 = vadd.f32 %v8499_v59, %v7940_v58  ;;  %v3822_v61 = vpop.f32.mrb[17].mxu0 }
0x14fb   : > { %v3823_v53 = vadd.f32 %v7940_v58, %v3822_v61 }
0x14fd   : > { %v9560_v62 = vpack.i.bf16 %v3828_v60, %v3823_v53  ;;  %v8946_v63 = vpack.c.bf16 %v3828_v60, %v3823_v53 }
0x14ff   : > { %8947 = vmatpush3.bf16.msra.mxu0 %v8946_v63 }
0x1500   : > { %8952 = vmatprep.subr.bf16.mxu0 %v10008_v0 }
0x1566   : > { %v4002_v1 = vpop.permute.xlu0 %4001 }
0x1567   : > { %8519 = vmatmul.mubr.msk.f32.vlgmr.msra.gmra.mrb[30].mxu1 %vm1828_vm2, %v4002_v1  ;;  %v4354_v1 = vld [vmem:[%s11439_s16] sm:$0xff] }
0x1568   : > { %8539 = vmatprep.mubr.msk.f32.mxu1 %vm10014_vm4, %v10015_v7  ;;  %8960 = vmatpush3.bf16.msra.mxu1 %v8959_v26 }
0x1569   : > { %8967 = vmatprep.subr.bf16.mxu1 %v10008_v0 }
0x15c7   : > { %v3911_v2 = vpop.f32.mrb[28].mxu1 }
0x15c8   : > { %v3915_v3 = vmul.f32 0.25, %v3911_v2  ;;  %v8506_v4 = vpop.f32.mrb[29].mxu1  ;;  %v4355_v2 = vld [vmem:[%s11439_s16 + $0x8] sm:$0xff] }
0x15c9   : > { %v4357_v4 = vld [vmem:[%s11439_s16 + $0x18] sm:$0xff] }
0x15ca   : > { %v3917_v5 = vsel %vm3916_vm9, %v3915_v3, -inf }
0x15cb   : > { %3918 = vmax.xlane.f32.xlu1 %v3917_v5  ;;  %v7966_v5 = vld [vmem:[%s11428_s10 + $0x100] sm:$0xff] }
0x163a   : > { %v4079_v6 = vpop.f32.mrb[30].mxu1 }
0x163b   : > { %v4083_v9 = vmul.f32 0.25, %v4079_v6  ;;  %v8520_v10 = vpop.f32.mrb[31].mxu1 }
0x163d   : > { %v4084_v11 = vsel %vm3916_vm9, %v4083_v9, -inf }
0x163e   : > { %4085 = vmax.xlane.f32.xlu0 %v4084_v11 }
0x1658   : > { %v3919_v12 = vpop.xlane.xlu1 %3918 }
0x1659   : > { %v3920_v16 = vsub.f32 %v3915_v3, %v3919_v12  ;;  %v8962_v3 = vpack.c.bf16 %v4355_v2, %v4354_v1  ;;  %v7973_v2 = vld [vmem:[%s11428_s10 + $0x120] sm:$0xff] }
0x165b   : > { %v3921_v17 = vmul.f32 1.442695, %v3920_v16 }
0x165d   : > { %9617 = vpow2.f32 %v3921_v17 }
0x1667   : > { %v9618_v18 = vpop.eup %9617 }
0x1668   : > { %v3923_v19 = vsel %vm3916_vm9, %v9618_v18, 0.0 }
0x1669   : > { %3924 = vadd.xlane.f32.xlu1 %v3923_v19 }
0x16cb   : > { %v4086_v20 = vpop.xlane.xlu0 %4085 }
0x16cc   : > { %v4087_v21 = vsub.f32 %v4083_v9, %v4086_v20  ;;  %v7967_v9 = vld [vmem:[%s11428_s10 + $0x108] sm:$0xff] }
0x16cd   : > { %v8979_v10 = vpack.c.bf16 %v7967_v9, %v7966_v5  ;;  %v7982_v5 = vld [vmem:[%s11428_s10 + $0x158] sm:$0xff] }
0x16ce   : > { %v4088_v48 = vmul.f32 1.442695, %v4087_v21 }
0x16d0   : > { %9619 = vpow2.f32 %v4088_v48 }
0x16da   : > { %v9620_v49 = vpop.eup %9619 }
0x16db   : > { %v4090_v22 = vsel %vm3916_vm9, %v9620_v49, 0.0 }
0x16dc   : > { %4091 = vadd.xlane.f32.xlu1 %v4090_v22 }
0x16ed   : > { %9561 = vrot.lane.b32.xlu1 %v9560_v62, %s11360_s11  ;;  %s11440_s11 = sld [smem:[#allocation44_spill]] }
0x16f3   : > { %v4439_v11 = vld [vmem:[%s11440_s11] sm:$0xff]  ;;  %v4440_v12 = vld [vmem:[%s11440_s11 + $0x8] sm:$0xff]  ;;  %v4441_v16 = vld [vmem:[%s11440_s11 + $0x10] sm:$0xff] }
0x16f4   : > { %v8968_v17 = vpack.c.bf16 %v4440_v12, %v4439_v11  ;;  %v4443_v20 = vld [vmem:[%s11440_s11 + $0x20] sm:$0xff]  ;;  %v4444_v21 = vld [vmem:[%s11440_s11 + $0x28] sm:$0xff]  ;;  %v4446_v39 = vld [vmem:[%s11440_s11 + $0x38] sm:$0xff] }
0x16f5   : > { %v8974_v48 = vpack.c.bf16 %v4444_v21, %v4443_v20  ;;  %v7965_v21 = vld [vmem:[%s11438_s1 + $0x2] ss:$0 sm:$0xff] }
0x16f6   : > { %v3925_v23 = vpop.xlane.xlu1 %3924 }
0x16f7   : > { %9621 = vrcp.f32 %v3925_v23 }
0x1701   : > { %v9622_v27 = vpop.eup %9621 }
0x1702   : > { %v3927_v28 = vmul.f32 %v9622_v27, %v9618_v18  ;;  %v4442_v18 = vld [vmem:[%s11440_s11 + $0x18] sm:$0xff]  ;;  %v7959_v27 = vld [vmem:[%s11438_s1 + $0x1] ss:$0 sm:$0xff] }
0x1703   : > { %v8971_v19 = vpack.c.bf16 %v4442_v18, %v4441_v16 }
0x1704   : > { %8512 = vmatmul.mubr.msk.f32.vlgmr.msra.gmra.mrb[18].mxu0 %vm1828_vm2, %v3927_v28  ;;  %v7968_v28 = vld [vmem:[%s11428_s10 + $0x110] sm:$0xff] }
0x1705   : > { %8525 = vmatprep.mubr.msk.f32.mxu0 %vm10014_vm4, %v10015_v7 }
0x1769   : > { %v4092_v29 = vpop.xlane.xlu1 %4091 }
0x176a   : > { %9623 = vrcp.f32 %v4092_v29  ;;  %v7969_v29 = vld [vmem:[%s11428_s10 + $0x118] sm:$0xff] }
0x176d   : > { %v9562_v30 = vpop.permute.xlu1 %9561 }
0x176e   : > { %v9564_v31 = vunpack.i.h.bf16 %v9562_v30  ;;  %v9563_v33 = vunpack.i.l.bf16 %v9562_v30 }
0x1770   : > { %v8953_v38 = vpack.c.bf16 %v9564_v31, %v9563_v33  ;;  %v8983_v33 = vpack.c.bf16 %v7969_v29, %v7968_v28 }
0x1772   : > { %8954 = vmatpush3.bf16.msra.mxu0 %v8953_v38  ;;  %v4445_v38 = vld [vmem:[%s11440_s11 + $0x30] sm:$0xff] }
0x1773   : > { %8955 = vmatprep.subr.bf16.mxu0 %v10008_v0  ;;  %v8977_v40 = vpack.c.bf16 %v4446_v39, %v4445_v38 }
0x1774   : > { %v9624_v41 = vpop.eup %9623 }
0x1775   : > { %v4094_v43 = vmul.f32 %v9624_v41, %v9620_v49  ;;  %v7960_v41 = vld [vmem:[%s11441_s0] ss:$0 sm:$0xff]  ;;  %s11443_s0 = sld [smem:[#allocation45_spill]] }
0x1777   : > { %8526 = vmatmul.mubr.msk.f32.vlgmr.msra.gmra.mrb[20].mxu0 %vm1828_vm2, %v4094_v43 }
0x1778   : > { %8957 = vmatpush3.bf16.msra.mxu0 %v8956_v42  ;;  %8532 = vmatprep.mubr.msk.f32.mxu0 %vm10014_vm4, %v10015_v7 }
0x1779   : > { %8961 = vmatprep.subr.bf16.mxu0 %v10008_v0 }
0x17d7   : > { %v3997_v44 = vpop.f32.mrb[18].mxu0 }
0x17d8   : > { %v8513_v45 = vpop.f32.mrb[19].mxu0  ;;  %8540 = vmatmul.mubr.msk.f32.vlgmr.msra.gmra.mrb[32].mxu1 %vm1828_vm2, %v3997_v44 }
0x17d9   : > { %8569 = vmatprep.mubr.msk.f32.mxu1 %vm10014_vm4, %v10015_v7  ;;  %8969 = vmatpush3.bf16.msra.mxu1 %v8968_v17  ;;  %v7970_v45 = vld [vmem:[%s11431_s26 + $0x8] ss:$0 sm:$0xff] }
0x17da   : > { %8970 = vmatprep.subr.bf16.mxu1 %v10008_v0 }
0x17dd   : > { %8972 = vmatpush3.bf16.msra.mxu1 %v8971_v19  ;;  %v7964_v19 = vld [vmem:[%s11437_s15 + $0x2] ss:$0 sm:$0xff] }
0x17de   : > { %8973 = vmatprep.subr.bf16.mxu1 %v10008_v0 }
0x17e1   : > { %8975 = vmatpush3.bf16.msra.mxu1 %v8974_v48 }
0x17e2   : > { %8976 = vmatprep.subr.bf16.mxu1 %v10008_v0 }
0x17e5   : > { %8978 = vmatpush3.bf16.msra.mxu1 %v8977_v40 }
0x17e6   : > { %8993 = vmatprep.subr.bf16.mxu1 %v10008_v0 }
0x184a   : > { %v4172_v47 = vpop.f32.mrb[20].mxu0 }
0x184b   : > { %v8527_v50 = vpop.f32.mrb[21].mxu0  ;;  %8533 = vmatmul.mubr.msk.f32.vlgmr.msra.gmra.mrb[22].mxu0 %vm1828_vm2, %v4172_v47 }
0x184c   : > { %8550 = vmatprep.mubr.msk.f32.mxu0 %vm10014_vm4, %v10015_v7  ;;  %8963 = vmatpush3.bf16.msra.mxu0 %v8962_v3  ;;  %v7974_v3 = vld [vmem:[%s11428_s10 + $0x128] sm:$0xff] }
0x184d   : > { %8964 = vmatprep.subr.bf16.mxu0 %v10008_v0 }
0x18ab   : > { %v4318_v51 = vpop.f32.mrb[32].mxu1 }
0x18ac   : > { %v8541_v54 = vpop.f32.mrb[33].mxu1 }
0x18ad   : > { %v7962_v54 = vld [vmem:[#allocation2] ss:$0 sm:$0xff] }
0x191e   : > { %v4245_v52 = vpop.f32.mrb[22].mxu0 }
0x191f   : > { %v4319_v55 = vadd.f32 %v4318_v51, %v4245_v52  ;;  %v8534_v56 = vpop.f32.mrb[23].mxu0 }
0x1921   : > { %v4327_v57 = vadd.f32 %v7957_v46, %v4319_v55 }
0x1923   : > { %v4328_v58 = vadd.f32 %v4327_v57, %v10739_v36  ;;  %v4356_v36 = vld [vmem:[%s11439_s16 + $0x10] sm:$0xff] }
0x1924   : > { %v8965_v6 = vpack.c.bf16 %v4357_v4, %v4356_v36  ;;  %v8988_v36 = vpack.c.bf16 %v7974_v3, %v7973_v2  ;;  %v7981_v4 = vld [vmem:[%s11428_s10 + $0x150] sm:$0xff] }
0x1925   : > { %v4331_v59 = vsel %vm3539_vm8, %v4328_v58, 0.0  ;;  %v8997_v9 = vpack.c.bf16 %v7982_v5, %v7981_v4 }
0x1926   : > { %4332 = vadd.xlane.f32.xlu1 %v4331_v59  ;;  %8966 = vmatpush3.bf16.msra.mxu0 %v8965_v6  ;;  %v7975_v6 = vld [vmem:[%s11428_s10 + $0x130] sm:$0xff] }
0x1927   : > { %8980 = vmatprep.subr.bf16.mxu0 %v8979_v10 }
0x19b3   : > { %v4333_v60 = vpop.xlane.xlu1 %4332 }
0x19b4   : > { %v4334_v61 = vmul.f32 0.03125, %v4333_v60 }
0x19b6   : > { %v4335_v53 = vsub.f32 %v4328_v58, %v4334_v61 }
0x19b8   : > { %v4336_v62 = vmul.f32 %v4335_v53, %v4335_v53 }
0x19ba   : > { %v4337_v63 = vsel %vm3539_vm8, %v4336_v62, 0.0  ;;  %v7979_v62 = vld [vmem:[%s11428_s10 + $0x140] sm:$0xff] }
0x19bb   : > { %4338 = vadd.xlane.f32.xlu0 %v4337_v63  ;;  %v7980_v63 = vld [vmem:[%s11428_s10 + $0x148] sm:$0xff] }
0x19bc   : > { %v8994_v1 = vpack.c.bf16 %v7980_v63, %v7979_v62 }
0x1a48   : > { %v4339_v49 = vpop.xlane.xlu0 %4338 }
0x1a49   : > { %v4340_v22 = vmul.f32 0.03125, %v4339_v49 }
0x1a4b   : > { %v4341_v23 = vadd.f32 1e-05, %v4340_v22 }
0x1a4d   : > { %9625 = vrsqrt.f32 %v4341_v23  ;;  %v7983_v23 = vld [vmem:[%s11431_s26 + $0xa] ss:$0 sm:$0xff] }
0x1a57   : > { %v9626_v24 = vpop.eup %9625 }
0x1a58   : > { %v4343_v26 = vmul.f32 %v9626_v24, %v4335_v53 }
0x1a5a   : > { %v4348_v30 = vmul.f32 %v7958_v25, %v4343_v26  ;;  %v7977_v25 = vld [vmem:[%s11431_s26 + $0x9] ss:$0 sm:$0xff] }
0x1a5c   : > { %v4353_v31 = vadd.f32 %v7959_v27, %v4348_v30 }
0x1a5e   : > { %8551 = vmatmul.mubr.msk.f32.vlgmr.msra.gmra.mrb[24].mxu0 %vm1686_vm1, %v4353_v31 }
0x1a5f   : > { %8982 = vmatpush3.bf16.msra.mxu0 %v8979_v10  ;;  %8580 = vmatprep.mubr.msk.f32.mxu0 %vm1686_vm1, %v10697_v37  ;;  %v7976_v10 = vld [vmem:[%s11428_s10 + $0x138] sm:$0xff] }
0x1a60   : > { %8984 = vmatprep.subr.bf16.mxu0 %v8983_v33  ;;  %v8991_v11 = vpack.c.bf16 %v7976_v10, %v7975_v6 }
0x1a63   : > { %8986 = vmatpush3.bf16.msra.mxu0 %v8983_v33 }
0x1a64   : > { %8987 = vmatprep.subr.bf16.mxu0 %v10008_v0 }
0x1a66   : > { %8581 = vmatmul.mubr.msk.f32.vlgmr.msra.gmra.mrb[26].mxu0 %vm1686_vm1, %v10722_v15 }
0x1a67   : > { %8591 = vmatprep.mubr.msk.f32.mxu0 %vm10014_vm4, %v10015_v7  ;;  %8989 = vmatpush3.bf16.msra.mxu0 %v8988_v36 }
0x1a68   : > { %8990 = vmatprep.subr.bf16.mxu0 %v10008_v0 }
0x1a6b   : > { %8992 = vmatpush3.bf16.msra.mxu0 %v8991_v11 }
0x1b31   : > { %v4434_v42 = vpop.f32.mrb[24].mxu0 }
0x1b32   : > { %v4435_v37 = vadd.f32 %v7960_v41, %v4434_v42  ;;  %v8552_v43 = vpop.f32.mrb[25].mxu0 }
0x1b34   : > { %v4438_v44 = vmax.f32 %v4435_v37, 0.0 }
0x1b36   : > { %8570 = vmatmul.mubr.msk.f32.vlgmr.msra.gmra.mrb[34].mxu1 %vm1598_vm0, %v4438_v44 }
0x1b37   : > { %8602 = vmatprep.mubr.msk.f32.mxu1 %vm10014_vm4, %v10015_v7  ;;  %8995 = vmatpush3.bf16.msra.mxu1 %v8994_v1 }
0x1b38   : > { %8996 = vmatprep.subr.bf16.mxu1 %v10008_v0 }
0x1b39   : > { %v8582_v15 = vpop.f32.mrb[26].mxu0 }
0x1b3a   : > { %v10833_v47 = vadd.f32 %v8582_v15, %v7970_v45  ;;  %v4630_v50 = vpop.f32.mrb[27].mxu0 }
0x1b3b   : > { %v4631_v51 = vadd.f32 %v7970_v45, %v4630_v50  ;;  %8998 = vmatpush3.bf16.msra.mxu1 %v8997_v9 }
0x1b3d   : > { %5002 = vrot.lane.b32.xlu1 %v4631_v51, %s11442_s2 }
0x1c09   : > { %v4523_v52 = vpop.f32.mrb[34].mxu1 }
0x1c0a   : > { %v4524_v46 = vadd.f32 %v7962_v54, %v4523_v52  ;;  %v8571_v55 = vpop.f32.mrb[35].mxu1 }
0x1c0c   : > { %v4527_v56 = vadd.f32 %v4524_v46, %v4353_v31 }
0x1c0e   : > { %v4530_v57 = vsel %vm3539_vm8, %v4527_v56, 0.0 }
0x1c0f   : > { %4531 = vadd.xlane.f32.xlu0 %v4530_v57 }
0x1c9c   : > { %v4532_v58 = vpop.xlane.xlu0 %4531 }
0x1c9d   : > { %v4533_v59 = vmul.f32 0.03125, %v4532_v58 }
0x1c9f   : > { %v4534_v60 = vsub.f32 %v4527_v56, %v4533_v59 }
0x1ca1   : > { %v4535_v61 = vmul.f32 %v4534_v60, %v4534_v60 }
0x1ca3   : > { %v4536_v53 = vsel %vm3539_vm8, %v4535_v61, 0.0 }
0x1ca4   : > { %4537 = vadd.xlane.f32.xlu0 %v4536_v53 }
0x1d31   : > { %v4538_v12 = vpop.xlane.xlu0 %4537 }
0x1d32   : > { %v4539_v16 = vmul.f32 0.03125, %v4538_v12 }
0x1d34   : > { %v4540_v17 = vadd.f32 1e-05, %v4539_v16 }
0x1d36   : > { %9627 = vrsqrt.f32 %v4540_v17  ;;  %v7987_v17 = vld [vmem:[%s11428_s10 + $0x170] sm:$0xff] }
0x1d40   : > { %v9628_v18 = vpop.eup %9627 }
0x1d41   : > { %v4542_v20 = vmul.f32 %v9628_v18, %v4534_v60  ;;  %v7988_v18 = vld [vmem:[%s11428_s10 + $0x178] sm:$0xff] }
0x1d43   : > { %v4547_v48 = vmul.f32 %v7964_v19, %v4542_v20  ;;  %v8999_v19 = vpack.c.bf16 %v7988_v18, %v7987_v17 }
0x1d45   : > { %v10850_v49 = vadd.f32 %v7965_v21, %v4547_v48 }
0x1d47   : > { %8603 = vmatmul.mubr.msk.f32.vlgmr.msra.gmra.mrb[36].mxu1 %vm1686_vm1, %v10850_v49  ;;  %v10856_v22 = vadd.f32 %v10850_v49, %v10612_v8  ;;  %v5003_v8 = vpop.permute.xlu1 %5002 }
0x1d49   : > { %8592 = vmatmul.mubr.msk.f32.vlgmr.msra.gmra.mrb[28].mxu0 %vm1686_vm1, %v10856_v22 }
0x1d4a   : > { %8607 = vmatprep.mubr.msk.f32.mxu0 %vm1828_vm2, %v4631_v51 }
0x1e1a   : > { %v4801_v24 = vpop.f32.mrb[36].mxu1 }
0x1e1b   : > { %v4802_v26 = vadd.f32 %v7983_v23, %v4801_v24  ;;  %v8604_v27 = vpop.f32.mrb[37].mxu1 }
0x1e1c   : > { %v4718_v28 = vpop.f32.mrb[28].mxu0 }
0x1e1d   : > { %v4719_v29 = vadd.f32 %v7977_v25, %v4718_v28  ;;  %v8593_v30 = vpop.f32.mrb[29].mxu0  ;;  %8610 = vmatprep.subr.msk.mxu1 %vm3144_vm6, %v4802_v26  ;;  %v8008_v25 = vld [vmem:[%s11428_s10 + $0x180] sm:$0xff] }
0x1e1e   : > { %8611 = vmatpush3.msk.msra.mxu1 %vm3144_vm6, %v4802_v26  ;;  %v8010_v30 = vld [vmem:[%s11428_s10 + $0x190] sm:$0xff] }
0x1e1f   : > { %5006 = vrot.lane.b32.xlu0 %v4719_v29, %s11442_s2  ;;  %8605 = vmatprep.subr.msk.mxu0 %vm1828_vm2, %v4719_v29 }
0x1e20   : > { %8606 = vmatpush3.xpose.msk.msra.mxu0 %vm1828_vm2, %v4719_v29 }
0x1e23   : > { %5004 = vrot.lane.b32.xlu0 %v10833_v47, %s11442_s2  ;;  %8608 = vmatmul.mubr.msk.f32.vlgmr.msra.gmra.mrb[30].mxu0 %vm1828_vm2, %v10833_v47 }
0x1e24   : > { %8617 = vmatprep.mubr.msk.f32.mxu0 %vm1828_vm2, %v5003_v8  ;;  %v8011_v8 = vld [vmem:[%s11428_s10 + $0x198] sm:$0xff] }
0x1e91   : > { %v5007_v31 = vpop.permute.xlu0 %5006 }
0x1e92   : > { %8615 = vmatprep.subr.msk.mxu0 %vm1828_vm2, %v5007_v31 }
0x1e93   : > { %8616 = vmatpush3.xpose.msk.msra.mxu0 %vm1828_vm2, %v5007_v31  ;;  %v9011_v31 = vpack.c.bf16 %v8011_v8, %v8010_v30 }
0x1e94   : > { %9000 = vmatprep.subr.bf16.mxu0 %v8999_v19 }
0x1e95   : > { %v5005_v33 = vpop.permute.xlu0 %5004 }
0x1e96   : > { %8618 = vmatmul.mubr.msk.f32.vlgmr.msra.gmra.mrb[32].mxu0 %vm1828_vm2, %v5005_v33  ;;  %v7985_v33 = vld [vmem:[%s11428_s10 + $0x160] sm:$0xff] }
0x1e97   : > { %9002 = vmatpush3.bf16.msra.mxu0 %v8999_v19 }
0x1ef6   : > { %v8609_v38 = vpop.f32.mrb[30].mxu0 }
0x1ef7   : > { %v4895_v39 = vmul.f32 0.25, %v8609_v38  ;;  %v4885_v40 = vpop.f32.mrb[31].mxu0  ;;  %v7986_v38 = vld [vmem:[%s11428_s10 + $0x168] sm:$0xff] }
0x1ef8   : > { %v4894_v41 = vmul.f32 0.25, %v4885_v40 }
0x1ef9   : > { %v4899_v42 = vsel %vm3140_vm7, %v4895_v39, -inf }
0x1efa   : > { %4900 = vmax.xlane.f32.xlu1 %v4899_v42  ;;  %v4896_v37 = vsel %vm3140_vm7, %v4894_v41, -inf }
0x1efb   : > { %4897 = vmax.xlane.f32.xlu0 %v4896_v37 }
0x1f69   : > { %v8619_v43 = vpop.f32.mrb[32].mxu0 }
0x1f6a   : > { %v5080_v44 = vpop.f32.mrb[33].mxu0  ;;  %v5090_v15 = vmul.f32 0.25, %v8619_v43 }
0x1f6b   : > { %v5089_v45 = vmul.f32 0.25, %v5080_v44 }
0x1f6c   : > { %v5094_v50 = vsel %vm3140_vm7, %v5090_v15, -inf }
0x1f6d   : > { %v5091_v47 = vsel %vm3140_vm7, %v5089_v45, -inf }
0x1f6e   : > { %5092 = vmax.xlane.f32.xlu0 %v5091_v47 }
0x1f72   : > { %5095 = vmax.xlane.f32.xlu0 %v5094_v50 }
0x1f87   : > { %v4901_v51 = vpop.xlane.xlu1 %4900 }
0x1f88   : > { %v4903_v54 = vsub.f32 %v4895_v39, %v4901_v51  ;;  %v4898_v52 = vpop.xlane.xlu0 %4897  ;;  %v9003_v39 = vpack.c.bf16 %v7986_v38, %v7985_v33  ;;  %v8025_v33 = vld [vmem:[%s11431_s26 + $0xe] ss:$0 sm:$0xff]  ;;  %v8018_v38 = vld [vmem:[%s11431_s26 + $0xd] ss:$0 sm:$0xff] }
0x1f89   : > { %v4902_v46 = vsub.f32 %v4894_v41, %v4898_v52 }
0x1f8a   : > { %v4906_v55 = vmul.f32 1.442695, %v4903_v54  ;;  %9004 = vmatprep.subr.bf16.mxu0 %v9003_v39 }
0x1f8b   : > { %v4904_v56 = vmul.f32 1.442695, %v4902_v46 }
0x1f8c   : > { %9629 = vpow2.f32 %v4906_v55 }
0x1f8d   : > { %9631 = vpow2.f32 %v4904_v56 }
0x1f96   : > { %v9630_v57 = vpop.eup %9629 }
0x1f97   : > { %v4911_v58 = vsel %vm3140_vm7, %v9630_v57, 0.0  ;;  %v9632_v59 = vpop.eup %9631 }
0x1f98   : > { %4912 = vadd.xlane.f32.xlu0 %v4911_v58  ;;  %v4908_v60 = vsel %vm3140_vm7, %v9632_v59, 0.0 }
0x1f9c   : > { %4909 = vadd.xlane.f32.xlu0 %v4908_v60 }
0x1ffb   : > { %v5093_v61 = vpop.xlane.xlu0 %5092 }
0x1ffc   : > { %v5097_v53 = vsub.f32 %v5089_v45, %v5093_v61 }
0x1ffe   : > { %v5099_v62 = vmul.f32 1.442695, %v5097_v53 }
0x1fff   : > { %v5096_v63 = vpop.xlane.xlu0 %5095 }
0x2000   : > { %9633 = vpow2.f32 %v5099_v62  ;;  %v5098_v1 = vsub.f32 %v5090_v15, %v5096_v63  ;;  %v8021_v62 = vld [vmem:[%s11428_s10 + $0x1c0] sm:$0xff]  ;;  %v8022_v63 = vld [vmem:[%s11428_s10 + $0x1c8] sm:$0xff] }
0x2002   : > { %v5101_v2 = vmul.f32 1.442695, %v5098_v1  ;;  %v9021_v1 = vpack.c.bf16 %v8022_v63, %v8021_v62 }
0x2004   : > { %9635 = vpow2.f32 %v5101_v2  ;;  %v8014_v2 = vld [vmem:[%s11428_s10 + $0x1a0] sm:$0xff] }
0x200a   : > { %v9634_v3 = vpop.eup %9633 }
0x200b   : > { %v5103_v36 = vsel %vm3140_vm7, %v9634_v3, 0.0 }
0x200c   : > { %5104 = vadd.xlane.f32.xlu0 %v5103_v36 }
0x200e   : > { %v9636_v4 = vpop.eup %9635 }
0x200f   : > { %v5106_v5 = vsel %vm3140_vm7, %v9636_v4, 0.0 }
0x2010   : > { %5107 = vadd.xlane.f32.xlu1 %v5106_v5  ;;  %v8024_v5 = vld [vmem:[%s11428_s10 + $0x1d8] sm:$0xff] }
0x2022   : > { %5113 = vrot.lane.b32.xlu0 %v4802_v26, %s11442_s2  ;;  %v8009_v26 = vld [vmem:[%s11428_s10 + $0x188] sm:$0xff] }
0x2023   : > { %v9008_v28 = vpack.c.bf16 %v8009_v26, %v8008_v25 }
0x2025   : > { %v4913_v6 = vpop.xlane.xlu0 %4912 }
0x2026   : > { %9637 = vrcp.f32 %v4913_v6 }
0x2029   : > { %v4910_v9 = vpop.xlane.xlu0 %4909 }
0x202a   : > { %9639 = vrcp.f32 %v4910_v9  ;;  %v8016_v9 = vld [vmem:[%s11428_s10 + $0x1b0] sm:$0xff] }
0x2030   : > { %v9638_v10 = vpop.eup %9637 }
0x2031   : > { %v4917_v16 = vmul.f32 %v9638_v10, %v9630_v57  ;;  %v8017_v10 = vld [vmem:[%s11428_s10 + $0x1b8] sm:$0xff] }
0x2034   : > { %v9640_v11 = vpop.eup %9639 }
0x2035   : > { %v4915_v12 = vmul.f32 %v9640_v11, %v9632_v59  ;;  %v9017_v11 = vpack.c.bf16 %v8017_v10, %v8016_v9 }
0x2037   : > { %8612 = vmatprep.mubr.msk.f32.mxu1 %vm3140_vm7, %v4915_v12 }
0x2038   : > { %8613 = vmatmul.mubr.msk.f32.vlgmr.msra.gmra.mrb[38].mxu1 %vm3140_vm7, %v4917_v16 }
0x2099   : > { %v5105_v20 = vpop.xlane.xlu0 %5104 }
0x209a   : > { %9641 = vrcp.f32 %v5105_v20 }
0x209d   : > { %v5108_v21 = vpop.xlane.xlu1 %5107  ;;  %v5114_v48 = vpop.permute.xlu0 %5113 }
0x209e   : > { %9643 = vrcp.f32 %v5108_v21  ;;  %8620 = vmatprep.subr.msk.mxu1 %vm3144_vm6, %v5114_v48 }
0x209f   : > { %8621 = vmatpush3.msk.msra.mxu1 %vm3144_vm6, %v5114_v48  ;;  %v8006_v48 = vld [vmem:[%s11437_s15 + $0x3] ss:$0 sm:$0xff] }
0x20a0   : > { %9007 = vmatprep.subr.bf16.mxu1 %v10008_v0 }
0x20a4   : > { %v9642_v23 = vpop.eup %9641 }
0x20a5   : > { %v5110_v24 = vmul.f32 %v9642_v23, %v9634_v3  ;;  %v8015_v3 = vld [vmem:[%s11428_s10 + $0x1a8] sm:$0xff] }
0x20a6   : > { %v9013_v36 = vpack.c.bf16 %v8015_v3, %v8014_v2  ;;  %v8029_v2 = vld [vmem:[%s11428_s10 + $0x1e8] sm:$0xff] }
0x20a7   : > { %8622 = vmatprep.mubr.msk.f32.mxu1 %vm3140_vm7, %v5110_v24  ;;  %v8007_v24 = vld [vmem:[%s11438_s1 + $0x3] ss:$0 sm:$0xff] }
0x20a8   : > { %v9644_v27 = vpop.eup %9643 }
0x20a9   : > { %v5112_v29 = vmul.f32 %v9644_v27, %v9636_v4  ;;  %v8023_v4 = vld [vmem:[%s11428_s10 + $0x1d0] sm:$0xff] }
0x20aa   : > { %v9025_v6 = vpack.c.bf16 %v8024_v5, %v8023_v4 }
0x20ab   : > { %8623 = vmatmul.mubr.msk.f32.vlgmr.msra.gmra.mrb[40].mxu1 %vm3140_vm7, %v5112_v29 }
0x20ac   : > { %9009 = vmatpush3.bf16.msra.mxu1 %v9008_v28  ;;  %8647 = vmatprep.mubr.msk.f32.mxu1 %vm10014_vm4, %v10015_v7 }
0x20ad   : > { %9010 = vmatprep.subr.bf16.mxu1 %v10008_v0 }
0x20b0   : > { %9012 = vmatpush3.bf16.msra.mxu1 %v9011_v31 }
0x20b1   : > { %9022 = vmatprep.subr.bf16.mxu1 %v9021_v1 }
0x20b3   : > { %8648 = vmatmul.mubr.msk.f32.vlgmr.msra.gmra.mrb[42].mxu1 %vm1686_vm1, %v10856_v22  ;;  %v8005_v22 = vld [vmem:[%s11431_s26 + $0xb] ss:$0 sm:$0xff] }
0x20b4   : > { %9024 = vmatpush3.bf16.msra.mxu1 %v9021_v1  ;;  %v8028_v1 = vld [vmem:[%s11428_s10 + $0x1e0] sm:$0xff] }
0x20b5   : > { %9026 = vmatprep.subr.bf16.mxu1 %v9025_v6  ;;  %v9047_v3 = vpack.c.bf16 %v8029_v2, %v8028_v1 }
0x20b8   : > { %9028 = vmatpush3.bf16.msra.mxu1 %v9025_v6 }
0x20b9   : > { %9033 = vmatprep.subr.bf16.mxu1 %v10008_v0 }
0x210b   : > { %v8614_v40 = vpop.f32.mrb[38].mxu1 }
0x210c   : > { %v4993_v41 = vpop.f32.mrb[39].mxu1 }
0x217e   : > { %v8624_v42 = vpop.f32.mrb[40].mxu1 }
0x217f   : > { %v5189_v37 = vpop.f32.mrb[41].mxu1 }
0x2180   : > { %8629 = vmatprep.mubr.msk.f32.mxu0 %vm1828_vm2, %v5189_v37 }
0x2181   : > { %8630 = vmatmul.mubr.msk.f32.vlgmr.msra.gmra.mrb[34].mxu0 %vm1828_vm2, %v8624_v42 }
0x2182   : > { %9006 = vmatpush3.bf16.msra.mxu0 %v9003_v39  ;;  %8636 = vmatprep.mubr.msk.f32.mxu0 %vm1828_vm2, %v4993_v41 }
0x2183   : > { %9014 = vmatprep.subr.bf16.mxu0 %v9013_v36 }
0x2186   : > { %v10908_v43 = vpop.f32.mrb[42].mxu1 }
0x2187   : > { %v8649_v44 = vpop.f32.mrb[43].mxu1 }
0x2189   : > { %8637 = vmatmul.mubr.msk.f32.vlgmr.msra.gmra.mrb[34].mxu0 %vm1828_vm2, %v8614_v40 }
0x218a   : > { %9016 = vmatpush3.bf16.msra.mxu0 %v9013_v36 }
0x218b   : > { %9018 = vmatprep.subr.bf16.mxu0 %v9017_v11 }
0x218e   : > { %9020 = vmatpush3.bf16.msra.mxu0 %v9017_v11 }
0x218f   : > { %9029 = vmatprep.subr.bf16.mxu0 %v10008_v0 }
0x225c   : > { %v8638_v45 = vpop.f32.mrb[34].mxu0 }
0x225d   : > { %v5351_v15 = vpop.f32.mrb[35].mxu0  ;;  %v5366_v47 = vadd.f32 %v8638_v45, %v8005_v22 }
0x225e   : > { %v5365_v50 = vadd.f32 %v8005_v22, %v5351_v15 }
0x225f   : > { %v5368_v52 = vadd.f32 %v5366_v47, %v10718_v14 }
0x2260   : > { %v5367_v51 = vadd.f32 %v5365_v50, %v10690_v34  ;;  %v8012_v50 = vld [vmem:[%s11431_s26 + $0xc] ss:$0 sm:$0xff] }
0x2261   : > { %v5374_v46 = vsel %vm1686_vm1, %v5368_v52, 0.0 }
0x2262   : > { %v5371_v54 = vsel %vm1686_vm1, %v5367_v51, 0.0 }
0x2263   : > { %5372 = vadd.xlane.f32.xlu1 %v5371_v54 }
0x2267   : > { %5375 = vadd.xlane.f32.xlu1 %v5374_v46 }
0x22f0   : > { %v5373_v55 = vpop.xlane.xlu1 %5372 }
0x22f1   : > { %v5377_v56 = vmul.f32 0.03125, %v5373_v55 }
0x22f3   : > { %v5379_v57 = vsub.f32 %v5367_v51, %v5377_v56  ;;  %v5488_v51 = vadd.f32 %v8012_v50, %v10908_v43  ;;  %v8042_v50 = vld [vmem:[%s11431_s26 + $0xf] ss:$0 sm:$0xff] }
0x22f4   : > { %v5376_v58 = vpop.xlane.xlu1 %5375 }
0x22f5   : > { %v5378_v59 = vmul.f32 0.03125, %v5376_v58  ;;  %v5381_v60 = vmul.f32 %v5379_v57, %v5379_v57 }
0x22f7   : > { %v5380_v34 = vsub.f32 %v5368_v52, %v5378_v59  ;;  %v5383_v61 = vsel %vm1686_vm1, %v5381_v60, 0.0 }
0x22f8   : > { %5384 = vadd.xlane.f32.xlu1 %v5383_v61 }
0x22f9   : > { %v5382_v14 = vmul.f32 %v5380_v34, %v5380_v34 }
0x22fb   : > { %v5386_v53 = vsel %vm1686_vm1, %v5382_v14, 0.0 }
0x22fc   : > { %5387 = vadd.xlane.f32.xlu1 %v5386_v53 }
0x2385   : > { %v5385_v12 = vpop.xlane.xlu1 %5384 }
0x2386   : > { %v5389_v16 = vmul.f32 0.03125, %v5385_v12 }
0x2388   : > { %v5391_v17 = vadd.f32 1e-05, %v5389_v16 }
0x2389   : > { %v5388_v18 = vpop.xlane.xlu1 %5387 }
0x238a   : > { %9645 = vrsqrt.f32 %v5391_v17  ;;  %v5390_v19 = vmul.f32 0.03125, %v5388_v18 }
0x238c   : > { %v5392_v20 = vadd.f32 1e-05, %v5390_v19 }
0x238e   : > { %9647 = vrsqrt.f32 %v5392_v20 }
0x2394   : > { %v9646_v21 = vpop.eup %9645 }
0x2395   : > { %v5395_v23 = vmul.f32 %v9646_v21, %v5379_v57 }
0x2397   : > { %v5401_v25 = vmul.f32 %v8006_v48, %v5395_v23 }
0x2398   : > { %v9648_v26 = vpop.eup %9647 }
0x2399   : > { %v5396_v27 = vmul.f32 %v9648_v26, %v5380_v34  ;;  %v10930_v28 = vadd.f32 %v8007_v24, %v5401_v25  ;;  %v8030_v26 = vld [vmem:[%s11428_s10 + $0x1f0] sm:$0xff] }
0x239b   : > { %v5402_v29 = vmul.f32 %v8006_v48, %v5396_v27  ;;  %8669 = vmatprep.mubr.msk.f32.mxu1 %vm1686_vm1, %v10930_v28  ;;  %v5409_v30 = vadd.f32 %v10930_v28, %v10693_v35  ;;  %v8031_v27 = vld [vmem:[%s11428_s10 + $0x1f8] sm:$0xff] }
0x239d   : > { %v10936_v8 = vadd.f32 %v8007_v24, %v5402_v29  ;;  %8658 = vmatprep.mubr.msk.f32.mxu0 %vm1686_vm1, %v5409_v30  ;;  %v9044_v30 = vpack.c.bf16 %v8031_v27, %v8030_v26 }
0x239f   : > { %8670 = vmatmul.mubr.msk.f32.vlgmr.msra.gmra.mrb[44].mxu1 %vm1686_vm1, %v10936_v8  ;;  %v5410_v31 = vadd.f32 %v10936_v8, %v10716_v13 }
0x23a0   : > { %8683 = vmatprep.mubr.msk.f32.mxu1 %vm10014_vm4, %v10015_v7 }
0x23a1   : > { %8659 = vmatmul.mubr.msk.f32.vlgmr.msra.gmra.mrb[36].mxu0 %vm1686_vm1, %v5410_v31 }
0x23a2   : > { %8676 = vmatprep.mubr.msk.f32.mxu0 %vm10014_vm4, %v10015_v7 }
0x2472   : > { %v8671_v35 = vpop.f32.mrb[44].mxu1 }
0x2473   : > { %v5670_v39 = vadd.f32 %v8671_v35, %v8025_v33  ;;  %v5664_v40 = vpop.f32.mrb[45].mxu1  ;;  %v6196_v35 = vld [vmem:[%s11443_s0 + $0x8] sm:$0xff] }
0x2474   : > { %v5665_v41 = vadd.f32 %v8025_v33, %v5664_v40  ;;  %v8660_v42 = vpop.f32.mrb[36].mxu0  ;;  %v6195_v33 = vld [vmem:[%s11443_s0] sm:$0xff]  ;;  %v6198_v40 = vld [vmem:[%s11443_s0 + $0x18] sm:$0xff] }
0x2475   : > { %v5579_v37 = vadd.f32 %v8660_v42, %v8018_v38  ;;  %v5573_v44 = vpop.f32.mrb[37].mxu0 }
0x2476   : > { %v9570_v22 = vpack.i.bf16 %v5670_v39, %v5665_v41  ;;  %v9034_v13 = vpack.c.bf16 %v5670_v39, %v5665_v41  ;;  %v5574_v45 = vadd.f32 %v8018_v38, %v5573_v44  ;;  %v9049_v38 = vpack.c.bf16 %v6196_v35, %v6195_v33  ;;  %v6197_v39 = vld [vmem:[%s11443_s0 + $0x10] sm:$0xff]  ;;  %s11445_s0 = sld [smem:[#allocation48_spill]] }
0x2477   : > { %v9053_v41 = vpack.c.bf16 %v6198_v40, %v6197_v39 }
0x2478   : > { %v9565_v15 = vpack.i.bf16 %v5579_v37, %v5574_v45  ;;  %v9030_v47 = vpack.c.bf16 %v5579_v37, %v5574_v45  ;;  %9035 = vmatpush3.bf16.msra.mxu1 %v9034_v13 }
0x2479   : > { %9036 = vmatprep.subr.bf16.mxu1 %v10008_v0 }
0x247a   : > { %9566 = vrot.lane.b32.xlu0 %v9565_v15, %s11442_s2  ;;  %9032 = vmatpush3.bf16.xpose.msk.msra.mxu0 %vm10523_vm3, %v9030_v47 }
0x247b   : > { %9040 = vmatprep.subr.bf16.mxu0 %v10008_v0 }
0x247c   : > { %v6602_v1 = vld [vmem:[%s11445_s0 + $0x8] sm:$0xff] }
0x2481   : > { %8677 = vmatmul.mubr.msk.f32.vlgmr.msra.gmra.mrb[38].mxu0 %vm1828_vm2, %v5488_v51 }
0x2482   : > { %8697 = vmatprep.mubr.msk.f32.mxu0 %vm10014_vm4, %v10015_v7 }
0x24ec   : > { %v9567_v34 = vpop.permute.xlu0 %9566 }
0x24ed   : > { %v9569_v61 = vunpack.i.h.bf16 %v9567_v34  ;;  %v9568_v14 = vunpack.i.l.bf16 %v9567_v34 }
0x24ef   : > { %v9037_v63 = vpack.c.bf16 %v9569_v61, %v9568_v14 }
0x2554   : > { %v5753_v54 = vpop.f32.mrb[38].mxu0 }
0x2555   : > { %v5757_v52 = vmul.f32 0.25, %v5753_v54  ;;  %v8678_v46 = vpop.f32.mrb[39].mxu0 }
0x2556   : > { %v8045_v46 = vld [vmem:[#allocation4] ss:$0 sm:$0xff] }
0x2557   : > { %v5758_v55 = vsel %vm3916_vm9, %v5757_v52, -inf }
0x2558   : > { %5759 = vmax.xlane.f32.xlu1 %v5758_v55 }
0x25e5   : > { %v5760_v56 = vpop.xlane.xlu1 %5759 }
0x25e6   : > { %v5761_v57 = vsub.f32 %v5757_v52, %v5760_v56 }
0x25e8   : > { %v5762_v58 = vmul.f32 1.442695, %v5761_v57 }
0x25ea   : > { %9649 = vpow2.f32 %v5762_v58 }
0x25f4   : > { %v9650_v59 = vpop.eup %9649 }
0x25f5   : > { %v5764_v60 = vsel %vm3916_vm9, %v9650_v59, 0.0 }
0x25f6   : > { %5765 = vadd.xlane.f32.xlu1 %v5764_v60 }
0x2607   : > { %5842 = vrot.lane.b32.xlu1 %v5488_v51, %s11442_s2 }
0x2683   : > { %v5766_v43 = vpop.xlane.xlu1 %5765 }
0x2684   : > { %9651 = vrcp.f32 %v5766_v43 }
0x2687   : > { %v5843_v36 = vpop.permute.xlu1 %5842 }
0x268e   : > { %v9652_v53 = vpop.eup %9651 }
0x268f   : > { %v5768_v62 = vmul.f32 %v9652_v53, %v9650_v59 }
0x2691   : > { %8684 = vmatmul.mubr.msk.f32.vlgmr.msra.gmra.mrb[46].mxu1 %vm1828_vm2, %v5768_v62 }
0x2692   : > { %9039 = vmatpush3.bf16.xpose.msk.msra.mxu1 %vm10523_vm3, %v9037_v63  ;;  %8690 = vmatprep.mubr.msk.f32.mxu1 %vm10014_vm4, %v10015_v7  ;;  %v6601_v63 = vld [vmem:[%s11445_s0] sm:$0xff] }
0x2693   : > { %9046 = vmatprep.subr.bf16.mxu1 %v10008_v0 }
0x2699   : > { %8691 = vmatmul.mubr.msk.f32.vlgmr.msra.gmra.mrb[48].mxu1 %vm1828_vm2, %v5843_v36  ;;  %v9082_v36 = vpack.c.bf16 %v6602_v1, %v6601_v63  ;;  %v6605_v1 = vld [vmem:[#allocation10] sm:$0x1] }
0x269a   : > { %9048 = vmatpush3.bf16.msra.mxu1 %v9047_v3  ;;  %8711 = vmatprep.mubr.msk.f32.mxu1 %vm10014_vm4, %v10015_v7 }
0x2764   : > { %v5838_v4 = vpop.f32.mrb[46].mxu1 }
0x2765   : > { %v8685_v5 = vpop.f32.mrb[47].mxu1  ;;  %8712 = vmatmul.mubr.msk.f32.vlgmr.msra.gmra.mrb[50].mxu1 %vm1828_vm2, %v5838_v4 }
0x2766   : > { %v6603_v5 = vld [vmem:[%s11445_s0 + $0x10] sm:$0xff] }
0x276c   : > { %v5920_v32 = vpop.f32.mrb[48].mxu1 }
0x276d   : > { %v5924_v6 = vmul.f32 0.25, %v5920_v32  ;;  %v8692_v9 = vpop.f32.mrb[49].mxu1  ;;  %v6604_v32 = vld [vmem:[%s11445_s0 + $0x18] sm:$0xff]  ;;  %s11447_s0 = sld [smem:[#allocation49_spill]] }
0x276f   : > { %v5925_v10 = vsel %vm3916_vm9, %v5924_v6, -inf }
0x2770   : > { %5926 = vmax.xlane.f32.xlu0 %v5925_v10 }
0x2786   : > { %9571 = vrot.lane.b32.xlu0 %v9570_v22, %s11442_s2  ;;  %s11444_s2 = sld [smem:[#allocation46_spill]] }
0x278c   : > { %v6281_v44 = vld [vmem:[%s11444_s2] sm:$0xff]  ;;  %v6282_v22 = vld [vmem:[%s11444_s2 + $0x8] sm:$0xff]  ;;  %v6283_v45 = vld [vmem:[%s11444_s2 + $0x10] sm:$0xff] }
0x278d   : > { %v9057_v13 = vpack.c.bf16 %v6282_v22, %v6281_v44  ;;  %v6284_v15 = vld [vmem:[%s11444_s2 + $0x18] sm:$0xff]  ;;  %s11446_s2 = sld [smem:[#allocation47_spill]] }
0x278e   : > { %v9061_v47 = vpack.c.bf16 %v6284_v15, %v6283_v45 }
0x278f   : > { %9058 = vmatprep.subr.bf16.mxu1 %v9057_v13 }
0x2790   : > { %9060 = vmatpush3.bf16.msra.mxu1 %v9057_v13 }
0x2791   : > { %9062 = vmatprep.subr.bf16.mxu1 %v9061_v47 }
0x2793   : > { %v6494_v26 = vld [vmem:[%s11446_s2 + $0x18] sm:$0xff] }
0x2794   : > { %9064 = vmatpush3.bf16.msra.mxu1 %v9061_v47 }
0x27fd   : > { %v5927_v11 = vpop.xlane.xlu0 %5926 }
0x27fe   : > { %v5928_v12 = vsub.f32 %v5924_v6, %v5927_v11  ;;  %v9085_v6 = vpack.c.bf16 %v6604_v32, %v6603_v5 }
0x2800   : > { %v5929_v16 = vmul.f32 1.442695, %v5928_v12 }
0x2801   : > { %v9572_v17 = vpop.permute.xlu0 %9571 }
0x2802   : > { %9653 = vpow2.f32 %v5929_v16  ;;  %v9574_v18 = vunpack.i.h.bf16 %v9572_v17  ;;  %v9573_v19 = vunpack.i.l.bf16 %v9572_v17  ;;  %v8043_v16 = vld [vmem:[%s11437_s15 + $0x4] ss:$0 sm:$0xff] }
0x2804   : > { %v9041_v20 = vpack.c.bf16 %v9574_v18, %v9573_v19  ;;  %v8044_v18 = vld [vmem:[%s11438_s1 + $0x4] ss:$0 sm:$0xff]  ;;  %s11448_s1 = sld [smem:[#allocation50_spill]] }
0x2806   : > { %9042 = vmatpush3.bf16.msra.mxu0 %v9041_v20 }
0x2807   : > { %9043 = vmatprep.subr.bf16.mxu0 %v10008_v0 }
0x280a   : > { %v6760_v5 = vld [vmem:[%s11448_s1] sm:$0xff]  ;;  %v6761_v32 = vld [vmem:[%s11448_s1 + $0x8] sm:$0xff] }
0x280c   : > { %v9654_v21 = vpop.eup %9653 }
0x280d   : > { %v5931_v48 = vsel %vm3916_vm9, %v9654_v21, 0.0 }
0x280e   : > { %5932 = vadd.xlane.f32.xlu1 %v5931_v48  ;;  %v6491_v48 = vld [vmem:[%s11446_s2] sm:$0xff] }
0x2838   : > { %v6159_v23 = vpop.f32.mrb[50].mxu1 }
0x2839   : > { %v8713_v24 = vpop.f32.mrb[51].mxu1 }
0x283a   : > { %v6493_v24 = vld [vmem:[%s11446_s2 + $0x10] sm:$0xff] }
0x283b   : > { %v9077_v27 = vpack.c.bf16 %v6494_v26, %v6493_v24 }
0x289b   : > { %v5933_v25 = vpop.xlane.xlu1 %5932 }
0x289c   : > { %9655 = vrcp.f32 %v5933_v25 }
0x28a6   : > { %v9656_v29 = vpop.eup %9655 }
0x28a7   : > { %v5935_v31 = vmul.f32 %v9656_v29, %v9654_v21 }
0x28a9   : > { %8698 = vmatmul.mubr.msk.f32.vlgmr.msra.gmra.mrb[40].mxu0 %vm1828_vm2, %v5935_v31 }
0x28aa   : > { %9045 = vmatpush3.bf16.msra.mxu0 %v9044_v30  ;;  %8704 = vmatprep.mubr.msk.f32.mxu0 %vm10014_vm4, %v10015_v7 }
0x28ab   : > { %9050 = vmatprep.subr.bf16.mxu0 %v9049_v38 }
0x297c   : > { %v6013_v42 = vpop.f32.mrb[40].mxu0 }
0x297d   : > { %v8699_v37 = vpop.f32.mrb[41].mxu0  ;;  %8705 = vmatmul.mubr.msk.f32.vlgmr.msra.gmra.mrb[42].mxu0 %vm1828_vm2, %v6013_v42 }
0x297e   : > { %9052 = vmatpush3.bf16.msra.mxu0 %v9049_v38  ;;  %8722 = vmatprep.mubr.msk.f32.mxu0 %vm1686_vm1, %v10930_v28  ;;  %v8052_v38 = vld [vmem:[#allocation6] ss:$0 sm:$0xff] }
0x297f   : > { %9054 = vmatprep.subr.bf16.mxu0 %v9053_v41 }
0x2982   : > { %9056 = vmatpush3.bf16.msra.mxu0 %v9053_v41  ;;  %v8053_v41 = vld [vmem:[#allocation7] ss:$0 sm:$0xff] }
0x2983   : > { %9066 = vmatprep.subr.bf16.mxu0 %v9057_v13 }
0x2985   : > { %8723 = vmatmul.mubr.msk.f32.vlgmr.msra.gmra.mrb[44].mxu0 %vm1686_vm1, %v10936_v8 }
0x2986   : > { %9068 = vmatpush3.bf16.msra.mxu0 %v9057_v13 }
0x2987   : > { %9070 = vmatprep.subr.bf16.mxu0 %v9061_v47 }
0x298a   : > { %9072 = vmatpush3.bf16.msra.mxu0 %v9061_v47 }
0x298b   : > { %9081 = vmatprep.subr.bf16.mxu0 %v10008_v0 }
0x2a50   : > { %v6086_v28 = vpop.f32.mrb[42].mxu0 }
0x2a51   : > { %v6160_v8 = vadd.f32 %v6159_v23, %v6086_v28  ;;  %v8706_v51 = vpop.f32.mrb[43].mxu0  ;;  %v6492_v23 = vld [vmem:[%s11446_s2 + $0x8] sm:$0xff]  ;;  %s11449_s2 = sld [smem:[#allocation51_spill]] }
0x2a52   : > { %v9073_v25 = vpack.c.bf16 %v6492_v23, %v6491_v48 }
0x2a53   : > { %v6168_v54 = vadd.f32 %v8042_v50, %v6160_v8 }
0x2a54   : > { %9074 = vmatprep.subr.bf16.mxu1 %v9073_v25 }
0x2a55   : > { %v6169_v52 = vadd.f32 %v6168_v54, %v10850_v49 }
0x2a57   : > { %v6172_v55 = vsel %vm3539_vm8, %v6169_v52, 0.0  ;;  %v6849_v24 = vld [vmem:[%s11449_s2 + $0x20] sm:$0xff]  ;;  %v6854_v26 = vld [vmem:[%s11449_s2 + $0x48] sm:$0xff] }
0x2a58   : > { %v8724_v56 = vpop.f32.mrb[44].mxu0  ;;  %6173 = vadd.xlane.f32.xlu1 %v6172_v55 }
0x2a59   : > { %v6272_v57 = vpop.f32.mrb[45].mxu0  ;;  %v6278_v59 = vadd.f32 %v8724_v56, %v8045_v46 }
0x2a5a   : > { %v6273_v58 = vadd.f32 %v8045_v46, %v6272_v57 }
0x2a5c   : > { %8733 = vmatprep.mubr.msk.f32.mxu1 %vm1686_vm1, %v6273_v58 }
0x2a5d   : > { %8734 = vmatmul.mubr.msk.f32.vlgmr.msra.gmra.mrb[52].mxu1 %vm1686_vm1, %v6278_v59 }
0x2a5e   : > { %9076 = vmatpush3.bf16.msra.mxu1 %v9073_v25  ;;  %v6851_v25 = vld [vmem:[%s11449_s2 + $0x30] sm:$0xff] }
0x2a5f   : > { %9078 = vmatprep.subr.bf16.mxu1 %v9077_v27 }
0x2a62   : > { %9080 = vmatpush3.bf16.msra.mxu1 %v9077_v27  ;;  %v9105_v27 = vpack.c.bf16 %v6851_v25, %v6849_v24  ;;  %v7061_v25 = vld [vmem:[%s10260_s29 + $0x118] sm:$0xff] }
0x2a63   : > { %9087 = vmatprep.subr.bf16.mxu1 %v10008_v0 }
0x2ae5   : > { %v6174_v60 = vpop.xlane.xlu1 %6173 }
0x2ae6   : > { %v6175_v43 = vmul.f32 0.03125, %v6174_v60  ;;  %v6681_v60 = vld [vmem:[%s11447_s0] sm:$0xff] }
0x2ae8   : > { %v6176_v34 = vsub.f32 %v6169_v52, %v6175_v43  ;;  %v6682_v43 = vld [vmem:[%s11447_s0 + $0x8] sm:$0xff] }
0x2aea   : > { %v6177_v49 = vmul.f32 %v6176_v34, %v6176_v34 }
0x2aec   : > { %v6178_v61 = vsel %vm3539_vm8, %v6177_v49, 0.0 }
0x2aed   : > { %6179 = vadd.xlane.f32.xlu0 %v6178_v61  ;;  %v9088_v61 = vpack.c.bf16 %v6682_v43, %v6681_v60 }
0x2b30   : > { %v8735_v14 = vpop.f32.mrb[52].mxu1 }
0x2b31   : > { %v6367_v53 = vsub.f32 %v6278_v59, %v8735_v14  ;;  %v6357_v62 = vpop.f32.mrb[53].mxu1 }
0x2b32   : > { %v6366_v2 = vsub.f32 %v6273_v58, %v6357_v62  ;;  %v6684_v62 = vld [vmem:[%s11447_s0 + $0x18] sm:$0xff] }
0x2b33   : > { %v6369_v4 = vmul.f32 %v6367_v53, %v6367_v53 }
0x2b34   : > { %v6368_v3 = vmul.f32 %v6366_v2, %v6366_v2 }
0x2b36   : > { %8744 = vmatprep.mubr.msk.f32.mxu0 %vm1686_vm1, %v6368_v3 }
0x2b37   : > { %8745 = vmatmul.mubr.msk.f32.vlgmr.msra.gmra.mrb[46].mxu0 %vm1686_vm1, %v6369_v4 }
0x2b38   : > { %9083 = vmatpush3.bf16.msra.mxu0 %v9082_v36  ;;  %8766 = vmatprep.mubr.msk.f32.mxu0 %vm10014_vm4, %v10015_v7 }
0x2b39   : > { %9084 = vmatprep.subr.bf16.mxu0 %v10008_v0 }
0x2b3c   : > { %9086 = vmatpush3.bf16.msra.mxu0 %v9085_v6  ;;  %v9094_v6 = vpack.c.bf16 %v6761_v32, %v6760_v5 }
0x2b3d   : > { %9093 = vmatprep.subr.bf16.mxu0 %v10008_v0 }
0x2b7a   : > { %v6180_v9 = vpop.xlane.xlu0 %6179 }
0x2b7b   : > { %v6181_v10 = vmul.f32 0.03125, %v6180_v9  ;;  %v6762_v9 = vld [vmem:[%s11448_s1 + $0x10] sm:$0xff] }
0x2b7d   : > { %v6182_v11 = vadd.f32 1e-05, %v6181_v10  ;;  %v6763_v10 = vld [vmem:[%s11448_s1 + $0x18] sm:$0xff] }
0x2b7f   : > { %9657 = vrsqrt.f32 %v6182_v11  ;;  %v9097_v11 = vpack.c.bf16 %v6763_v10, %v6762_v9 }
0x2b89   : > { %v9658_v12 = vpop.eup %9657 }
0x2b8a   : > { %v6184_v17 = vmul.f32 %v9658_v12, %v6176_v34  ;;  %v6846_v12 = vld [vmem:[%s11449_s2 + $0x8] sm:$0xff] }
0x2b8c   : > { %v6189_v19 = vmul.f32 %v8043_v16, %v6184_v17  ;;  %v6848_v16 = vld [vmem:[%s11449_s2 + $0x18] sm:$0xff]  ;;  %v6845_v17 = vld [vmem:[%s11449_s2] sm:$0xff] }
0x2b8e   : > { %v6194_v20 = vadd.f32 %v8044_v18, %v6189_v19  ;;  %v9099_v18 = vpack.c.bf16 %v6848_v16, %v6846_v12  ;;  %v6847_v19 = vld [vmem:[%s11449_s2 + $0x10] sm:$0xff]  ;;  %v7037_v12 = vld [vmem:[%s10260_s29 + $0x58] sm:$0xff] }
0x2b8f   : > { %v9101_v48 = vpack.c.bf16 %v6847_v19, %v6845_v17  ;;  %v7028_v17 = vld [vmem:[%s10260_s29 + $0x10] sm:$0xff] }
0x2b90   : > { %v6607_v21 = vrot.slane %v6194_v20, 1  ;;  %v6850_v20 = vld [vmem:[%s11449_s2 + $0x28] sm:$0xff] }
0x2b92   : > { %8767 = vmatmul.mubr.msk.f32.vlgmr.msra.gmra.mrb[48].mxu0 %vm1686_vm1, %v6607_v21  ;;  %v6852_v21 = vld [vmem:[%s11449_s2 + $0x38] sm:$0xff] }
0x2b93   : > { %8788 = vmatprep.mubr.msk.f32.mxu0 %vm10014_vm4, %v10015_v7  ;;  %9095 = vmatpush3.bf16.msra.mxu0 %v9094_v6  ;;  %v9103_v23 = vpack.c.bf16 %v6852_v21, %v6850_v20  ;;  %v7045_v20 = vld [vmem:[%s10260_s29 + $0x98] sm:$0xff] }
0x2b94   : > { %9096 = vmatprep.subr.bf16.mxu0 %v10008_v0  ;;  %v7053_v21 = vld [vmem:[%s10260_s29 + $0xd8] sm:$0xff] }
0x2b97   : > { %9098 = vmatpush3.bf16.msra.mxu0 %v9097_v11  ;;  %v7029_v11 = vld [vmem:[%s10260_s29 + $0x18] sm:$0xff] }
0x2b98   : > { %v9183_v16 = vpack.c.bf16 %v7037_v12, %v7029_v11  ;;  %v7188_v11 = vld [vmem:[%s10260_s29 + $0x510] sm:$0xff] }
0x2b99   : > { %v7196_v12 = vld [vmem:[%s10260_s29 + $0x550] sm:$0xff] }
0x2c0a   : > { %v8746_v29 = vpop.f32.mrb[46].mxu0 }
0x2c0b   : > { %v6448_v30 = vadd.f32 1e-06, %v8746_v29  ;;  %v6442_v31 = vpop.f32.mrb[47].mxu0 }
0x2c0c   : > { %v6443_v33 = vadd.f32 1e-06, %v6442_v31 }
0x2c0d   : > { %9659 = vrsqrt.f32 %v6448_v30 }
0x2c0e   : > { %9661 = vrsqrt.f32 %v6443_v33  ;;  %v6685_v33 = vld [vmem:[#allocation12] sm:$0x1] }
0x2c17   : > { %v9660_v35 = vpop.eup %9659 }
0x2c18   : > { %v9662_v39 = vpop.eup %9661  ;;  %v6454_v40 = vmul.f32 %v9660_v35, %v6367_v53  ;;  %v6683_v53 = vld [vmem:[%s11447_s0 + $0x10] sm:$0xff]  ;;  %s11450_s0 = sshll.u32 %s11452_s7, 3 }
0x2c19   : > { %v6453_v42 = vmul.f32 %v9662_v39, %v6366_v2  ;;  %v9091_v63 = vpack.c.bf16 %v6684_v62, %v6683_v53  ;;  %v6764_v62 = vld [vmem:[#allocation13] sm:$0x1]  ;;  %s1562_s1 = scalar_lea.vmem %s10265_s30, %s11450_s0 }
0x2c1a   : > { %v6463_v37 = vmul.f32 %v8052_v38, %v6454_v40 }
0x2c1b   : > { %v6462_v44 = vmul.f32 %v8052_v38, %v6453_v42  ;;  %v6855_v42 = vld [vmem:[%s11449_s2 + $0x50] sm:$0xff] }
0x2c1c   : > { %v6472_v22 = vadd.f32 %v8053_v41, %v6463_v37 }
0x2c1d   : > { %v6471_v13 = vadd.f32 %v8053_v41, %v6462_v44  ;;  %v6853_v41 = vld [vmem:[%s11449_s2 + $0x40] sm:$0xff]  ;;  %v6858_v44 = vld [vmem:[%s11449_s2 + $0x68] sm:$0xff] }
0x2c1e   : > { %v6474_v45 = vmul.f32 %v6472_v22, %v6472_v22  ;;  %v9109_v37 = vpack.c.bf16 %v6855_v42, %v6853_v41  ;;  %v7093_v41 = vld [vmem:[%s10260_s29 + $0x218] sm:$0xff] }
0x2c1f   : > { %v6473_v15 = vmul.f32 %v6471_v13, %v6471_v13  ;;  %v7101_v42 = vld [vmem:[%s10260_s29 + $0x258] sm:$0xff] }
0x2c20   : > { %v6476_v47 = vmul.f32 %v6474_v45, %v6472_v22  ;;  %v6857_v45 = vld [vmem:[%s11449_s2 + $0x60] sm:$0xff] }
0x2c21   : > { %v6475_v28 = vmul.f32 %v6473_v15, %v6471_v13  ;;  %v6859_v15 = vld [vmem:[%s11449_s2 + $0x70] sm:$0xff] }
0x2c22   : > { %v6478_v50 = vmul.f32 0.044715, %v6476_v47  ;;  %v9113_v47 = vpack.c.bf16 %v6859_v15, %v6857_v45  ;;  %v7109_v45 = vld [vmem:[%s10260_s29 + $0x298] sm:$0xff] }
0x2c23   : > { %v6477_v8 = vmul.f32 0.044715, %v6475_v28  ;;  %v8054_v28 = vld [vmem:[#allocation9] ss:$0 sm:$0xff]  ;;  %v7117_v15 = vld [vmem:[%s10260_s29 + $0x2d8] sm:$0xff] }
0x2c24   : > { %v6480_v51 = vadd.f32 %v6478_v50, %v6472_v22 }
0x2c25   : > { %v6479_v54 = vadd.f32 %v6477_v8, %v6471_v13 }
0x2c26   : > { %v6482_v52 = vmul.f32 0.7978846, %v6480_v51 }
0x2c27   : > { %v6481_v46 = vmul.f32 0.7978846, %v6479_v54 }
0x2c28   : > { %9663 = vtanh.f32 %v6482_v52 }
0x2c29   : > { %9665 = vtanh.f32 %v6481_v46 }
0x2c32   : > { %v9664_v55 = vpop.eup %9663 }
0x2c33   : > { %v9666_v56 = vpop.eup %9665  ;;  %v6486_v57 = vadd.f32 1.0, %v9664_v55 }
0x2c34   : > { %v6485_v58 = vadd.f32 1.0, %v9666_v56 }
0x2c35   : > { %v6488_v59 = vmul.f32 0.5, %v6486_v57 }
0x2c36   : > { %v6487_v34 = vmul.f32 0.5, %v6485_v58 }
0x2c37   : > { %v6490_v14 = vmul.f32 %v6488_v59, %v6472_v22  ;;  %v6860_v22 = vld [vmem:[%s11449_s2 + $0x78] sm:$0xff] }
0x2c38   : > { %v6489_v49 = vmul.f32 %v6487_v34, %v6471_v13  ;;  %v9111_v13 = vpack.c.bf16 %v6860_v22, %v6858_v44  ;;  %v6838_v34 = vlaneseq  ;;  %v7092_v44 = vld [vmem:[%s10260_s29 + $0x210] sm:$0xff] }
0x2c39   : > { %v7100_v22 = vld [vmem:[%s10260_s29 + $0x250] sm:$0xff] }
0x2c3a   : > { %8755 = vmatprep.mubr.msk.f32.mxu1 %vm1686_vm1, %v6489_v49  ;;  %v11058_v53 = vshrl.u32 %v6838_v34, 7 }
0x2c3b   : > { %8756 = vmatmul.mubr.msk.f32.vlgmr.msra.gmra.mrb[54].mxu1 %vm1686_vm1, %v6490_v14 }
0x2c3c   : > { %9089 = vmatpush3.bf16.msra.mxu1 %v9088_v61  ;;  %8777 = vmatprep.mubr.msk.f32.mxu1 %vm10014_vm4, %v10015_v7 }
0x2c3d   : > { %9090 = vmatprep.subr.bf16.mxu1 %v10008_v0  ;;  %v6856_v0 = vld [vmem:[%s11449_s2 + $0x58] sm:$0xff] }
0x2c3e   : > { %v9107_v29 = vpack.c.bf16 %v6856_v0, %v6854_v26  ;;  %v7069_v26 = vld [vmem:[%s10260_s29 + $0x158] sm:$0xff] }
0x2c3f   : > { %v9191_v0 = vpack.c.bf16 %v7069_v26, %v7061_v25  ;;  %v7220_v25 = vld [vmem:[%s10260_s29 + $0x610] sm:$0xff] }
0x2c40   : > { %9092 = vmatpush3.bf16.msra.mxu1 %v9091_v63  ;;  %v7228_v26 = vld [vmem:[%s10260_s29 + $0x650] sm:$0xff] }
0x2c41   : > { %9100 = vmatprep.subr.bf16.mxu1 %v9099_v18  ;;  %v7036_v18 = vld [vmem:[%s10260_s29 + $0x50] sm:$0xff] }
0x2c42   : > { %v9185_v19 = vpack.c.bf16 %v7036_v18, %v7028_v17  ;;  %v7205_v17 = vld [vmem:[%s10260_s29 + $0x598] sm:$0xff] }
0x2c43   : > { %v7213_v18 = vld [vmem:[%s10260_s29 + $0x5d8] sm:$0xff] }
0x2c65   : > { %v6676_v2 = vpop.f32.mrb[48].mxu0 }
0x2c66   : > { %v6677_v3 = vadd.f32 %v6676_v2, %v6605_v1  ;;  %v8768_v36 = vpop.f32.mrb[49].mxu0  ;;  %v6840_v2 = vsub.s32 0, %v11058_v53 }
0x2c68   : > { %v6680_v4 = vmax.f32 %v6677_v3, 0.0 }
0x2c6a   : > { %8778 = vmatmul.mubr.msk.f32.vlgmr.msra.gmra.mrb[56].mxu1 %vm1686_vm1, %v6680_v4 }
0x2c6b   : > { %6931 = vmatprep.mubr.f32.mxu1 %v10015_v7  ;;  %9102 = vmatpush1.bf16.msra.mxu1 %v9101_v48  ;;  %v9187_v48 = vpack.c.bf16 %v7053_v21, %v7045_v20  ;;  %v7204_v20 = vld [vmem:[%s10260_s29 + $0x590] sm:$0xff] }
0x2c6c   : > { %9104 = vmatprep.subr.bf16.mxu1 %v9103_v23  ;;  %v7052_v23 = vld [vmem:[%s10260_s29 + $0xd0] sm:$0xff] }
0x2c6d   : > { %v7212_v21 = vld [vmem:[%s10260_s29 + $0x5d0] sm:$0xff] }
0x2c6f   : > { %9106 = vmatpush1.bf16.msra.mxu1 %v9105_v27  ;;  %v7060_v27 = vld [vmem:[%s10260_s29 + $0x110] sm:$0xff] }
0x2c70   : > { %9108 = vmatprep.subr.bf16.mxu1 %v9107_v29  ;;  %v7068_v29 = vld [vmem:[%s10260_s29 + $0x150] sm:$0xff] }
0x2c73   : > { %9110 = vmatpush1.bf16.msra.mxu1 %v9109_v37  ;;  %v9199_v37 = vpack.c.bf16 %v7101_v42, %v7093_v41  ;;  %v7252_v41 = vld [vmem:[%s10260_s29 + $0x710] sm:$0xff] }
0x2c74   : > { %9112 = vmatprep.subr.bf16.mxu1 %v9111_v13  ;;  %v9201_v13 = vpack.c.bf16 %v7100_v22, %v7092_v44  ;;  %v7260_v42 = vld [vmem:[%s10260_s29 + $0x750] sm:$0xff]  ;;  %v7269_v44 = vld [vmem:[%s10260_s29 + $0x798] sm:$0xff] }
0x2c75   : > { %v7277_v22 = vld [vmem:[%s10260_s29 + $0x7d8] sm:$0xff] }
0x2c77   : > { %9114 = vmatpush1.bf16.msra.mxu1 %v9113_v47  ;;  %v9203_v47 = vpack.c.bf16 %v7117_v15, %v7109_v45  ;;  %v7268_v45 = vld [vmem:[%s10260_s29 + $0x790] sm:$0xff] }
0x2c78   : > { %9184 = vmatprep.subr.bf16.mxu1 %v9183_v16  ;;  %v9225_v16 = vpack.c.bf16 %v7196_v12, %v7188_v11  ;;  %v7276_v15 = vld [vmem:[%s10260_s29 + $0x7d0] sm:$0xff]  ;;  %v7058_v11 = vld [vmem:[%s10260_s29 + $0x100] sm:$0xff] }
0x2c79   : > { %v7066_v12 = vld [vmem:[%s10260_s29 + $0x140] sm:$0xff] }
0x2d0e   : > { %v8757_v30 = vpop.f32.mrb[54].mxu1 }
0x2d0f   : > { %v6574_v31 = vpop.f32.mrb[55].mxu1  ;;  %v6580_v50 = vadd.f32 %v8757_v30, %v8054_v28  ;;  %v9193_v30 = vpack.c.bf16 %v7068_v29, %v7060_v27  ;;  %v7237_v27 = vld [vmem:[%s10260_s29 + $0x698] sm:$0xff] }
0x2d10   : > { %v6575_v8 = vadd.f32 %v8054_v28, %v6574_v31  ;;  %v7077_v31 = vld [vmem:[%s10260_s29 + $0x198] sm:$0xff]  ;;  %v7108_v28 = vld [vmem:[%s10260_s29 + $0x290] sm:$0xff] }
0x2d11   : > { %v6584_v51 = vmul.f32 %v6580_v50, %v6580_v50  ;;  %v7245_v29 = vld [vmem:[%s10260_s29 + $0x6d8] sm:$0xff] }
0x2d12   : > { %v6583_v54 = vmul.f32 %v6575_v8, %v6575_v8 }
0x2d13   : > { %v6586_v52 = vmul.f32 %v6584_v51, %v6580_v50  ;;  %v7125_v51 = vld [vmem:[%s10260_s29 + $0x318] sm:$0xff] }
0x2d14   : > { %v6585_v46 = vmul.f32 %v6583_v54, %v6575_v8  ;;  %v7133_v54 = vld [vmem:[%s10260_s29 + $0x358] sm:$0xff] }
0x2d15   : > { %v6588_v55 = vmul.f32 0.044715, %v6586_v52  ;;  %v9207_v52 = vpack.c.bf16 %v7133_v54, %v7125_v51  ;;  %v6946_v51 = vld [vmem:[%s10250_s8 + $0x10] sm:$0xff]  ;;  %v6945_v54 = vld [vmem:[%s10250_s8 + $0x8] sm:$0xff] }
0x2d16   : > { %v6587_v56 = vmul.f32 0.044715, %v6585_v46  ;;  %v7124_v46 = vld [vmem:[%s10260_s29 + $0x310] sm:$0xff] }
0x2d17   : > { %v6590_v57 = vadd.f32 %v6588_v55, %v6580_v50  ;;  %v7132_v55 = vld [vmem:[%s10260_s29 + $0x350] sm:$0xff] }
0x2d18   : > { %v6589_v58 = vadd.f32 %v6587_v56, %v6575_v8  ;;  %v9209_v56 = vpack.c.bf16 %v7132_v55, %v7124_v46 }
0x2d19   : > { %v6592_v59 = vmul.f32 0.7978846, %v6590_v57  ;;  %v7141_v57 = vld [vmem:[%s10260_s29 + $0x398] sm:$0xff] }
0x2d1a   : > { %v6591_v60 = vmul.f32 0.7978846, %v6589_v58  ;;  %v7149_v58 = vld [vmem:[%s10260_s29 + $0x3d8] sm:$0xff] }
0x2d1b   : > { %9667 = vtanh.f32 %v6592_v59  ;;  %v9211_v59 = vpack.c.bf16 %v7149_v58, %v7141_v57  ;;  %v7027_v58 = vld [vmem:[%s10260_s29 + $0x8] sm:$0xff] }
0x2d1c   : > { %9669 = vtanh.f32 %v6591_v60  ;;  %v7140_v60 = vld [vmem:[%s10260_s29 + $0x390] sm:$0xff] }
0x2d25   : > { %v9668_v43 = vpop.eup %9667 }
0x2d26   : > { %v9670_v49 = vpop.eup %9669  ;;  %v6596_v14 = vadd.f32 1.0, %v9668_v43  ;;  %v7148_v43 = vld [vmem:[%s10260_s29 + $0x3d0] sm:$0xff] }
0x2d27   : > { %v6595_v61 = vadd.f32 1.0, %v9670_v49  ;;  %v9213_v34 = vpack.c.bf16 %v7148_v43, %v7140_v60  ;;  %v7157_v49 = vld [vmem:[%s10260_s29 + $0x418] sm:$0xff] }
0x2d28   : > { %v6598_v1 = vmul.f32 0.5, %v6596_v14 }
0x2d29   : > { %v6597_v63 = vmul.f32 0.5, %v6595_v61  ;;  %v7165_v61 = vld [vmem:[%s10260_s29 + $0x458] sm:$0xff] }
0x2d2a   : > { %v6600_v32 = vmul.f32 %v6598_v1, %v6580_v50  ;;  %v7116_v50 = vld [vmem:[%s10260_s29 + $0x2d0] sm:$0xff]  ;;  %v9215_v14 = vpack.c.bf16 %v7165_v61, %v7157_v49 }
0x2d2b   : > { %v6599_v5 = vmul.f32 %v6597_v63, %v6575_v8  ;;  %v9205_v8 = vpack.c.bf16 %v7116_v50, %v7108_v28  ;;  %v7164_v63 = vld [vmem:[%s10260_s29 + $0x450] sm:$0xff] }
0x2d3d   : > { %v6755_v35 = vpop.f32.mrb[56].mxu1 }
0x2d3e   : > { %v6756_v38 = vadd.f32 %v6755_v35, %v6685_v33  ;;  %v8779_v39 = vpop.f32.mrb[57].mxu1  ;;  %v7085_v33 = vld [vmem:[%s10260_s29 + $0x1d8] sm:$0xff] }
0x2d3f   : > { %v9195_v35 = vpack.c.bf16 %v7085_v33, %v7077_v31  ;;  %v7084_v39 = vld [vmem:[%s10260_s29 + $0x1d0] sm:$0xff] }
0x2d40   : > { %v6759_v40 = vmax.f32 %v6756_v38, 0.0  ;;  %v7076_v38 = vld [vmem:[%s10260_s29 + $0x190] sm:$0xff] }
0x2d41   : > { %v7236_v31 = vld [vmem:[%s10260_s29 + $0x690] sm:$0xff] }
0x2d42   : > { %8789 = vmatmul.mubr.msk.f32.vlgmr.msra.gmra.mrb[50].mxu0 %vm1686_vm1, %v6759_v40  ;;  %v9197_v40 = vpack.c.bf16 %v7084_v39, %v7076_v38  ;;  %v7244_v33 = vld [vmem:[%s10260_s29 + $0x6d0] sm:$0xff]  ;;  %v7253_v38 = vld [vmem:[%s10260_s29 + $0x718] sm:$0xff] }
0x2d43   : > { %7019 = vmatprep.mubr.f32.mxu0 %v10015_v7  ;;  %v7261_v39 = vld [vmem:[%s10260_s29 + $0x758] sm:$0xff] }
0x2e15   : > { %v6834_v3 = vpop.f32.mrb[50].mxu0 }
0x2e16   : > { %v6835_v36 = vadd.f32 %v6834_v3, %v6764_v62  ;;  %v8790_v4 = vpop.f32.mrb[51].mxu0  ;;  %v7156_v62 = vld [vmem:[%s10260_s29 + $0x410] sm:$0xff]  ;;  %v7181_v3 = vld [vmem:[%s10260_s29 + $0x4d8] sm:$0xff] }
0x2e17   : > { %v9217_v1 = vpack.c.bf16 %v7164_v63, %v7156_v62  ;;  %v7172_v4 = vld [vmem:[%s10260_s29 + $0x490] sm:$0xff]  ;;  %v7034_v62 = vld [vmem:[%s10260_s29 + $0x40] sm:$0xff]  ;;  %v7043_v63 = vld [vmem:[%s10260_s29 + $0x88] sm:$0xff] }
0x2e18   : > { %v6841_v6 = vrot.slane %v6835_v36, %v6840_v2  ;;  %v7173_v2 = vld [vmem:[%s10260_s29 + $0x498] sm:$0xff] }
0x2e19   : > { %v9219_v36 = vpack.c.bf16 %v7181_v3, %v7173_v2  ;;  %v6844_v2 = vld [vmem:[#allocation15] sm:$0x1] }
0x2e1a   : > { %v6842_v9 = vmul.f32 %v6841_v6, %v6599_v5  ;;  %v6843_v10 = vmul.f32 %v6841_v6, %v6600_v32  ;;  %v7180_v5 = vld [vmem:[%s10260_s29 + $0x4d0] sm:$0xff]  ;;  %v7189_v6 = vld [vmem:[%s10260_s29 + $0x518] sm:$0xff] }
0x2e1b   : > { %v9221_v32 = vpack.c.bf16 %v7180_v5, %v7172_v4  ;;  %v7042_v4 = vld [vmem:[%s10260_s29 + $0x80] sm:$0xff] }
0x2e1c   : > { %8060 = vmatmul.mubr.msk.f32.vlgmr.msra.gmra.mrb[58].mxu1 %vm1598_vm0, %v6842_v9  ;;  %v7197_v9 = vld [vmem:[%s10260_s29 + $0x558] sm:$0xff]  ;;  %v7050_v5 = vld [vmem:[%s10260_s29 + $0xc0] sm:$0xff] }
0x2e1d   : > { %6937 = vmatprep.mubr.f32.mxu1 %v10015_v7  ;;  %9186 = vmatpush1.bf16.msra.mxu1 %v9185_v19  ;;  %v7044_v7 = vld [vmem:[%s10260_s29 + $0x90] sm:$0xff]  ;;  %v9227_v19 = vpack.c.bf16 %v7213_v18, %v7205_v17  ;;  %v7083_v17 = vld [vmem:[%s10260_s29 + $0x1c8] sm:$0xff]  ;;  %v9129_v18 = vpack.c.bf16 %v7066_v12, %v7058_v11 }
0x2e1e   : > { %9188 = vmatprep.subr.bf16.mxu1 %v9187_v48  ;;  %v9189_v24 = vpack.c.bf16 %v7052_v23, %v7044_v7  ;;  %v9229_v48 = vpack.c.bf16 %v7212_v21, %v7204_v20  ;;  %v7221_v7 = vld [vmem:[%s10260_s29 + $0x618] sm:$0xff]  ;;  %v7074_v20 = vld [vmem:[%s10260_s29 + $0x180] sm:$0xff]  ;;  %v7243_v11 = vld [vmem:[%s10260_s29 + $0x6c8] sm:$0xff] }
0x2e1f   : > { %v7229_v23 = vld [vmem:[%s10260_s29 + $0x658] sm:$0xff]  ;;  %v7082_v21 = vld [vmem:[%s10260_s29 + $0x1c0] sm:$0xff] }
0x2e20   : > { %8061 = vmatmul.mubr.msk.f32.gmra.mrb[60].mxu1 %vm1598_vm0, %v6843_v10  ;;  %v9223_v10 = vpack.c.bf16 %v7197_v9, %v7189_v6  ;;  %v7067_v6 = vld [vmem:[%s10260_s29 + $0x148] sm:$0xff]  ;;  %v9125_v9 = vpack.c.bf16 %v7050_v5, %v7042_v4 }
0x2e21   : > { %9190 = vmatpush1.bf16.msra.mxu1 %v9189_v24  ;;  %v9231_v24 = vpack.c.bf16 %v7229_v23, %v7221_v7  ;;  %v7099_v7 = vld [vmem:[%s10260_s29 + $0x248] sm:$0xff]  ;;  %v9133_v23 = vpack.c.bf16 %v7082_v21, %v7074_v20 }
0x2e22   : > { %9192 = vmatprep.subr.bf16.mxu1 %v9191_v0  ;;  %v9233_v0 = vpack.c.bf16 %v7228_v26, %v7220_v25  ;;  %v7090_v25 = vld [vmem:[%s10260_s29 + $0x200] sm:$0xff]  ;;  %v7227_v4 = vld [vmem:[%s10260_s29 + $0x648] sm:$0xff] }
0x2e23   : > { %v7098_v26 = vld [vmem:[%s10260_s29 + $0x240] sm:$0xff]  ;;  %v7259_v20 = vld [vmem:[%s10260_s29 + $0x748] sm:$0xff] }
0x2e25   : > { %9194 = vmatpush1.bf16.msra.mxu1 %v9193_v30  ;;  %v9235_v30 = vpack.c.bf16 %v7245_v29, %v7237_v27  ;;  %v7115_v27 = vld [vmem:[%s10260_s29 + $0x2c8] sm:$0xff]  ;;  %v9137_v29 = vpack.c.bf16 %v7098_v26, %v7090_v25 }
0x2e26   : > { %9196 = vmatprep.subr.bf16.mxu1 %v9195_v35  ;;  %v9237_v35 = vpack.c.bf16 %v7244_v33, %v7236_v31  ;;  %v7106_v31 = vld [vmem:[%s10260_s29 + $0x280] sm:$0xff]  ;;  %v7275_v25 = vld [vmem:[%s10260_s29 + $0x7c8] sm:$0xff] }
0x2e27   : > { %v7114_v33 = vld [vmem:[%s10260_s29 + $0x2c0] sm:$0xff] }
0x2e29   : > { %9198 = vmatpush1.bf16.msra.mxu1 %v9197_v40  ;;  %v9239_v40 = vpack.c.bf16 %v7261_v39, %v7253_v38  ;;  %v7131_v38 = vld [vmem:[%s10260_s29 + $0x348] sm:$0xff]  ;;  %v9141_v39 = vpack.c.bf16 %v7114_v33, %v7106_v31 }
0x2e2a   : > { %9200 = vmatprep.subr.bf16.mxu1 %v9199_v37  ;;  %v9241_v37 = vpack.c.bf16 %v7260_v42, %v7252_v41  ;;  %v7122_v41 = vld [vmem:[%s10260_s29 + $0x300] sm:$0xff]  ;;  %v7031_v31 = vld [vmem:[%s10260_s29 + $0x28] sm:$0xff] }
0x2e2b   : > { %v7130_v42 = vld [vmem:[%s10260_s29 + $0x340] sm:$0xff]  ;;  %v7039_v33 = vld [vmem:[%s10260_s29 + $0x68] sm:$0xff] }
0x2e2d   : > { %9202 = vmatpush1.bf16.msra.mxu1 %v9201_v13  ;;  %v9243_v13 = vpack.c.bf16 %v7277_v22, %v7269_v44  ;;  %v7147_v44 = vld [vmem:[%s10260_s29 + $0x3c8] sm:$0xff]  ;;  %v9145_v22 = vpack.c.bf16 %v7130_v42, %v7122_v41  ;;  %v7030_v41 = vld [vmem:[%s10260_s29 + $0x20] sm:$0xff] }
0x2e2e   : > { %9204 = vmatprep.subr.bf16.mxu1 %v9203_v47  ;;  %v9245_v47 = vpack.c.bf16 %v7276_v15, %v7268_v45  ;;  %v7138_v45 = vld [vmem:[%s10260_s29 + $0x380] sm:$0xff] }
0x2e2f   : > { %v7146_v15 = vld [vmem:[%s10260_s29 + $0x3c0] sm:$0xff] }
0x2e30   : > { %v7038_v42 = vld [vmem:[%s10260_s29 + $0x60] sm:$0xff] }
0x2e31   : > { %9206 = vmatpush1.bf16.msra.mxu1 %v9205_v8  ;;  %v6944_v8 = vld [vmem:[%s10250_s8] sm:$0xff] }
0x2e32   : > { %9208 = vmatprep.subr.bf16.mxu1 %v9207_v52  ;;  %v6947_v52 = vld [vmem:[%s10250_s8 + $0x18] sm:$0xff] }
0x2e35   : > { %9210 = vmatpush1.bf16.msra.mxu1 %v9209_v56 }
0x2e36   : > { %9212 = vmatprep.subr.bf16.mxu1 %v9211_v59  ;;  %v7035_v59 = vld [vmem:[%s10260_s29 + $0x48] sm:$0xff] }
0x2e37   : > { %v9119_v61 = vpack.c.bf16 %v7035_v59, %v7027_v58  ;;  %v7178_v58 = vld [vmem:[%s10260_s29 + $0x4c0] sm:$0xff]  ;;  %v7187_v59 = vld [vmem:[%s10260_s29 + $0x508] sm:$0xff] }
0x2e39   : > { %9214 = vmatpush1.bf16.msra.mxu1 %v9213_v34 }
0x2e3a   : > { %9216 = vmatprep.subr.bf16.mxu1 %v9215_v14  ;;  %v7026_v14 = vld [vmem:[%s10260_s29] sm:$0xff] }
0x2e3b   : > { %v9121_v3 = vpack.c.bf16 %v7034_v62, %v7026_v14  ;;  %v7203_v14 = vld [vmem:[%s10260_s29 + $0x588] sm:$0xff] }
0x2e3c   : > { %v7211_v62 = vld [vmem:[%s10260_s29 + $0x5c8] sm:$0xff] }
0x2e3d   : > { %9218 = vmatpush1.bf16.msra.mxu1 %v9217_v1  ;;  %v7051_v1 = vld [vmem:[%s10260_s29 + $0xc8] sm:$0xff] }
0x2e3e   : > { %9220 = vmatprep.subr.bf16.mxu1 %v9219_v36  ;;  %v9123_v36 = vpack.c.bf16 %v7051_v1, %v7043_v63  ;;  %v9163_v1 = vpack.c.bf16 %v7211_v62, %v7203_v14 }
0x2e41   : > { %9222 = vmatpush1.bf16.msra.mxu1 %v9221_v32  ;;  %v7059_v32 = vld [vmem:[%s10260_s29 + $0x108] sm:$0xff] }
0x2e42   : > { %9224 = vmatprep.subr.bf16.mxu1 %v9223_v10  ;;  %v9127_v10 = vpack.c.bf16 %v7067_v6, %v7059_v32  ;;  %v7218_v6 = vld [vmem:[%s10260_s29 + $0x600] sm:$0xff] }
0x2e45   : > { %9226 = vmatpush1.bf16.msra.mxu1 %v9225_v16  ;;  %v7075_v16 = vld [vmem:[%s10260_s29 + $0x188] sm:$0xff] }
0x2e46   : > { %9228 = vmatprep.subr.bf16.mxu1 %v9227_v19  ;;  %v9131_v19 = vpack.c.bf16 %v7083_v17, %v7075_v16  ;;  %v7234_v17 = vld [vmem:[%s10260_s29 + $0x680] sm:$0xff] }
0x2e49   : > { %9230 = vmatpush1.bf16.msra.mxu1 %v9229_v48  ;;  %v7091_v48 = vld [vmem:[%s10260_s29 + $0x208] sm:$0xff] }
0x2e4a   : > { %9232 = vmatprep.subr.bf16.mxu1 %v9231_v24  ;;  %v9135_v24 = vpack.c.bf16 %v7099_v7, %v7091_v48  ;;  %v7250_v7 = vld [vmem:[%s10260_s29 + $0x700] sm:$0xff] }
0x2e4d   : > { %9234 = vmatpush1.bf16.msra.mxu1 %v9233_v0  ;;  %v7107_v0 = vld [vmem:[%s10260_s29 + $0x288] sm:$0xff] }
0x2e4e   : > { %9236 = vmatprep.subr.bf16.mxu1 %v9235_v30  ;;  %v9139_v30 = vpack.c.bf16 %v7115_v27, %v7107_v0  ;;  %v7266_v27 = vld [vmem:[%s10260_s29 + $0x780] sm:$0xff] }
0x2e51   : > { %9238 = vmatpush1.bf16.msra.mxu1 %v9237_v35  ;;  %v7123_v35 = vld [vmem:[%s10260_s29 + $0x308] sm:$0xff] }
0x2e52   : > { %9240 = vmatprep.subr.bf16.mxu1 %v9239_v40  ;;  %v9143_v40 = vpack.c.bf16 %v7131_v38, %v7123_v35  ;;  %v7033_v35 = vld [vmem:[%s10260_s29 + $0x38] sm:$0xff]  ;;  %v9247_v38 = vpack.c.bf16 %v7039_v33, %v7031_v31 }
0x2e53   : > { %v7121_v31 = vld [vmem:[%s10260_s29 + $0x2f8] sm:$0xff] }
0x2e55   : > { %9242 = vmatpush1.bf16.msra.mxu1 %v9241_v37  ;;  %v7139_v37 = vld [vmem:[%s10260_s29 + $0x388] sm:$0xff] }
0x2e56   : > { %9244 = vmatprep.subr.bf16.mxu1 %v9243_v13  ;;  %v9147_v13 = vpack.c.bf16 %v7147_v44, %v7139_v37  ;;  %v7032_v37 = vld [vmem:[%s10260_s29 + $0x30] sm:$0xff] }
0x2e57   : > { %v7040_v44 = vld [vmem:[%s10260_s29 + $0x70] sm:$0xff] }
0x2e59   : > { %9246 = vmatpush1.bf16.msra.mxu1 %v9245_v47  ;;  %v7155_v47 = vld [vmem:[%s10260_s29 + $0x408] sm:$0xff] }
0x2eef   : > { %v6933_v28 = vpop.f32.mrb[58].mxu1 }
0x2ef0   : > { %v6935_v50 = vpop.f32.mrb[59].mxu1  ;;  %v6948_v55 = vmul.f32 %v6944_v8, %v6933_v28  ;;  %v7163_v28 = vld [vmem:[%s10260_s29 + $0x448] sm:$0xff] }
0x2ef1   : > { %v6949_v60 = vmul.f32 %v6945_v54, %v6935_v50  ;;  %v9149_v50 = vpack.c.bf16 %v7146_v15, %v7138_v45  ;;  %v9151_v8 = vpack.c.bf16 %v7163_v28, %v7155_v47  ;;  %v7162_v54 = vld [vmem:[%s10260_s29 + $0x440] sm:$0xff]  ;;  %v7049_v45 = vld [vmem:[%s10260_s29 + $0xb8] sm:$0xff]  ;;  %v9249_v28 = vpack.c.bf16 %v7038_v42, %v7030_v41  ;;  %v7112_v42 = vld [vmem:[%s10260_s29 + $0x2b0] sm:$0xff] }
0x2ef2   : > { %v7057_v15 = vld [vmem:[%s10260_s29 + $0xf8] sm:$0xff] }
0x2ef3   : > { %v6939_v46 = vpop.f32.mrb[60].mxu1 }
0x2ef4   : > { %v6950_v56 = vmul.f32 %v6946_v51, %v6939_v46  ;;  %v6941_v57 = vpop.f32.mrb[61].mxu1  ;;  %v7154_v51 = vld [vmem:[%s10260_s29 + $0x400] sm:$0xff]  ;;  %v7179_v46 = vld [vmem:[%s10260_s29 + $0x4c8] sm:$0xff] }
0x2ef5   : > { %v6951_v43 = vmul.f32 %v6947_v52, %v6941_v57  ;;  %v7171_v52 = vld [vmem:[%s10260_s29 + $0x488] sm:$0xff]  ;;  %v7170_v57 = vld [vmem:[%s10260_s29 + $0x480] sm:$0xff] }
0x2ef6   : > { %v9117_v34 = vpack.c.bf16 %v6950_v56, %v6948_v55  ;;  %v9153_v55 = vpack.c.bf16 %v7162_v54, %v7154_v51  ;;  %v9155_v56 = vpack.c.bf16 %v7179_v46, %v7171_v52  ;;  %v7054_v51 = vld [vmem:[%s10260_s29 + $0xe0] sm:$0xff]  ;;  %v7048_v52 = vld [vmem:[%s10260_s29 + $0xb0] sm:$0xff] }
0x2ef7   : > { %v9115_v49 = vpack.c.bf16 %v6951_v43, %v6949_v60  ;;  %v7195_v60 = vld [vmem:[%s10260_s29 + $0x548] sm:$0xff]  ;;  %v9157_v43 = vpack.c.bf16 %v7178_v58, %v7170_v57  ;;  %v7056_v46 = vld [vmem:[%s10260_s29 + $0xf0] sm:$0xff]  ;;  %v9315_v57 = vpack.c.bf16 %v7057_v15, %v7049_v45  ;;  %v7137_v45 = vld [vmem:[%s10260_s29 + $0x378] sm:$0xff] }
0x2ef8   : > { %v7071_v58 = vld [vmem:[%s10260_s29 + $0x168] sm:$0xff] }
0x2ef9   : > { %9116 = vmatprep.subr.bf16.mxu0 %v9115_v49  ;;  %v7186_v49 = vld [vmem:[%s10260_s29 + $0x500] sm:$0xff] }
0x2efa   : > { %9118 = vmatpush1.bf16.msra.mxu0 %v9117_v34  ;;  %v9159_v34 = vpack.c.bf16 %v7195_v60, %v7187_v59  ;;  %v7065_v59 = vld [vmem:[%s10260_s29 + $0x138] sm:$0xff] }
0x2efb   : > { %9120 = vmatprep.subr.bf16.mxu0 %v9119_v61  ;;  %v7194_v61 = vld [vmem:[%s10260_s29 + $0x540] sm:$0xff]  ;;  %v7073_v60 = vld [vmem:[%s10260_s29 + $0x178] sm:$0xff] }
0x2efc   : > { %v9161_v63 = vpack.c.bf16 %v7194_v61, %v7186_v49  ;;  %v7062_v49 = vld [vmem:[%s10260_s29 + $0x120] sm:$0xff]  ;;  %v9319_v62 = vpack.c.bf16 %v7073_v60, %v7065_v59 }
0x2efd   : > { %8062 = vmatmul.mubr.msk.f32.vlgmr.msra.gmra.mrb[52].mxu0 %vm1828_vm2, %v6844_v2  ;;  %v7202_v2 = vld [vmem:[%s10260_s29 + $0x580] sm:$0xff] }
0x2efe   : > { %9122 = vmatpush1.bf16.msra.mxu0 %v9121_v3  ;;  %v7210_v3 = vld [vmem:[%s10260_s29 + $0x5c0] sm:$0xff] }
0x2eff   : > { %9124 = vmatprep.subr.bf16.mxu0 %v9123_v36  ;;  %v7219_v36 = vld [vmem:[%s10260_s29 + $0x608] sm:$0xff]  ;;  %v9165_v5 = vpack.c.bf16 %v7210_v3, %v7202_v2  ;;  %v7070_v61 = vld [vmem:[%s10260_s29 + $0x160] sm:$0xff] }
0x2f00   : > { %v9167_v32 = vpack.c.bf16 %v7227_v4, %v7219_v36  ;;  %v7079_v2 = vld [vmem:[%s10260_s29 + $0x1a8] sm:$0xff]  ;;  %v7081_v36 = vld [vmem:[%s10260_s29 + $0x1b8] sm:$0xff] }
0x2f01   : > { %v7087_v3 = vld [vmem:[%s10260_s29 + $0x1e8] sm:$0xff]  ;;  %v7089_v4 = vld [vmem:[%s10260_s29 + $0x1f8] sm:$0xff] }
0x2f02   : > { %9126 = vmatpush1.bf16.msra.mxu0 %v9125_v9  ;;  %v7226_v9 = vld [vmem:[%s10260_s29 + $0x640] sm:$0xff] }
0x2f03   : > { %9128 = vmatprep.subr.bf16.mxu0 %v9127_v10  ;;  %v7235_v10 = vld [vmem:[%s10260_s29 + $0x688] sm:$0xff]  ;;  %v9169_v12 = vpack.c.bf16 %v7226_v9, %v7218_v6  ;;  %v7078_v6 = vld [vmem:[%s10260_s29 + $0x1a0] sm:$0xff] }
0x2f04   : > { %v9171_v16 = vpack.c.bf16 %v7243_v11, %v7235_v10  ;;  %v7086_v9 = vld [vmem:[%s10260_s29 + $0x1e0] sm:$0xff]  ;;  %v9259_v10 = vpack.c.bf16 %v7087_v3, %v7079_v2  ;;  %v9323_v11 = vpack.c.bf16 %v7089_v4, %v7081_v36  ;;  %v7161_v2 = vld [vmem:[%s10260_s29 + $0x438] sm:$0xff] }
0x2f05   : > { %v7169_v3 = vld [vmem:[%s10260_s29 + $0x478] sm:$0xff] }
0x2f06   : > { %9130 = vmatpush1.bf16.msra.mxu0 %v9129_v18  ;;  %v7242_v18 = vld [vmem:[%s10260_s29 + $0x6c0] sm:$0xff] }
0x2f07   : > { %9132 = vmatprep.subr.bf16.mxu0 %v9131_v19  ;;  %v7251_v19 = vld [vmem:[%s10260_s29 + $0x708] sm:$0xff]  ;;  %v9173_v21 = vpack.c.bf16 %v7242_v18, %v7234_v17 }
0x2f08   : > { %v9175_v48 = vpack.c.bf16 %v7259_v20, %v7251_v19  ;;  %v7095_v17 = vld [vmem:[%s10260_s29 + $0x228] sm:$0xff]  ;;  %v7097_v19 = vld [vmem:[%s10260_s29 + $0x238] sm:$0xff] }
0x2f09   : > { %v7103_v18 = vld [vmem:[%s10260_s29 + $0x268] sm:$0xff]  ;;  %v7105_v20 = vld [vmem:[%s10260_s29 + $0x278] sm:$0xff] }
0x2f0a   : > { %9134 = vmatpush1.bf16.msra.mxu0 %v9133_v23  ;;  %v7258_v23 = vld [vmem:[%s10260_s29 + $0x740] sm:$0xff] }
0x2f0b   : > { %9136 = vmatprep.subr.bf16.mxu0 %v9135_v24  ;;  %v7267_v24 = vld [vmem:[%s10260_s29 + $0x788] sm:$0xff]  ;;  %v9177_v26 = vpack.c.bf16 %v7258_v23, %v7250_v7  ;;  %v7094_v7 = vld [vmem:[%s10260_s29 + $0x220] sm:$0xff] }
0x2f0c   : > { %v9179_v0 = vpack.c.bf16 %v7275_v25, %v7267_v24  ;;  %v7102_v23 = vld [vmem:[%s10260_s29 + $0x260] sm:$0xff]  ;;  %v9263_v24 = vpack.c.bf16 %v7103_v18, %v7095_v17  ;;  %v9327_v25 = vpack.c.bf16 %v7105_v20, %v7097_v19  ;;  %v7177_v17 = vld [vmem:[%s10260_s29 + $0x4b8] sm:$0xff] }
0x2f0d   : > { %v9265_v33 = vpack.c.bf16 %v7102_v23, %v7094_v7  ;;  %v7185_v18 = vld [vmem:[%s10260_s29 + $0x4f8] sm:$0xff] }
0x2f0e   : > { %9138 = vmatpush1.bf16.msra.mxu0 %v9137_v29  ;;  %v7274_v29 = vld [vmem:[%s10260_s29 + $0x7c0] sm:$0xff]  ;;  %v9347_v23 = vpack.c.bf16 %v7185_v18, %v7177_v17 }
0x2f0f   : > { %9140 = vmatprep.subr.bf16.mxu0 %v9139_v30  ;;  %v9181_v30 = vpack.c.bf16 %v7274_v29, %v7266_v27  ;;  %v7111_v27 = vld [vmem:[%s10260_s29 + $0x2a8] sm:$0xff] }
0x2f10   : > { %v7119_v29 = vld [vmem:[%s10260_s29 + $0x2e8] sm:$0xff] }
0x2f12   : > { %9142 = vmatpush1.bf16.msra.mxu0 %v9141_v39  ;;  %v7041_v39 = vld [vmem:[%s10260_s29 + $0x78] sm:$0xff] }
0x2f13   : > { %9144 = vmatprep.subr.bf16.mxu0 %v9143_v40  ;;  %v9311_v40 = vpack.c.bf16 %v7041_v39, %v7033_v35  ;;  %v7118_v39 = vld [vmem:[%s10260_s29 + $0x2e0] sm:$0xff] }
0x2f15   : > { %9312 = vmatprep.subr.bf16.mxu1 %v9311_v40  ;;  %v9267_v40 = vpack.c.bf16 %v7119_v29, %v7111_v27  ;;  %v7193_v27 = vld [vmem:[%s10260_s29 + $0x538] sm:$0xff] }
0x2f16   : > { %9146 = vmatpush1.bf16.msra.mxu0 %v9145_v22  ;;  %v7047_v22 = vld [vmem:[%s10260_s29 + $0xa8] sm:$0xff]  ;;  %v7201_v29 = vld [vmem:[%s10260_s29 + $0x578] sm:$0xff] }
0x2f17   : > { %9148 = vmatprep.subr.bf16.mxu0 %v9147_v13  ;;  %v7055_v13 = vld [vmem:[%s10260_s29 + $0xe8] sm:$0xff] }
0x2f1a   : > { %9150 = vmatpush1.bf16.msra.mxu0 %v9149_v50  ;;  %v9313_v50 = vpack.c.bf16 %v7040_v44, %v7032_v37  ;;  %v7120_v37 = vld [vmem:[%s10260_s29 + $0x2f0] sm:$0xff]  ;;  %v7127_v44 = vld [vmem:[%s10260_s29 + $0x328] sm:$0xff] }
0x2f1b   : > { %9152 = vmatprep.subr.bf16.mxu0 %v9151_v8  ;;  %v7046_v8 = vld [vmem:[%s10260_s29 + $0xa0] sm:$0xff] }
0x2f1e   : > { %9154 = vmatpush1.bf16.msra.mxu0 %v9153_v55  ;;  %v7063_v55 = vld [vmem:[%s10260_s29 + $0x128] sm:$0xff] }
0x2f1f   : > { %9156 = vmatprep.subr.bf16.mxu0 %v9155_v56  ;;  %v9251_v56 = vpack.c.bf16 %v7055_v13, %v7047_v22  ;;  %v9255_v14 = vpack.c.bf16 %v7071_v58, %v7063_v55  ;;  %v7135_v22 = vld [vmem:[%s10260_s29 + $0x368] sm:$0xff]  ;;  %v7129_v13 = vld [vmem:[%s10260_s29 + $0x338] sm:$0xff] }
0x2f20   : > { %v7143_v55 = vld [vmem:[%s10260_s29 + $0x3a8] sm:$0xff]  ;;  %v7153_v58 = vld [vmem:[%s10260_s29 + $0x3f8] sm:$0xff] }
0x2f22   : > { %9158 = vmatpush1.bf16.msra.mxu0 %v9157_v43  ;;  %v9253_v43 = vpack.c.bf16 %v7054_v51, %v7046_v8  ;;  %v7134_v8 = vld [vmem:[%s10260_s29 + $0x360] sm:$0xff]  ;;  %v9271_v51 = vpack.c.bf16 %v7135_v22, %v7127_v44  ;;  %v7209_v44 = vld [vmem:[%s10260_s29 + $0x5b8] sm:$0xff] }
0x2f23   : > { %9160 = vmatprep.subr.bf16.mxu0 %v9159_v34  ;;  %v9317_v34 = vpack.c.bf16 %v7056_v46, %v7048_v52  ;;  %v7128_v52 = vld [vmem:[%s10260_s29 + $0x330] sm:$0xff]  ;;  %v7217_v22 = vld [vmem:[%s10260_s29 + $0x5f8] sm:$0xff] }
0x2f24   : > { %v7136_v46 = vld [vmem:[%s10260_s29 + $0x370] sm:$0xff] }
0x2f25   : > { %v9337_v60 = vpack.c.bf16 %v7136_v46, %v7128_v52  ;;  %v7223_v52 = vld [vmem:[%s10260_s29 + $0x628] sm:$0xff] }
0x2f26   : > { %9162 = vmatpush1.bf16.msra.mxu0 %v9161_v63  ;;  %v7064_v63 = vld [vmem:[%s10260_s29 + $0x130] sm:$0xff]  ;;  %v7231_v46 = vld [vmem:[%s10260_s29 + $0x668] sm:$0xff] }
0x2f27   : > { %9164 = vmatprep.subr.bf16.mxu0 %v9163_v1  ;;  %v7072_v1 = vld [vmem:[%s10260_s29 + $0x170] sm:$0xff] }
0x2f2a   : > { %9166 = vmatpush1.bf16.msra.mxu0 %v9165_v5  ;;  %v9257_v5 = vpack.c.bf16 %v7070_v61, %v7062_v49 }
0x2f2b   : > { %9168 = vmatprep.subr.bf16.mxu0 %v9167_v32  ;;  %v9321_v32 = vpack.c.bf16 %v7072_v1, %v7064_v63  ;;  %v7159_v63 = vld [vmem:[%s10260_s29 + $0x428] sm:$0xff] }
0x2f2c   : > { %v7167_v1 = vld [vmem:[%s10260_s29 + $0x468] sm:$0xff] }
0x2f2e   : > { %9170 = vmatpush1.bf16.msra.mxu0 %v9169_v12  ;;  %v7080_v12 = vld [vmem:[%s10260_s29 + $0x1b0] sm:$0xff] }
0x2f2f   : > { %9172 = vmatprep.subr.bf16.mxu0 %v9171_v16  ;;  %v7088_v16 = vld [vmem:[%s10260_s29 + $0x1f0] sm:$0xff] }
0x2f32   : > { %9174 = vmatpush1.bf16.msra.mxu0 %v9173_v21  ;;  %v9261_v21 = vpack.c.bf16 %v7086_v9, %v7078_v6  ;;  %v9279_v6 = vpack.c.bf16 %v7167_v1, %v7159_v63  ;;  %v9343_v9 = vpack.c.bf16 %v7169_v3, %v7161_v2  ;;  %v7241_v63 = vld [vmem:[%s10260_s29 + $0x6b8] sm:$0xff] }
0x2f33   : > { %9176 = vmatprep.subr.bf16.mxu0 %v9175_v48  ;;  %v9325_v48 = vpack.c.bf16 %v7088_v16, %v7080_v12  ;;  %v7175_v12 = vld [vmem:[%s10260_s29 + $0x4a8] sm:$0xff]  ;;  %v7249_v1 = vld [vmem:[%s10260_s29 + $0x6f8] sm:$0xff] }
0x2f34   : > { %v7183_v16 = vld [vmem:[%s10260_s29 + $0x4e8] sm:$0xff] }
0x2f35   : > { %v9283_v7 = vpack.c.bf16 %v7183_v16, %v7175_v12  ;;  %v7257_v12 = vld [vmem:[%s10260_s29 + $0x738] sm:$0xff] }
0x2f36   : > { %9178 = vmatpush1.bf16.msra.mxu0 %v9177_v26  ;;  %v7096_v26 = vld [vmem:[%s10260_s29 + $0x230] sm:$0xff]  ;;  %v7265_v16 = vld [vmem:[%s10260_s29 + $0x778] sm:$0xff] }
0x2f37   : > { %9180 = vmatprep.subr.bf16.mxu0 %v9179_v0  ;;  %v7104_v0 = vld [vmem:[%s10260_s29 + $0x270] sm:$0xff] }
0x2f38   : > { %v9329_v35 = vpack.c.bf16 %v7104_v0, %v7096_v26  ;;  %v7191_v26 = vld [vmem:[%s10260_s29 + $0x528] sm:$0xff] }
0x2f39   : > { %v7199_v0 = vld [vmem:[%s10260_s29 + $0x568] sm:$0xff] }
0x2f3a   : > { %9182 = vmatpush1.bf16.msra.mxu0 %v9181_v30  ;;  %v7113_v30 = vld [vmem:[%s10260_s29 + $0x2b8] sm:$0xff] }
0x2f3b   : > { %9248 = vmatprep.subr.bf16.mxu0 %v9247_v38  ;;  %v7110_v38 = vld [vmem:[%s10260_s29 + $0x2a0] sm:$0xff]  ;;  %v9331_v41 = vpack.c.bf16 %v7121_v31, %v7113_v30 }
0x2f3c   : > { %v9269_v15 = vpack.c.bf16 %v7118_v39, %v7110_v38  ;;  %v9287_v38 = vpack.c.bf16 %v7199_v0, %v7191_v26  ;;  %v9351_v39 = vpack.c.bf16 %v7201_v29, %v7193_v27  ;;  %v7273_v26 = vld [vmem:[%s10260_s29 + $0x7b8] sm:$0xff] }
0x2f3d   : > { %v7281_v0 = vld [vmem:[%s10260_s29 + $0x7f8] sm:$0xff] }
0x2fd0   : > { %v11209_v47 = vpop.f32.mrb[52].mxu0 }
0x2fd1   : > { %v7023_v54 = vpop.f32.mrb[53].mxu0 }
0x2fd2   : > { %7346 = vmatprep.mubr.f32.mxu0 %v7023_v54  ;;  %7417 = vmatprep.mubr.f32.mxu1 %v7023_v54 }
0x2fd3   : > { %7347 = vmatmul.mubr.f32.vlgmr.msra.gmra.mrb[54].mxu0 %v11209_v47  ;;  %7418 = vmatmul.mubr.f32.vlgmr.msra.gmra.mrb[62].mxu1 %v11209_v47 }
0x2fd4   : > { %9250 = vmatpush1.bf16.msra.mxu0 %v9249_v28  ;;  %9314 = vmatpush1.bf16.msra.mxu1 %v9313_v50  ;;  %v9333_v28 = vpack.c.bf16 %v7120_v37, %v7112_v42  ;;  %v7126_v50 = vld [vmem:[%s10260_s29 + $0x320] sm:$0xff]  ;;  %v7207_v42 = vld [vmem:[%s10260_s29 + $0x5a8] sm:$0xff] }
0x2fd5   : > { %7488 = vmatprep.mubr.f32.mxu0 %v7023_v54  ;;  %7559 = vmatprep.mubr.f32.mxu1 %v7023_v54  ;;  %v9335_v54 = vpack.c.bf16 %v7137_v45, %v7129_v13  ;;  %v9273_v59 = vpack.c.bf16 %v7134_v8, %v7126_v50  ;;  %v7215_v37 = vld [vmem:[%s10260_s29 + $0x5e8] sm:$0xff]  ;;  %v9355_v8 = vpack.c.bf16 %v7217_v22, %v7209_v44 }
0x2fd6   : > { %9252 = vmatprep.subr.bf16.mxu0 %v9251_v56  ;;  %9316 = vmatprep.subr.bf16.mxu1 %v9315_v57  ;;  %v7151_v56 = vld [vmem:[%s10260_s29 + $0x3e8] sm:$0xff]  ;;  %v7145_v57 = vld [vmem:[%s10260_s29 + $0x3b8] sm:$0xff]  ;;  %v9291_v50 = vpack.c.bf16 %v7215_v37, %v7207_v42  ;;  %v10016_v42 = vmov 1966171168  }
0x2fd7   : > { %v9275_v49 = vpack.c.bf16 %v7151_v56, %v7143_v55  ;;  %v9339_v61 = vpack.c.bf16 %v7153_v58, %v7145_v57  ;;  %v7225_v55 = vld [vmem:[%s10260_s29 + $0x638] sm:$0xff]  ;;  %v7579_v37 = vunpack.c.l.s4 %v10016_v42 }
0x2fd8   : > { %9254 = vmatpush1.bf16.msra.mxu0 %v9253_v43  ;;  %9318 = vmatpush1.bf16.msra.mxu1 %v9317_v34  ;;  %v7142_v43 = vld [vmem:[%s10260_s29 + $0x3a0] sm:$0xff]  ;;  %v7233_v56 = vld [vmem:[%s10260_s29 + $0x678] sm:$0xff] }
0x2fd9   : > { %9256 = vmatprep.subr.bf16.mxu0 %v9255_v14  ;;  %9320 = vmatprep.subr.bf16.mxu1 %v9319_v62  ;;  %v7150_v34 = vld [vmem:[%s10260_s29 + $0x3e0] sm:$0xff]  ;;  %v7144_v14 = vld [vmem:[%s10260_s29 + $0x3b0] sm:$0xff]  ;;  %v7580_v44 = vunpack.c.0.s8 %v7579_v37 }
0x2fda   : > { %v7152_v62 = vld [vmem:[%s10260_s29 + $0x3f0] sm:$0xff]  ;;  %v9277_v36 = vpack.c.bf16 %v7150_v34, %v7142_v43  ;;  %v9295_v43 = vpack.c.bf16 %v7231_v46, %v7223_v52  ;;  %v9359_v34 = vpack.c.bf16 %v7233_v56, %v7225_v55 }
0x2fdb   : > { %v9341_v4 = vpack.c.bf16 %v7152_v62, %v7144_v14  ;;  %v7239_v14 = vld [vmem:[%s10260_s29 + $0x6a8] sm:$0xff]  ;;  %v7583_v22 = vsub.s32 %v7580_v44, %v11058_v53 }
0x2fdc   : > { %9258 = vmatpush1.bf16.msra.mxu0 %v9257_v5  ;;  %9322 = vmatpush1.bf16.msra.mxu1 %v9321_v32  ;;  %v7158_v5 = vld [vmem:[%s10260_s29 + $0x420] sm:$0xff]  ;;  %v7247_v62 = vld [vmem:[%s10260_s29 + $0x6e8] sm:$0xff] }
0x2fdd   : > { %9260 = vmatprep.subr.bf16.mxu0 %v9259_v10  ;;  %9324 = vmatprep.subr.bf16.mxu1 %v9323_v11  ;;  %v7166_v32 = vld [vmem:[%s10260_s29 + $0x460] sm:$0xff]  ;;  %v7160_v10 = vld [vmem:[%s10260_s29 + $0x430] sm:$0xff] }
0x2fde   : > { %v7168_v11 = vld [vmem:[%s10260_s29 + $0x470] sm:$0xff]  ;;  %v9281_v19 = vpack.c.bf16 %v7166_v32, %v7158_v5  ;;  %v9299_v5 = vpack.c.bf16 %v7247_v62, %v7239_v14  ;;  %v9363_v32 = vpack.c.bf16 %v7249_v1, %v7241_v63 }
0x2fdf   : > { %v9345_v20 = vpack.c.bf16 %v7168_v11, %v7160_v10  ;;  %v7255_v10 = vld [vmem:[%s10260_s29 + $0x728] sm:$0xff] }
0x2fe0   : > { %9262 = vmatpush1.bf16.msra.mxu0 %v9261_v21  ;;  %9326 = vmatpush1.bf16.msra.mxu1 %v9325_v48  ;;  %v7174_v21 = vld [vmem:[%s10260_s29 + $0x4a0] sm:$0xff]  ;;  %v7263_v11 = vld [vmem:[%s10260_s29 + $0x768] sm:$0xff] }
0x2fe1   : > { %9264 = vmatprep.subr.bf16.mxu0 %v9263_v24  ;;  %9328 = vmatprep.subr.bf16.mxu1 %v9327_v25  ;;  %v7182_v48 = vld [vmem:[%s10260_s29 + $0x4e0] sm:$0xff]  ;;  %v7176_v24 = vld [vmem:[%s10260_s29 + $0x4b0] sm:$0xff] }
0x2fe2   : > { %v7184_v25 = vld [vmem:[%s10260_s29 + $0x4f0] sm:$0xff]  ;;  %v9285_v30 = vpack.c.bf16 %v7182_v48, %v7174_v21  ;;  %v9303_v21 = vpack.c.bf16 %v7263_v11, %v7255_v10  ;;  %v9367_v48 = vpack.c.bf16 %v7265_v16, %v7257_v12 }
0x2fe3   : > { %v9349_v31 = vpack.c.bf16 %v7184_v25, %v7176_v24  ;;  %v7271_v24 = vld [vmem:[%s10260_s29 + $0x7a8] sm:$0xff] }
0x2fe4   : > { %9266 = vmatpush1.bf16.msra.mxu0 %v9265_v33  ;;  %9330 = vmatpush1.bf16.msra.mxu1 %v9329_v35  ;;  %v7190_v33 = vld [vmem:[%s10260_s29 + $0x520] sm:$0xff]  ;;  %v7279_v25 = vld [vmem:[%s10260_s29 + $0x7e8] sm:$0xff] }
0x2fe5   : > { %9268 = vmatprep.subr.bf16.mxu0 %v9267_v40  ;;  %9332 = vmatprep.subr.bf16.mxu1 %v9331_v41  ;;  %v7198_v35 = vld [vmem:[%s10260_s29 + $0x560] sm:$0xff]  ;;  %v7192_v40 = vld [vmem:[%s10260_s29 + $0x530] sm:$0xff] }
0x2fe6   : > { %v7200_v41 = vld [vmem:[%s10260_s29 + $0x570] sm:$0xff]  ;;  %v9289_v13 = vpack.c.bf16 %v7198_v35, %v7190_v33  ;;  %v9371_v33 = vpack.c.bf16 %v7281_v0, %v7273_v26  ;;  %v7278_v35 = vld [vmem:[%s10260_s29 + $0x7e0] sm:$0xff] }
0x2fe7   : > { %v9353_v45 = vpack.c.bf16 %v7200_v41, %v7192_v40 }
0x2fe8   : > { %9270 = vmatpush1.bf16.msra.mxu0 %v9269_v15  ;;  %9334 = vmatpush1.bf16.msra.mxu1 %v9333_v28  ;;  %v7206_v15 = vld [vmem:[%s10260_s29 + $0x5a0] sm:$0xff] }
0x2fe9   : > { %9272 = vmatprep.subr.bf16.mxu0 %v9271_v51  ;;  %9336 = vmatprep.subr.bf16.mxu1 %v9335_v54  ;;  %v7214_v28 = vld [vmem:[%s10260_s29 + $0x5e0] sm:$0xff]  ;;  %v7208_v51 = vld [vmem:[%s10260_s29 + $0x5b0] sm:$0xff] }
0x2fea   : > { %v7216_v54 = vld [vmem:[%s10260_s29 + $0x5f0] sm:$0xff]  ;;  %v9293_v57 = vpack.c.bf16 %v7214_v28, %v7206_v15 }
0x2feb   : > { %v9357_v58 = vpack.c.bf16 %v7216_v54, %v7208_v51 }
0x2fec   : > { %9274 = vmatpush1.bf16.msra.mxu0 %v9273_v59  ;;  %9338 = vmatpush1.bf16.msra.mxu1 %v9337_v60  ;;  %v7222_v59 = vld [vmem:[%s10260_s29 + $0x620] sm:$0xff] }
0x2fed   : > { %9276 = vmatprep.subr.bf16.mxu0 %v9275_v49  ;;  %9340 = vmatprep.subr.bf16.mxu1 %v9339_v61  ;;  %v7230_v60 = vld [vmem:[%s10260_s29 + $0x660] sm:$0xff]  ;;  %v7224_v49 = vld [vmem:[%s10260_s29 + $0x630] sm:$0xff] }
0x2fee   : > { %v7232_v61 = vld [vmem:[%s10260_s29 + $0x670] sm:$0xff]  ;;  %v9297_v2 = vpack.c.bf16 %v7230_v60, %v7222_v59 }
0x2fef   : > { %v9361_v3 = vpack.c.bf16 %v7232_v61, %v7224_v49 }
0x2ff0   : > { %9278 = vmatpush1.bf16.msra.mxu0 %v9277_v36  ;;  %9342 = vmatpush1.bf16.msra.mxu1 %v9341_v4  ;;  %v7238_v36 = vld [vmem:[%s10260_s29 + $0x6a0] sm:$0xff] }
0x2ff1   : > { %9280 = vmatprep.subr.bf16.mxu0 %v9279_v6  ;;  %9344 = vmatprep.subr.bf16.mxu1 %v9343_v9  ;;  %v7246_v4 = vld [vmem:[%s10260_s29 + $0x6e0] sm:$0xff]  ;;  %v7240_v6 = vld [vmem:[%s10260_s29 + $0x6b0] sm:$0xff] }
0x2ff2   : > { %v7248_v9 = vld [vmem:[%s10260_s29 + $0x6f0] sm:$0xff]  ;;  %v9301_v17 = vpack.c.bf16 %v7246_v4, %v7238_v36 }
0x2ff3   : > { %v9365_v18 = vpack.c.bf16 %v7248_v9, %v7240_v6 }
0x2ff4   : > { %9282 = vmatpush1.bf16.msra.mxu0 %v9281_v19  ;;  %9346 = vmatpush1.bf16.msra.mxu1 %v9345_v20  ;;  %v7254_v19 = vld [vmem:[%s10260_s29 + $0x720] sm:$0xff] }
0x2ff5   : > { %9284 = vmatprep.subr.bf16.mxu0 %v9283_v7  ;;  %9348 = vmatprep.subr.bf16.mxu1 %v9347_v23  ;;  %v7262_v20 = vld [vmem:[%s10260_s29 + $0x760] sm:$0xff]  ;;  %v7256_v7 = vld [vmem:[%s10260_s29 + $0x730] sm:$0xff] }
0x2ff6   : > { %v7264_v23 = vld [vmem:[%s10260_s29 + $0x770] sm:$0xff]  ;;  %v9305_v27 = vpack.c.bf16 %v7262_v20, %v7254_v19 }
0x2ff7   : > { %v9369_v29 = vpack.c.bf16 %v7264_v23, %v7256_v7 }
0x2ff8   : > { %9286 = vmatpush1.bf16.msra.mxu0 %v9285_v30  ;;  %9350 = vmatpush1.bf16.msra.mxu1 %v9349_v31  ;;  %v7270_v30 = vld [vmem:[%s10260_s29 + $0x7a0] sm:$0xff]  ;;  %v9307_v31 = vpack.c.bf16 %v7279_v25, %v7271_v24 }
0x2ff9   : > { %9288 = vmatprep.subr.bf16.mxu0 %v9287_v38  ;;  %9352 = vmatprep.subr.bf16.mxu1 %v9351_v39  ;;  %v7272_v38 = vld [vmem:[%s10260_s29 + $0x7b0] sm:$0xff]  ;;  %v9309_v40 = vpack.c.bf16 %v7278_v35, %v7270_v30 }
0x2ffa   : > { %v7280_v39 = vld [vmem:[%s10260_s29 + $0x7f0] sm:$0xff] }
0x2ffb   : > { %v9373_v41 = vpack.c.bf16 %v7280_v39, %v7272_v38 }
0x2ffc   : > { %9290 = vmatpush1.bf16.msra.mxu0 %v9289_v13  ;;  %9354 = vmatpush1.bf16.msra.mxu1 %v9353_v45 }
0x2ffd   : > { %9292 = vmatprep.subr.bf16.mxu0 %v9291_v50  ;;  %9356 = vmatprep.subr.bf16.mxu1 %v9355_v8 }
0x3000   : > { %9294 = vmatpush1.bf16.msra.mxu0 %v9293_v57  ;;  %9358 = vmatpush1.bf16.msra.mxu1 %v9357_v58 }
0x3001   : > { %9296 = vmatprep.subr.bf16.mxu0 %v9295_v43  ;;  %9360 = vmatprep.subr.bf16.mxu1 %v9359_v34 }
0x3004   : > { %9298 = vmatpush1.bf16.msra.mxu0 %v9297_v2  ;;  %9362 = vmatpush1.bf16.msra.mxu1 %v9361_v3 }
0x3005   : > { %9300 = vmatprep.subr.bf16.mxu0 %v9299_v5  ;;  %9364 = vmatprep.subr.bf16.mxu1 %v9363_v32 }
0x3008   : > { %9302 = vmatpush1.bf16.msra.mxu0 %v9301_v17  ;;  %9366 = vmatpush1.bf16.msra.mxu1 %v9365_v18 }
0x3009   : > { %9304 = vmatprep.subr.bf16.mxu0 %v9303_v21  ;;  %9368 = vmatprep.subr.bf16.mxu1 %v9367_v48 }
0x300c   : > { %9306 = vmatpush1.bf16.msra.mxu0 %v9305_v27  ;;  %9370 = vmatpush1.bf16.msra.mxu1 %v9369_v29 }
0x300d   : > { %9308 = vmatprep.subr.bf16.mxu0 %v9307_v31  ;;  %9372 = vmatprep.subr.bf16.mxu1 %v9371_v33 }
0x3010   : > { %9310 = vmatpush1.bf16.msra.mxu0 %v9309_v40  ;;  %9374 = vmatpush1.bf16.msra.mxu1 %v9373_v41 }
0x3013   : > { %7489 = vmatmul.mubr.f32.vlgmr.msra.gmra.mrb[56].mxu0 %v11209_v47  ;;  %7560 = vmatmul.mubr.f32.vlgmr.msra.gmra.mrb[64].mxu1 %v11209_v47 }
0x30a6   : > { %v7348_v13 = vpop.f32.mrb[54].mxu0  ;;  %v7419_v45 = vpop.f32.mrb[62].mxu1 }
0x30a7   : > { %v7350_v15 = vpop.f32.mrb[55].mxu0  ;;  %v7421_v28 = vpop.f32.mrb[63].mxu1 }
0x30a8   : > { %v7574_v50 = vcombine.low %v7348_v13, %v7350_v15  ;;  %v7575_v8 = vcombine.low %v7419_v45, %v7421_v28 }
0x30aa   : > { %v7584_v51 = vrot.slane %v7574_v50, %v7583_v22  ;;  %v7591_v54 = vrot.slane %v7575_v8, %v7583_v22 }
0x30ac   : > { %v7606_v52 = vcombine.low %v7584_v51, %v7591_v54 }
0x30ae   : > { %v7614_v46 = vrot.slane %v7606_v52, %v7583_v22 }
0x30e6   : > { %v7490_v55 = vpop.f32.mrb[56].mxu0  ;;  %v7561_v56 = vpop.f32.mrb[64].mxu1 }
0x30e7   : > { %v7492_v47 = vpop.f32.mrb[57].mxu0  ;;  %v7563_v57 = vpop.f32.mrb[65].mxu1 }
0x30e8   : > { %v7576_v58 = vcombine.low %v7490_v55, %v7492_v47  ;;  %v7577_v59 = vcombine.low %v7561_v56, %v7563_v57 }
0x30ea   : > { %v7598_v60 = vrot.slane %v7576_v58, %v7583_v22  ;;  %v7605_v53 = vrot.slane %v7577_v59, %v7583_v22 }
0x30ec   : > { %v7607_v43 = vcombine.low %v7598_v60, %v7605_v53 }
0x30ee   : > { %v7621_v34 = vrot.slane %v7607_v43, %v7583_v22 }
0x30f0   : > { %v7622_v49 = vcombine.low %v7614_v46, %v7621_v34 }
0x30f2   : > { %7624 = vst [vmem:[%s1562_s1] sm:$0xff] %v7622_v49 }
0x30f3 PF: > { %s112_s28 = sadd.s32 1, %s9949_s28  }
0x30f4   : > { %p109_p9 = scmp.ge.s32.totalorder %s112_s28, 4  }
0x30f6   :  { %111 = sbr.rel (!%p109_p9) target bundleno = 90 (0x5a), region = 345 }
0x30fd   :  { %7644 = vsyncpa [#allocation3], 1 }
0x30fe   :  { %7646 = vsyncpa [#allocation3 + $0x1], 1 }
0x30ff   :  { %7647 = vsyncpa [#allocation5], 1 }
0x3100   :  { %7648 = vsyncpa [#allocation8], 1 }
0x3101   :  { %7649 = vsyncpa [#allocation11], 1 }
0x3102   :  { %7650 = vsyncpa [#allocation14], 1 }

</bundles_post_ra>
